<compile_context>
chip_gen: v7x
topology: tpu7x:2x2x1
jax: 0.10.0
libtpu: 0.0.40
codegen_flags: <defaults>
</compile_context>

<pallas_src>
import numpy as np

import jax
import jax.numpy as jnp
from jax.experimental import pallas as pl
from jax.experimental.pallas import tpu as pltpu


# ---------------------------------------------------------------------------
# Fused forward kernel (one batch sample per grid step)
# ---------------------------------------------------------------------------
def _fused_forward_kernel(p_ref, w1_ref, vec_ref, msk_ref, sel_ref,
                          w2_ref, wf1_ref, wf2_ref, o_ref):
    f32 = jnp.float32
    bf16 = jnp.bfloat16

    # Packed per-channel vectors (all (1,128), f32).
    gn_g = vec_ref[0:1, :]
    gn_b = vec_ref[1:2, :]
    b2 = vec_ref[2:3, :]
    bf1 = vec_ref[3:4, :]
    bf2 = vec_ref[4:5, :]

    # ---- conv1 (3->16, 8x8, stride 2, pad 3, no bias) ----------------------
    # p_ref[0]: (196, 192) = (14*14 output positions, 3*8*8 taps), bf16.
    a1 = jnp.dot(p_ref[0], w1_ref[...], preferred_element_type=f32)   # (196,128)

    # ---- max_pool2d(2, stride=1): 14x14 -> 13x13, then ReLU ----------------
    # Rows are flattened as r = oh*14 + ow; neighbours are r, r+1, r+14, r+15.
    # Rows with r % 14 == 13 are junk and never read downstream.
    z1 = jnp.maximum(jnp.maximum(a1[0:181], a1[1:182]),
                     jnp.maximum(a1[14:195], a1[15:196]))             # (181,128)
    z1 = jnp.maximum(z1, 0.0)                                         # ReLU

    # ---- GroupNorm(16, 16) == per-(sample, channel) norm over 169 pixels --
    m = msk_ref[...]                                                  # (181,128)
    mean = jnp.sum(z1 * m, axis=0, keepdims=True) * (1.0 / 169.0)     # (1,128)
    cen = z1 - mean
    cm = cen * m
    var = jnp.sum(cm * cm, axis=0, keepdims=True) * (1.0 / 169.0)
    inv = jax.lax.rsqrt(var + 1e-5)
    g = cen * (inv * gn_g) + gn_b                                     # (181,128)
    gb = g.astype(bf16)

    # ---- conv2 (16->32, 4x4, stride 2) + bias ------------------------------
    # In-kernel im2col: one 0/1 selection matmul gathers, for each of the 16
    # kernel taps, the 25 (=5x5) stride-2 source rows of g into 32-row blocks.
    sp = jnp.dot(sel_ref[...], gb, preferred_element_type=f32)        # (512,128)
    spb = sp.astype(bf16)
    acc = jnp.broadcast_to(b2, (32, 128))                             # bias init
    for kpos in range(16):
        acc = acc + jnp.dot(spb[kpos * 32:(kpos + 1) * 32, :], w2_ref[kpos],
                            preferred_element_type=f32)
    # rows 0..24 of acc hold the 5x5 output map

    # ---- max_pool2d(2, stride=1): 5x5 -> 4x4, then ReLU --------------------
    # r = oh*5 + ow; neighbours r, r+1, r+5, r+6.  Rows r % 5 == 4 are junk.
    z2 = jnp.maximum(jnp.maximum(acc[0:19], acc[1:20]),
                     jnp.maximum(acc[5:24], acc[6:25]))               # (19,128)
    z2 = jnp.maximum(z2, 0.0)                                         # ReLU
    z2b = z2.astype(bf16)

    # ---- fc1 (512 -> 32) + ReLU --------------------------------------------
    # torch's .view(-1, 512) (C,H,W-major) flatten order is folded into wf1's
    # packing, so fc1 is a sum of one small matmul per pooled (h, w).
    f1 = bf1                                                          # (1,128)
    for h in range(4):
        for w in range(4):
            r = h * 5 + w
            f1 = f1 + jnp.dot(z2b[r:r + 1, :], wf1_ref[h * 4 + w],
                              preferred_element_type=f32)
    f1 = jnp.maximum(f1, 0.0)                                         # (1,128)

    # ---- fc2 (32 -> 10, lanes 10..127 stay zero) ---------------------------
    o_ref[0] = jnp.dot(f1.astype(bf16), wf2_ref[...],
                       preferred_element_type=f32) + bf2              # (1,128)


# ---------------------------------------------------------------------------
# Wrapper-side glue (boundary only): conv1 im2col with static slices
# ---------------------------------------------------------------------------
def _conv1_patches(x):
    """(B,3,28,28) -> (B,196,192) conv1 im2col patches (static slices only)."""
    B = x.shape[0]
    xh = jnp.transpose(x, (0, 2, 3, 1))                    # NHWC (B,28,28,3)
    xp = jnp.pad(xh, ((0, 0), (3, 3), (3, 3), (0, 0)))     # (B,34,34,3)
    pieces = [xp[:, ki:ki + 27:2, kj:kj + 27:2, :]         # (B,14,14,3) each
              for ki in range(8) for kj in range(8)]
    p = jnp.stack(pieces, axis=3)                          # (B,14,14,64,3)
    p = jnp.transpose(p, (0, 1, 2, 4, 3))                  # (B,14,14,3,64)
    return p.reshape(B, 196, 192)                          # col = c*64 + ki*8 + kj


@jax.jit
def sample_convnet_forward(packed, x):
    B = x.shape[0]
    patches = _conv1_patches(x).astype(jnp.bfloat16)

    rep2 = lambda b: (0, 0)
    rep3 = lambda b: (0, 0, 0)

    out = pl.pallas_call(
        _fused_forward_kernel,
        out_shape=jax.ShapeDtypeStruct((B, 1, 128), jnp.float32),
        grid_spec=pltpu.PrefetchScalarGridSpec(
            num_scalar_prefetch=0,
            grid=(B,),
            in_specs=[
                pl.BlockSpec((1, 196, 192), lambda b: (b, 0, 0)),   # conv1 patches
                pl.BlockSpec((192, 128), rep2),                     # w1
                pl.BlockSpec((8, 128), rep2),                       # packed vectors
                pl.BlockSpec((181, 128), rep2),                     # pool-validity mask
                pl.BlockSpec((512, 181), rep2),                     # conv2 selection
                pl.BlockSpec((16, 128, 128), rep3),                 # w2
                pl.BlockSpec((16, 128, 128), rep3),                 # wf1
                pl.BlockSpec((128, 128), rep2),                     # wf2
            ],
            out_specs=pl.BlockSpec((1, 1, 128), lambda b: (b, 0, 0)),
        ),
        compiler_params=pltpu.CompilerParams(
            dimension_semantics=("parallel",)),
    )(patches, packed["w1"], packed["vecs"], packed["mask"],
      packed["sel2"], packed["w2"], packed["wf1"], packed["wf2"])
    return out[:, 0, :10]


# ---------------------------------------------------------------------------
# Parameters: torch-shaped init + one-time packing (pad/transpose hoisted)
# ---------------------------------------------------------------------------
def init_params(key):
    ks = jax.random.split(key, 7)

    def u(k, shape, fan_in):
        bound = 1.0 / jnp.sqrt(float(fan_in))
        return jax.random.uniform(k, shape, jnp.float32, -bound, bound)

    return {
        "conv1_w": u(ks[0], (16, 3, 8, 8), 3 * 8 * 8),    # Conv2d(3,16,8,2,pad=3,bias=False)
        "conv2_w": u(ks[1], (32, 16, 4, 4), 16 * 4 * 4),  # Conv2d(16,32,4,2)
        "conv2_b": u(ks[2], (32,), 16 * 4 * 4),
        "fc1_w": u(ks[3], (32, 512), 512),                # Linear(512, 32)
        "fc1_b": u(ks[4], (32,), 512),
        "fc2_w": u(ks[5], (10, 32), 32),                  # Linear(32, 10)
        "fc2_b": u(ks[6], (32,) if False else (10,), 32),
        "gn_w": jnp.ones((16,), jnp.float32),             # GroupNorm affine init
        "gn_b": jnp.zeros((16,), jnp.float32),
    }


def pack_params(p):
    f32, bf16 = jnp.float32, jnp.bfloat16

    # conv1: (16,3,8,8) -> im2col weight (3*8*8, 16), Cout padded to 128.
    w1 = jnp.transpose(p["conv1_w"], (1, 2, 3, 0)).reshape(192, 16)
    w1 = jnp.pad(w1, ((0, 0), (0, 112))).astype(bf16)

    # Packed (8,128) f32: rows = gn gamma, gn beta, conv2 bias, fc1 bias, fc2 bias.
    def row(v):
        return jnp.pad(v.astype(f32), (0, 128 - v.shape[0]))

    vecs = jnp.stack([row(p["gn_w"]), row(p["gn_b"]), row(p["conv2_b"]),
                      row(p["fc1_b"]), row(p["fc2_b"]),
                      jnp.zeros((128,), f32), jnp.zeros((128,), f32),
                      jnp.zeros((128,), f32)], axis=0)                # (8,128)

    # Validity mask for the 13x13 pool-1 output stored in a 181-row
    # (stride-14) flattened layout: row r = i*14 + j is valid iff j < 13.
    mask = np.tile(((np.arange(181) % 14) != 13).astype(np.float32)[:, None],
                   (1, 128))

    # conv2 im2col selection: for tap kpos=(ki,kj) and output p=(oh,ow),
    # row kpos*32 + oh*5 + ow picks source row (2*oh+ki)*14 + (2*ow+kj).
    sel = np.zeros((16 * 32, 181), np.float32)
    for ki in range(4):
        for kj in range(4):
            kpos = ki * 4 + kj
            for oh in range(5):
                for ow in range(5):
                    src = (2 * oh + ki) * 14 + (2 * ow + kj)
                    sel[kpos * 32 + oh * 5 + ow, src] = 1.0

    # conv2: (32,16,4,4) -> (16 taps, Cin padded to 128, Cout padded to 128).
    w2 = jnp.transpose(p["conv2_w"], (2, 3, 1, 0)).reshape(16, 16, 32)
    w2 = jnp.pad(w2, ((0, 0), (0, 112), (0, 96))).astype(bf16)

    # fc1: (32, 512) with torch flatten index c*16 + h*4 + w
    #   -> (16 positions h*4+w, Cin padded to 128, Cout padded to 128).
    wf1 = jnp.transpose(p["fc1_w"].reshape(32, 32, 4, 4), (2, 3, 1, 0))
    wf1 = jnp.pad(wf1.reshape(16, 32, 32), ((0, 0), (0, 96), (0, 96))).astype(bf16)

    # fc2: (10, 32) -> (128, 128).
    wf2 = jnp.pad(p["fc2_w"].T, ((0, 96), (0, 118))).astype(bf16)

    return {"w1": w1, "vecs": vecs,
            "mask": jnp.asarray(mask, f32), "sel2": jnp.asarray(sel, bf16),
            "w2": w2, "wf1": wf1, "wf2": wf2}


if __name__ == "__main__":
    key = jax.random.PRNGKey(0)
    pkey, xkey = jax.random.split(key)
    params = init_params(pkey)
    packed = pack_params(params)        # one-time layout/padding work
    x = jax.random.normal(xkey, (2, 3, 28, 28), jnp.float32)

    out = sample_convnet_forward(packed, x)
    jax.block_until_ready(out)
    assert out.shape == (2, 10), out.shape
    assert bool(jnp.all(jnp.isfinite(out)))
    print("KERNEL_OK")
</pallas_src>

<mosaic_0001>
module attributes {stable_mosaic.version = 11 : i64} {
  func.func @_fused_forward_kernel(%arg0: i32, %arg1: memref<1x196x192xbf16, #tpu.memory_space<vmem>>, %arg2: memref<192x128xbf16, #tpu.memory_space<vmem>>, %arg3: memref<8x128xf32, #tpu.memory_space<vmem>>, %arg4: memref<181x128xf32, #tpu.memory_space<vmem>>, %arg5: memref<512x181xbf16, #tpu.memory_space<vmem>>, %arg6: memref<16x128x128xbf16, #tpu.memory_space<vmem>>, %arg7: memref<16x128x128xbf16, #tpu.memory_space<vmem>>, %arg8: memref<128x128xbf16, #tpu.memory_space<vmem>>, %arg9: memref<1x1x128xf32, #tpu.memory_space<vmem>>) attributes {dimension_semantics = [#tpu.dimension_semantics<parallel>], iteration_bounds = array<i64: 2>, scalar_prefetch = 0 : i64, scratch_operands = 0 : i64, tpu.core_type = #tpu.core_type<tc>, window_params = [{transform_indices = @transform_0, window_bounds = array<i64: 1, 196, 192>}, {pipeline_mode = #tpu.pipeline_mode<synchronous>, transform_indices = @transform_1, window_bounds = array<i64: 192, 128>}, {pipeline_mode = #tpu.pipeline_mode<synchronous>, transform_indices = @transform_2, window_bounds = array<i64: 8, 128>}, {pipeline_mode = #tpu.pipeline_mode<synchronous>, transform_indices = @transform_3, window_bounds = array<i64: 181, 128>}, {pipeline_mode = #tpu.pipeline_mode<synchronous>, transform_indices = @transform_4, window_bounds = array<i64: 512, 181>}, {pipeline_mode = #tpu.pipeline_mode<synchronous>, transform_indices = @transform_5, window_bounds = array<i64: 16, 128, 128>}, {pipeline_mode = #tpu.pipeline_mode<synchronous>, transform_indices = @transform_6, window_bounds = array<i64: 16, 128, 128>}, {pipeline_mode = #tpu.pipeline_mode<synchronous>, transform_indices = @transform_7, window_bounds = array<i64: 128, 128>}, {transform_indices = @transform_8, window_bounds = array<i64: 1, 1, 128>}]} {
    %c0 = arith.constant 0 : index
    %c0_0 = arith.constant 0 : index
    %0 = vector.load %arg3[%c0, %c0_0] : memref<8x128xf32, #tpu.memory_space<vmem>>, vector<1x128xf32>
    %c1 = arith.constant 1 : index
    %c0_1 = arith.constant 0 : index
    %1 = vector.load %arg3[%c1, %c0_1] : memref<8x128xf32, #tpu.memory_space<vmem>>, vector<1x128xf32>
    %c2 = arith.constant 2 : index
    %c0_2 = arith.constant 0 : index
    %2 = vector.load %arg3[%c2, %c0_2] : memref<8x128xf32, #tpu.memory_space<vmem>>, vector<1x128xf32>
    %c3 = arith.constant 3 : index
    %c0_3 = arith.constant 0 : index
    %3 = vector.load %arg3[%c3, %c0_3] : memref<8x128xf32, #tpu.memory_space<vmem>>, vector<1x128xf32>
    %c4 = arith.constant 4 : index
    %c0_4 = arith.constant 0 : index
    %4 = vector.load %arg3[%c4, %c0_4] : memref<8x128xf32, #tpu.memory_space<vmem>>, vector<1x128xf32>
    %c0_5 = arith.constant 0 : index
    %c0_6 = arith.constant 0 : index
    %c0_7 = arith.constant 0 : index
    %5 = vector.load %arg1[%c0_5, %c0_6, %c0_7] : memref<1x196x192xbf16, #tpu.memory_space<vmem>>, vector<1x196x192xbf16>
    %6 = vector.shape_cast %5 : vector<1x196x192xbf16> to vector<196x192xbf16>
    %c0_8 = arith.constant 0 : index
    %c0_9 = arith.constant 0 : index
    %7 = vector.load %arg2[%c0_8, %c0_9] : memref<192x128xbf16, #tpu.memory_space<vmem>>, vector<192x128xbf16>
    %cst = arith.constant dense<0.000000e+00> : vector<196x128xf32>
    %8 = tpu.matmul %6, %7, %cst {dimension_numbers = #tpu.dot_dimension_numbers<[1], [0], [0], [1], [0, 0, 1, 1], [], []>} : vector<196x192xbf16>, vector<192x128xbf16>, vector<196x128xf32> -> vector<196x128xf32>
    %9 = vector.extract_strided_slice %8 {offsets = [0, 0], sizes = [181, 128], strides = [1, 1]} : vector<196x128xf32> to vector<181x128xf32>
    %10 = vector.extract_strided_slice %8 {offsets = [1, 0], sizes = [181, 128], strides = [1, 1]} : vector<196x128xf32> to vector<181x128xf32>
    %11 = arith.maximumf %9, %10 : vector<181x128xf32>
    %12 = vector.extract_strided_slice %8 {offsets = [14, 0], sizes = [181, 128], strides = [1, 1]} : vector<196x128xf32> to vector<181x128xf32>
    %13 = vector.extract_strided_slice %8 {offsets = [15, 0], sizes = [181, 128], strides = [1, 1]} : vector<196x128xf32> to vector<181x128xf32>
    %14 = arith.maximumf %12, %13 : vector<181x128xf32>
    %15 = arith.maximumf %11, %14 : vector<181x128xf32>
    %cst_10 = arith.constant 0.000000e+00 : f32
    %16 = vector.broadcast %cst_10 : f32 to vector<181x128xf32>
    %17 = arith.maximumf %15, %16 : vector<181x128xf32>
    %c0_11 = arith.constant 0 : index
    %c0_12 = arith.constant 0 : index
    %18 = vector.load %arg4[%c0_11, %c0_12] : memref<181x128xf32, #tpu.memory_space<vmem>>, vector<181x128xf32>
    %19 = arith.mulf %17, %18 : vector<181x128xf32>
    %cst_13 = arith.constant dense<0.000000e+00> : vector<128xf32>
    %20 = vector.multi_reduction <add>, %19, %cst_13 [0] : vector<181x128xf32> to vector<128xf32>
    %21 = vector.shape_cast %20 : vector<128xf32> to vector<1x128xf32>
    %cst_14 = arith.constant 5.917160e-03 : f32
    %22 = vector.broadcast %cst_14 : f32 to vector<1x128xf32>
    %23 = arith.mulf %21, %22 : vector<1x128xf32>
    %24 = vector.broadcast %23 : vector<1x128xf32> to vector<181x128xf32>
    %25 = arith.subf %17, %24 : vector<181x128xf32>
    %26 = arith.mulf %25, %18 : vector<181x128xf32>
    %27 = arith.mulf %26, %26 : vector<181x128xf32>
    %cst_15 = arith.constant dense<0.000000e+00> : vector<128xf32>
    %28 = vector.multi_reduction <add>, %27, %cst_15 [0] : vector<181x128xf32> to vector<128xf32>
    %29 = vector.shape_cast %28 : vector<128xf32> to vector<1x128xf32>
    %cst_16 = arith.constant 5.917160e-03 : f32
    %30 = vector.broadcast %cst_16 : f32 to vector<1x128xf32>
    %31 = arith.mulf %29, %30 : vector<1x128xf32>
    %cst_17 = arith.constant 9.99999974E-6 : f32
    %32 = vector.broadcast %cst_17 : f32 to vector<1x128xf32>
    %33 = arith.addf %31, %32 : vector<1x128xf32>
    %34 = math.rsqrt %33 : vector<1x128xf32>
    %35 = arith.mulf %34, %0 : vector<1x128xf32>
    %36 = vector.broadcast %35 : vector<1x128xf32> to vector<181x128xf32>
    %37 = arith.mulf %25, %36 : vector<181x128xf32>
    %38 = vector.broadcast %1 : vector<1x128xf32> to vector<181x128xf32>
    %39 = arith.addf %37, %38 : vector<181x128xf32>
    %40 = arith.truncf %39 : vector<181x128xf32> to vector<181x128xbf16>
    %c0_18 = arith.constant 0 : index
    %c0_19 = arith.constant 0 : index
    %41 = vector.load %arg5[%c0_18, %c0_19] : memref<512x181xbf16, #tpu.memory_space<vmem>>, vector<512x181xbf16>
    %cst_20 = arith.constant dense<0.000000e+00> : vector<512x128xf32>
    %42 = tpu.matmul %41, %40, %cst_20 {dimension_numbers = #tpu.dot_dimension_numbers<[1], [0], [0], [1], [0, 0, 1, 1], [], []>} : vector<512x181xbf16>, vector<181x128xbf16>, vector<512x128xf32> -> vector<512x128xf32>
    %43 = arith.truncf %42 : vector<512x128xf32> to vector<512x128xbf16>
    %44 = vector.shape_cast %2 : vector<1x128xf32> to vector<1x128xf32>
    %45 = vector.broadcast %44 : vector<1x128xf32> to vector<32x128xf32>
    %46 = vector.extract_strided_slice %43 {offsets = [0, 0], sizes = [32, 128], strides = [1, 1]} : vector<512x128xbf16> to vector<32x128xbf16>
    %c0_21 = arith.constant 0 : index
    %c0_22 = arith.constant 0 : index
    %c0_23 = arith.constant 0 : index
    %47 = vector.load %arg6[%c0_21, %c0_22, %c0_23] : memref<16x128x128xbf16, #tpu.memory_space<vmem>>, vector<1x128x128xbf16>
    %48 = vector.shape_cast %47 : vector<1x128x128xbf16> to vector<128x128xbf16>
    %cst_24 = arith.constant dense<0.000000e+00> : vector<32x128xf32>
    %49 = tpu.matmul %46, %48, %cst_24 {dimension_numbers = #tpu.dot_dimension_numbers<[1], [0], [0], [1], [0, 0, 1, 1], [], []>} : vector<32x128xbf16>, vector<128x128xbf16>, vector<32x128xf32> -> vector<32x128xf32>
    %50 = arith.addf %45, %49 : vector<32x128xf32>
    %51 = vector.extract_strided_slice %43 {offsets = [32, 0], sizes = [32, 128], strides = [1, 1]} : vector<512x128xbf16> to vector<32x128xbf16>
    %c1_25 = arith.constant 1 : index
    %c0_26 = arith.constant 0 : index
    %c0_27 = arith.constant 0 : index
    %52 = vector.load %arg6[%c1_25, %c0_26, %c0_27] : memref<16x128x128xbf16, #tpu.memory_space<vmem>>, vector<1x128x128xbf16>
    %53 = vector.shape_cast %52 : vector<1x128x128xbf16> to vector<128x128xbf16>
    %cst_28 = arith.constant dense<0.000000e+00> : vector<32x128xf32>
    %54 = tpu.matmul %51, %53, %cst_28 {dimension_numbers = #tpu.dot_dimension_numbers<[1], [0], [0], [1], [0, 0, 1, 1], [], []>} : vector<32x128xbf16>, vector<128x128xbf16>, vector<32x128xf32> -> vector<32x128xf32>
    %55 = arith.addf %50, %54 : vector<32x128xf32>
    %56 = vector.extract_strided_slice %43 {offsets = [64, 0], sizes = [32, 128], strides = [1, 1]} : vector<512x128xbf16> to vector<32x128xbf16>
    %c2_29 = arith.constant 2 : index
    %c0_30 = arith.constant 0 : index
    %c0_31 = arith.constant 0 : index
    %57 = vector.load %arg6[%c2_29, %c0_30, %c0_31] : memref<16x128x128xbf16, #tpu.memory_space<vmem>>, vector<1x128x128xbf16>
    %58 = vector.shape_cast %57 : vector<1x128x128xbf16> to vector<128x128xbf16>
    %cst_32 = arith.constant dense<0.000000e+00> : vector<32x128xf32>
    %59 = tpu.matmul %56, %58, %cst_32 {dimension_numbers = #tpu.dot_dimension_numbers<[1], [0], [0], [1], [0, 0, 1, 1], [], []>} : vector<32x128xbf16>, vector<128x128xbf16>, vector<32x128xf32> -> vector<32x128xf32>
    %60 = arith.addf %55, %59 : vector<32x128xf32>
    %61 = vector.extract_strided_slice %43 {offsets = [96, 0], sizes = [32, 128], strides = [1, 1]} : vector<512x128xbf16> to vector<32x128xbf16>
    %c3_33 = arith.constant 3 : index
    %c0_34 = arith.constant 0 : index
    %c0_35 = arith.constant 0 : index
    %62 = vector.load %arg6[%c3_33, %c0_34, %c0_35] : memref<16x128x128xbf16, #tpu.memory_space<vmem>>, vector<1x128x128xbf16>
    %63 = vector.shape_cast %62 : vector<1x128x128xbf16> to vector<128x128xbf16>
    %cst_36 = arith.constant dense<0.000000e+00> : vector<32x128xf32>
    %64 = tpu.matmul %61, %63, %cst_36 {dimension_numbers = #tpu.dot_dimension_numbers<[1], [0], [0], [1], [0, 0, 1, 1], [], []>} : vector<32x128xbf16>, vector<128x128xbf16>, vector<32x128xf32> -> vector<32x128xf32>
    %65 = arith.addf %60, %64 : vector<32x128xf32>
    %66 = vector.extract_strided_slice %43 {offsets = [128, 0], sizes = [32, 128], strides = [1, 1]} : vector<512x128xbf16> to vector<32x128xbf16>
    %c4_37 = arith.constant 4 : index
    %c0_38 = arith.constant 0 : index
    %c0_39 = arith.constant 0 : index
    %67 = vector.load %arg6[%c4_37, %c0_38, %c0_39] : memref<16x128x128xbf16, #tpu.memory_space<vmem>>, vector<1x128x128xbf16>
    %68 = vector.shape_cast %67 : vector<1x128x128xbf16> to vector<128x128xbf16>
    %cst_40 = arith.constant dense<0.000000e+00> : vector<32x128xf32>
    %69 = tpu.matmul %66, %68, %cst_40 {dimension_numbers = #tpu.dot_dimension_numbers<[1], [0], [0], [1], [0, 0, 1, 1], [], []>} : vector<32x128xbf16>, vector<128x128xbf16>, vector<32x128xf32> -> vector<32x128xf32>
    %70 = arith.addf %65, %69 : vector<32x128xf32>
    %71 = vector.extract_strided_slice %43 {offsets = [160, 0], sizes = [32, 128], strides = [1, 1]} : vector<512x128xbf16> to vector<32x128xbf16>
    %c5 = arith.constant 5 : index
    %c0_41 = arith.constant 0 : index
    %c0_42 = arith.constant 0 : index
    %72 = vector.load %arg6[%c5, %c0_41, %c0_42] : memref<16x128x128xbf16, #tpu.memory_space<vmem>>, vector<1x128x128xbf16>
    %73 = vector.shape_cast %72 : vector<1x128x128xbf16> to vector<128x128xbf16>
    %cst_43 = arith.constant dense<0.000000e+00> : vector<32x128xf32>
    %74 = tpu.matmul %71, %73, %cst_43 {dimension_numbers = #tpu.dot_dimension_numbers<[1], [0], [0], [1], [0, 0, 1, 1], [], []>} : vector<32x128xbf16>, vector<128x128xbf16>, vector<32x128xf32> -> vector<32x128xf32>
    %75 = arith.addf %70, %74 : vector<32x128xf32>
    %76 = vector.extract_strided_slice %43 {offsets = [192, 0], sizes = [32, 128], strides = [1, 1]} : vector<512x128xbf16> to vector<32x128xbf16>
    %c6 = arith.constant 6 : index
    %c0_44 = arith.constant 0 : index
    %c0_45 = arith.constant 0 : index
    %77 = vector.load %arg6[%c6, %c0_44, %c0_45] : memref<16x128x128xbf16, #tpu.memory_space<vmem>>, vector<1x128x128xbf16>
    %78 = vector.shape_cast %77 : vector<1x128x128xbf16> to vector<128x128xbf16>
    %cst_46 = arith.constant dense<0.000000e+00> : vector<32x128xf32>
    %79 = tpu.matmul %76, %78, %cst_46 {dimension_numbers = #tpu.dot_dimension_numbers<[1], [0], [0], [1], [0, 0, 1, 1], [], []>} : vector<32x128xbf16>, vector<128x128xbf16>, vector<32x128xf32> -> vector<32x128xf32>
    %80 = arith.addf %75, %79 : vector<32x128xf32>
    %81 = vector.extract_strided_slice %43 {offsets = [224, 0], sizes = [32, 128], strides = [1, 1]} : vector<512x128xbf16> to vector<32x128xbf16>
    %c7 = arith.constant 7 : index
    %c0_47 = arith.constant 0 : index
    %c0_48 = arith.constant 0 : index
    %82 = vector.load %arg6[%c7, %c0_47, %c0_48] : memref<16x128x128xbf16, #tpu.memory_space<vmem>>, vector<1x128x128xbf16>
    %83 = vector.shape_cast %82 : vector<1x128x128xbf16> to vector<128x128xbf16>
    %cst_49 = arith.constant dense<0.000000e+00> : vector<32x128xf32>
    %84 = tpu.matmul %81, %83, %cst_49 {dimension_numbers = #tpu.dot_dimension_numbers<[1], [0], [0], [1], [0, 0, 1, 1], [], []>} : vector<32x128xbf16>, vector<128x128xbf16>, vector<32x128xf32> -> vector<32x128xf32>
    %85 = arith.addf %80, %84 : vector<32x128xf32>
    %86 = vector.extract_strided_slice %43 {offsets = [256, 0], sizes = [32, 128], strides = [1, 1]} : vector<512x128xbf16> to vector<32x128xbf16>
    %c8 = arith.constant 8 : index
    %c0_50 = arith.constant 0 : index
    %c0_51 = arith.constant 0 : index
    %87 = vector.load %arg6[%c8, %c0_50, %c0_51] : memref<16x128x128xbf16, #tpu.memory_space<vmem>>, vector<1x128x128xbf16>
    %88 = vector.shape_cast %87 : vector<1x128x128xbf16> to vector<128x128xbf16>
    %cst_52 = arith.constant dense<0.000000e+00> : vector<32x128xf32>
    %89 = tpu.matmul %86, %88, %cst_52 {dimension_numbers = #tpu.dot_dimension_numbers<[1], [0], [0], [1], [0, 0, 1, 1], [], []>} : vector<32x128xbf16>, vector<128x128xbf16>, vector<32x128xf32> -> vector<32x128xf32>
    %90 = arith.addf %85, %89 : vector<32x128xf32>
    %91 = vector.extract_strided_slice %43 {offsets = [288, 0], sizes = [32, 128], strides = [1, 1]} : vector<512x128xbf16> to vector<32x128xbf16>
    %c9 = arith.constant 9 : index
    %c0_53 = arith.constant 0 : index
    %c0_54 = arith.constant 0 : index
    %92 = vector.load %arg6[%c9, %c0_53, %c0_54] : memref<16x128x128xbf16, #tpu.memory_space<vmem>>, vector<1x128x128xbf16>
    %93 = vector.shape_cast %92 : vector<1x128x128xbf16> to vector<128x128xbf16>
    %cst_55 = arith.constant dense<0.000000e+00> : vector<32x128xf32>
    %94 = tpu.matmul %91, %93, %cst_55 {dimension_numbers = #tpu.dot_dimension_numbers<[1], [0], [0], [1], [0, 0, 1, 1], [], []>} : vector<32x128xbf16>, vector<128x128xbf16>, vector<32x128xf32> -> vector<32x128xf32>
    %95 = arith.addf %90, %94 : vector<32x128xf32>
    %96 = vector.extract_strided_slice %43 {offsets = [320, 0], sizes = [32, 128], strides = [1, 1]} : vector<512x128xbf16> to vector<32x128xbf16>
    %c10 = arith.constant 10 : index
    %c0_56 = arith.constant 0 : index
    %c0_57 = arith.constant 0 : index
    %97 = vector.load %arg6[%c10, %c0_56, %c0_57] : memref<16x128x128xbf16, #tpu.memory_space<vmem>>, vector<1x128x128xbf16>
    %98 = vector.shape_cast %97 : vector<1x128x128xbf16> to vector<128x128xbf16>
    %cst_58 = arith.constant dense<0.000000e+00> : vector<32x128xf32>
    %99 = tpu.matmul %96, %98, %cst_58 {dimension_numbers = #tpu.dot_dimension_numbers<[1], [0], [0], [1], [0, 0, 1, 1], [], []>} : vector<32x128xbf16>, vector<128x128xbf16>, vector<32x128xf32> -> vector<32x128xf32>
    %100 = arith.addf %95, %99 : vector<32x128xf32>
    %101 = vector.extract_strided_slice %43 {offsets = [352, 0], sizes = [32, 128], strides = [1, 1]} : vector<512x128xbf16> to vector<32x128xbf16>
    %c11 = arith.constant 11 : index
    %c0_59 = arith.constant 0 : index
    %c0_60 = arith.constant 0 : index
    %102 = vector.load %arg6[%c11, %c0_59, %c0_60] : memref<16x128x128xbf16, #tpu.memory_space<vmem>>, vector<1x128x128xbf16>
    %103 = vector.shape_cast %102 : vector<1x128x128xbf16> to vector<128x128xbf16>
    %cst_61 = arith.constant dense<0.000000e+00> : vector<32x128xf32>
    %104 = tpu.matmul %101, %103, %cst_61 {dimension_numbers = #tpu.dot_dimension_numbers<[1], [0], [0], [1], [0, 0, 1, 1], [], []>} : vector<32x128xbf16>, vector<128x128xbf16>, vector<32x128xf32> -> vector<32x128xf32>
    %105 = arith.addf %100, %104 : vector<32x128xf32>
    %106 = vector.extract_strided_slice %43 {offsets = [384, 0], sizes = [32, 128], strides = [1, 1]} : vector<512x128xbf16> to vector<32x128xbf16>
    %c12 = arith.constant 12 : index
    %c0_62 = arith.constant 0 : index
    %c0_63 = arith.constant 0 : index
    %107 = vector.load %arg6[%c12, %c0_62, %c0_63] : memref<16x128x128xbf16, #tpu.memory_space<vmem>>, vector<1x128x128xbf16>
    %108 = vector.shape_cast %107 : vector<1x128x128xbf16> to vector<128x128xbf16>
    %cst_64 = arith.constant dense<0.000000e+00> : vector<32x128xf32>
    %109 = tpu.matmul %106, %108, %cst_64 {dimension_numbers = #tpu.dot_dimension_numbers<[1], [0], [0], [1], [0, 0, 1, 1], [], []>} : vector<32x128xbf16>, vector<128x128xbf16>, vector<32x128xf32> -> vector<32x128xf32>
    %110 = arith.addf %105, %109 : vector<32x128xf32>
    %111 = vector.extract_strided_slice %43 {offsets = [416, 0], sizes = [32, 128], strides = [1, 1]} : vector<512x128xbf16> to vector<32x128xbf16>
    %c13 = arith.constant 13 : index
    %c0_65 = arith.constant 0 : index
    %c0_66 = arith.constant 0 : index
    %112 = vector.load %arg6[%c13, %c0_65, %c0_66] : memref<16x128x128xbf16, #tpu.memory_space<vmem>>, vector<1x128x128xbf16>
    %113 = vector.shape_cast %112 : vector<1x128x128xbf16> to vector<128x128xbf16>
    %cst_67 = arith.constant dense<0.000000e+00> : vector<32x128xf32>
    %114 = tpu.matmul %111, %113, %cst_67 {dimension_numbers = #tpu.dot_dimension_numbers<[1], [0], [0], [1], [0, 0, 1, 1], [], []>} : vector<32x128xbf16>, vector<128x128xbf16>, vector<32x128xf32> -> vector<32x128xf32>
    %115 = arith.addf %110, %114 : vector<32x128xf32>
    %116 = vector.extract_strided_slice %43 {offsets = [448, 0], sizes = [32, 128], strides = [1, 1]} : vector<512x128xbf16> to vector<32x128xbf16>
    %c14 = arith.constant 14 : index
    %c0_68 = arith.constant 0 : index
    %c0_69 = arith.constant 0 : index
    %117 = vector.load %arg6[%c14, %c0_68, %c0_69] : memref<16x128x128xbf16, #tpu.memory_space<vmem>>, vector<1x128x128xbf16>
    %118 = vector.shape_cast %117 : vector<1x128x128xbf16> to vector<128x128xbf16>
    %cst_70 = arith.constant dense<0.000000e+00> : vector<32x128xf32>
    %119 = tpu.matmul %116, %118, %cst_70 {dimension_numbers = #tpu.dot_dimension_numbers<[1], [0], [0], [1], [0, 0, 1, 1], [], []>} : vector<32x128xbf16>, vector<128x128xbf16>, vector<32x128xf32> -> vector<32x128xf32>
    %120 = arith.addf %115, %119 : vector<32x128xf32>
    %121 = vector.extract_strided_slice %43 {offsets = [480, 0], sizes = [32, 128], strides = [1, 1]} : vector<512x128xbf16> to vector<32x128xbf16>
    %c15 = arith.constant 15 : index
    %c0_71 = arith.constant 0 : index
    %c0_72 = arith.constant 0 : index
    %122 = vector.load %arg6[%c15, %c0_71, %c0_72] : memref<16x128x128xbf16, #tpu.memory_space<vmem>>, vector<1x128x128xbf16>
    %123 = vector.shape_cast %122 : vector<1x128x128xbf16> to vector<128x128xbf16>
    %cst_73 = arith.constant dense<0.000000e+00> : vector<32x128xf32>
    %124 = tpu.matmul %121, %123, %cst_73 {dimension_numbers = #tpu.dot_dimension_numbers<[1], [0], [0], [1], [0, 0, 1, 1], [], []>} : vector<32x128xbf16>, vector<128x128xbf16>, vector<32x128xf32> -> vector<32x128xf32>
    %125 = arith.addf %120, %124 : vector<32x128xf32>
    %126 = vector.extract_strided_slice %125 {offsets = [0, 0], sizes = [19, 128], strides = [1, 1]} : vector<32x128xf32> to vector<19x128xf32>
    %127 = vector.extract_strided_slice %125 {offsets = [1, 0], sizes = [19, 128], strides = [1, 1]} : vector<32x128xf32> to vector<19x128xf32>
    %128 = arith.maximumf %126, %127 : vector<19x128xf32>
    %129 = vector.extract_strided_slice %125 {offsets = [5, 0], sizes = [19, 128], strides = [1, 1]} : vector<32x128xf32> to vector<19x128xf32>
    %130 = vector.extract_strided_slice %125 {offsets = [6, 0], sizes = [19, 128], strides = [1, 1]} : vector<32x128xf32> to vector<19x128xf32>
    %131 = arith.maximumf %129, %130 : vector<19x128xf32>
    %132 = arith.maximumf %128, %131 : vector<19x128xf32>
    %cst_74 = arith.constant 0.000000e+00 : f32
    %133 = vector.broadcast %cst_74 : f32 to vector<19x128xf32>
    %134 = arith.maximumf %132, %133 : vector<19x128xf32>
    %135 = arith.truncf %134 : vector<19x128xf32> to vector<19x128xbf16>
    %136 = vector.extract_strided_slice %135 {offsets = [0, 0], sizes = [1, 128], strides = [1, 1]} : vector<19x128xbf16> to vector<1x128xbf16>
    %c0_75 = arith.constant 0 : index
    %c0_76 = arith.constant 0 : index
    %c0_77 = arith.constant 0 : index
    %137 = vector.load %arg7[%c0_75, %c0_76, %c0_77] : memref<16x128x128xbf16, #tpu.memory_space<vmem>>, vector<1x128x128xbf16>
    %138 = vector.shape_cast %137 : vector<1x128x128xbf16> to vector<128x128xbf16>
    %cst_78 = arith.constant dense<0.000000e+00> : vector<1x128xf32>
    %139 = tpu.matmul %136, %138, %cst_78 {dimension_numbers = #tpu.dot_dimension_numbers<[1], [0], [0], [1], [0, 0, 1, 1], [], []>} : vector<1x128xbf16>, vector<128x128xbf16>, vector<1x128xf32> -> vector<1x128xf32>
    %140 = arith.addf %3, %139 : vector<1x128xf32>
    %141 = vector.extract_strided_slice %135 {offsets = [1, 0], sizes = [1, 128], strides = [1, 1]} : vector<19x128xbf16> to vector<1x128xbf16>
    %c1_79 = arith.constant 1 : index
    %c0_80 = arith.constant 0 : index
    %c0_81 = arith.constant 0 : index
    %142 = vector.load %arg7[%c1_79, %c0_80, %c0_81] : memref<16x128x128xbf16, #tpu.memory_space<vmem>>, vector<1x128x128xbf16>
    %143 = vector.shape_cast %142 : vector<1x128x128xbf16> to vector<128x128xbf16>
    %cst_82 = arith.constant dense<0.000000e+00> : vector<1x128xf32>
    %144 = tpu.matmul %141, %143, %cst_82 {dimension_numbers = #tpu.dot_dimension_numbers<[1], [0], [0], [1], [0, 0, 1, 1], [], []>} : vector<1x128xbf16>, vector<128x128xbf16>, vector<1x128xf32> -> vector<1x128xf32>
    %145 = arith.addf %140, %144 : vector<1x128xf32>
    %146 = vector.extract_strided_slice %135 {offsets = [2, 0], sizes = [1, 128], strides = [1, 1]} : vector<19x128xbf16> to vector<1x128xbf16>
    %c2_83 = arith.constant 2 : index
    %c0_84 = arith.constant 0 : index
    %c0_85 = arith.constant 0 : index
    %147 = vector.load %arg7[%c2_83, %c0_84, %c0_85] : memref<16x128x128xbf16, #tpu.memory_space<vmem>>, vector<1x128x128xbf16>
    %148 = vector.shape_cast %147 : vector<1x128x128xbf16> to vector<128x128xbf16>
    %cst_86 = arith.constant dense<0.000000e+00> : vector<1x128xf32>
    %149 = tpu.matmul %146, %148, %cst_86 {dimension_numbers = #tpu.dot_dimension_numbers<[1], [0], [0], [1], [0, 0, 1, 1], [], []>} : vector<1x128xbf16>, vector<128x128xbf16>, vector<1x128xf32> -> vector<1x128xf32>
    %150 = arith.addf %145, %149 : vector<1x128xf32>
    %151 = vector.extract_strided_slice %135 {offsets = [3, 0], sizes = [1, 128], strides = [1, 1]} : vector<19x128xbf16> to vector<1x128xbf16>
    %c3_87 = arith.constant 3 : index
    %c0_88 = arith.constant 0 : index
    %c0_89 = arith.constant 0 : index
    %152 = vector.load %arg7[%c3_87, %c0_88, %c0_89] : memref<16x128x128xbf16, #tpu.memory_space<vmem>>, vector<1x128x128xbf16>
    %153 = vector.shape_cast %152 : vector<1x128x128xbf16> to vector<128x128xbf16>
    %cst_90 = arith.constant dense<0.000000e+00> : vector<1x128xf32>
    %154 = tpu.matmul %151, %153, %cst_90 {dimension_numbers = #tpu.dot_dimension_numbers<[1], [0], [0], [1], [0, 0, 1, 1], [], []>} : vector<1x128xbf16>, vector<128x128xbf16>, vector<1x128xf32> -> vector<1x128xf32>
    %155 = arith.addf %150, %154 : vector<1x128xf32>
    %156 = vector.extract_strided_slice %135 {offsets = [5, 0], sizes = [1, 128], strides = [1, 1]} : vector<19x128xbf16> to vector<1x128xbf16>
    %c4_91 = arith.constant 4 : index
    %c0_92 = arith.constant 0 : index
    %c0_93 = arith.constant 0 : index
    %157 = vector.load %arg7[%c4_91, %c0_92, %c0_93] : memref<16x128x128xbf16, #tpu.memory_space<vmem>>, vector<1x128x128xbf16>
    %158 = vector.shape_cast %157 : vector<1x128x128xbf16> to vector<128x128xbf16>
    %cst_94 = arith.constant dense<0.000000e+00> : vector<1x128xf32>
    %159 = tpu.matmul %156, %158, %cst_94 {dimension_numbers = #tpu.dot_dimension_numbers<[1], [0], [0], [1], [0, 0, 1, 1], [], []>} : vector<1x128xbf16>, vector<128x128xbf16>, vector<1x128xf32> -> vector<1x128xf32>
    %160 = arith.addf %155, %159 : vector<1x128xf32>
    %161 = vector.extract_strided_slice %135 {offsets = [6, 0], sizes = [1, 128], strides = [1, 1]} : vector<19x128xbf16> to vector<1x128xbf16>
    %c5_95 = arith.constant 5 : index
    %c0_96 = arith.constant 0 : index
    %c0_97 = arith.constant 0 : index
    %162 = vector.load %arg7[%c5_95, %c0_96, %c0_97] : memref<16x128x128xbf16, #tpu.memory_space<vmem>>, vector<1x128x128xbf16>
    %163 = vector.shape_cast %162 : vector<1x128x128xbf16> to vector<128x128xbf16>
    %cst_98 = arith.constant dense<0.000000e+00> : vector<1x128xf32>
    %164 = tpu.matmul %161, %163, %cst_98 {dimension_numbers = #tpu.dot_dimension_numbers<[1], [0], [0], [1], [0, 0, 1, 1], [], []>} : vector<1x128xbf16>, vector<128x128xbf16>, vector<1x128xf32> -> vector<1x128xf32>
    %165 = arith.addf %160, %164 : vector<1x128xf32>
    %166 = vector.extract_strided_slice %135 {offsets = [7, 0], sizes = [1, 128], strides = [1, 1]} : vector<19x128xbf16> to vector<1x128xbf16>
    %c6_99 = arith.constant 6 : index
    %c0_100 = arith.constant 0 : index
    %c0_101 = arith.constant 0 : index
    %167 = vector.load %arg7[%c6_99, %c0_100, %c0_101] : memref<16x128x128xbf16, #tpu.memory_space<vmem>>, vector<1x128x128xbf16>
    %168 = vector.shape_cast %167 : vector<1x128x128xbf16> to vector<128x128xbf16>
    %cst_102 = arith.constant dense<0.000000e+00> : vector<1x128xf32>
    %169 = tpu.matmul %166, %168, %cst_102 {dimension_numbers = #tpu.dot_dimension_numbers<[1], [0], [0], [1], [0, 0, 1, 1], [], []>} : vector<1x128xbf16>, vector<128x128xbf16>, vector<1x128xf32> -> vector<1x128xf32>
    %170 = arith.addf %165, %169 : vector<1x128xf32>
    %171 = vector.extract_strided_slice %135 {offsets = [8, 0], sizes = [1, 128], strides = [1, 1]} : vector<19x128xbf16> to vector<1x128xbf16>
    %c7_103 = arith.constant 7 : index
    %c0_104 = arith.constant 0 : index
    %c0_105 = arith.constant 0 : index
    %172 = vector.load %arg7[%c7_103, %c0_104, %c0_105] : memref<16x128x128xbf16, #tpu.memory_space<vmem>>, vector<1x128x128xbf16>
    %173 = vector.shape_cast %172 : vector<1x128x128xbf16> to vector<128x128xbf16>
    %cst_106 = arith.constant dense<0.000000e+00> : vector<1x128xf32>
    %174 = tpu.matmul %171, %173, %cst_106 {dimension_numbers = #tpu.dot_dimension_numbers<[1], [0], [0], [1], [0, 0, 1, 1], [], []>} : vector<1x128xbf16>, vector<128x128xbf16>, vector<1x128xf32> -> vector<1x128xf32>
    %175 = arith.addf %170, %174 : vector<1x128xf32>
    %176 = vector.extract_strided_slice %135 {offsets = [10, 0], sizes = [1, 128], strides = [1, 1]} : vector<19x128xbf16> to vector<1x128xbf16>
    %c8_107 = arith.constant 8 : index
    %c0_108 = arith.constant 0 : index
    %c0_109 = arith.constant 0 : index
    %177 = vector.load %arg7[%c8_107, %c0_108, %c0_109] : memref<16x128x128xbf16, #tpu.memory_space<vmem>>, vector<1x128x128xbf16>
    %178 = vector.shape_cast %177 : vector<1x128x128xbf16> to vector<128x128xbf16>
    %cst_110 = arith.constant dense<0.000000e+00> : vector<1x128xf32>
    %179 = tpu.matmul %176, %178, %cst_110 {dimension_numbers = #tpu.dot_dimension_numbers<[1], [0], [0], [1], [0, 0, 1, 1], [], []>} : vector<1x128xbf16>, vector<128x128xbf16>, vector<1x128xf32> -> vector<1x128xf32>
    %180 = arith.addf %175, %179 : vector<1x128xf32>
    %181 = vector.extract_strided_slice %135 {offsets = [11, 0], sizes = [1, 128], strides = [1, 1]} : vector<19x128xbf16> to vector<1x128xbf16>
    %c9_111 = arith.constant 9 : index
    %c0_112 = arith.constant 0 : index
    %c0_113 = arith.constant 0 : index
    %182 = vector.load %arg7[%c9_111, %c0_112, %c0_113] : memref<16x128x128xbf16, #tpu.memory_space<vmem>>, vector<1x128x128xbf16>
    %183 = vector.shape_cast %182 : vector<1x128x128xbf16> to vector<128x128xbf16>
    %cst_114 = arith.constant dense<0.000000e+00> : vector<1x128xf32>
    %184 = tpu.matmul %181, %183, %cst_114 {dimension_numbers = #tpu.dot_dimension_numbers<[1], [0], [0], [1], [0, 0, 1, 1], [], []>} : vector<1x128xbf16>, vector<128x128xbf16>, vector<1x128xf32> -> vector<1x128xf32>
    %185 = arith.addf %180, %184 : vector<1x128xf32>
    %186 = vector.extract_strided_slice %135 {offsets = [12, 0], sizes = [1, 128], strides = [1, 1]} : vector<19x128xbf16> to vector<1x128xbf16>
    %c10_115 = arith.constant 10 : index
    %c0_116 = arith.constant 0 : index
    %c0_117 = arith.constant 0 : index
    %187 = vector.load %arg7[%c10_115, %c0_116, %c0_117] : memref<16x128x128xbf16, #tpu.memory_space<vmem>>, vector<1x128x128xbf16>
    %188 = vector.shape_cast %187 : vector<1x128x128xbf16> to vector<128x128xbf16>
    %cst_118 = arith.constant dense<0.000000e+00> : vector<1x128xf32>
    %189 = tpu.matmul %186, %188, %cst_118 {dimension_numbers = #tpu.dot_dimension_numbers<[1], [0], [0], [1], [0, 0, 1, 1], [], []>} : vector<1x128xbf16>, vector<128x128xbf16>, vector<1x128xf32> -> vector<1x128xf32>
    %190 = arith.addf %185, %189 : vector<1x128xf32>
    %191 = vector.extract_strided_slice %135 {offsets = [13, 0], sizes = [1, 128], strides = [1, 1]} : vector<19x128xbf16> to vector<1x128xbf16>
    %c11_119 = arith.constant 11 : index
    %c0_120 = arith.constant 0 : index
    %c0_121 = arith.constant 0 : index
    %192 = vector.load %arg7[%c11_119, %c0_120, %c0_121] : memref<16x128x128xbf16, #tpu.memory_space<vmem>>, vector<1x128x128xbf16>
    %193 = vector.shape_cast %192 : vector<1x128x128xbf16> to vector<128x128xbf16>
    %cst_122 = arith.constant dense<0.000000e+00> : vector<1x128xf32>
    %194 = tpu.matmul %191, %193, %cst_122 {dimension_numbers = #tpu.dot_dimension_numbers<[1], [0], [0], [1], [0, 0, 1, 1], [], []>} : vector<1x128xbf16>, vector<128x128xbf16>, vector<1x128xf32> -> vector<1x128xf32>
    %195 = arith.addf %190, %194 : vector<1x128xf32>
    %196 = vector.extract_strided_slice %135 {offsets = [15, 0], sizes = [1, 128], strides = [1, 1]} : vector<19x128xbf16> to vector<1x128xbf16>
    %c12_123 = arith.constant 12 : index
    %c0_124 = arith.constant 0 : index
    %c0_125 = arith.constant 0 : index
    %197 = vector.load %arg7[%c12_123, %c0_124, %c0_125] : memref<16x128x128xbf16, #tpu.memory_space<vmem>>, vector<1x128x128xbf16>
    %198 = vector.shape_cast %197 : vector<1x128x128xbf16> to vector<128x128xbf16>
    %cst_126 = arith.constant dense<0.000000e+00> : vector<1x128xf32>
    %199 = tpu.matmul %196, %198, %cst_126 {dimension_numbers = #tpu.dot_dimension_numbers<[1], [0], [0], [1], [0, 0, 1, 1], [], []>} : vector<1x128xbf16>, vector<128x128xbf16>, vector<1x128xf32> -> vector<1x128xf32>
    %200 = arith.addf %195, %199 : vector<1x128xf32>
    %201 = vector.extract_strided_slice %135 {offsets = [16, 0], sizes = [1, 128], strides = [1, 1]} : vector<19x128xbf16> to vector<1x128xbf16>
    %c13_127 = arith.constant 13 : index
    %c0_128 = arith.constant 0 : index
    %c0_129 = arith.constant 0 : index
    %202 = vector.load %arg7[%c13_127, %c0_128, %c0_129] : memref<16x128x128xbf16, #tpu.memory_space<vmem>>, vector<1x128x128xbf16>
    %203 = vector.shape_cast %202 : vector<1x128x128xbf16> to vector<128x128xbf16>
    %cst_130 = arith.constant dense<0.000000e+00> : vector<1x128xf32>
    %204 = tpu.matmul %201, %203, %cst_130 {dimension_numbers = #tpu.dot_dimension_numbers<[1], [0], [0], [1], [0, 0, 1, 1], [], []>} : vector<1x128xbf16>, vector<128x128xbf16>, vector<1x128xf32> -> vector<1x128xf32>
    %205 = arith.addf %200, %204 : vector<1x128xf32>
    %206 = vector.extract_strided_slice %135 {offsets = [17, 0], sizes = [1, 128], strides = [1, 1]} : vector<19x128xbf16> to vector<1x128xbf16>
    %c14_131 = arith.constant 14 : index
    %c0_132 = arith.constant 0 : index
    %c0_133 = arith.constant 0 : index
    %207 = vector.load %arg7[%c14_131, %c0_132, %c0_133] : memref<16x128x128xbf16, #tpu.memory_space<vmem>>, vector<1x128x128xbf16>
    %208 = vector.shape_cast %207 : vector<1x128x128xbf16> to vector<128x128xbf16>
    %cst_134 = arith.constant dense<0.000000e+00> : vector<1x128xf32>
    %209 = tpu.matmul %206, %208, %cst_134 {dimension_numbers = #tpu.dot_dimension_numbers<[1], [0], [0], [1], [0, 0, 1, 1], [], []>} : vector<1x128xbf16>, vector<128x128xbf16>, vector<1x128xf32> -> vector<1x128xf32>
    %210 = arith.addf %205, %209 : vector<1x128xf32>
    %211 = vector.extract_strided_slice %135 {offsets = [18, 0], sizes = [1, 128], strides = [1, 1]} : vector<19x128xbf16> to vector<1x128xbf16>
    %c15_135 = arith.constant 15 : index
    %c0_136 = arith.constant 0 : index
    %c0_137 = arith.constant 0 : index
    %212 = vector.load %arg7[%c15_135, %c0_136, %c0_137] : memref<16x128x128xbf16, #tpu.memory_space<vmem>>, vector<1x128x128xbf16>
    %213 = vector.shape_cast %212 : vector<1x128x128xbf16> to vector<128x128xbf16>
    %cst_138 = arith.constant dense<0.000000e+00> : vector<1x128xf32>
    %214 = tpu.matmul %211, %213, %cst_138 {dimension_numbers = #tpu.dot_dimension_numbers<[1], [0], [0], [1], [0, 0, 1, 1], [], []>} : vector<1x128xbf16>, vector<128x128xbf16>, vector<1x128xf32> -> vector<1x128xf32>
    %215 = arith.addf %210, %214 : vector<1x128xf32>
    %cst_139 = arith.constant 0.000000e+00 : f32
    %216 = vector.broadcast %cst_139 : f32 to vector<1x128xf32>
    %217 = arith.maximumf %215, %216 : vector<1x128xf32>
    %218 = arith.truncf %217 : vector<1x128xf32> to vector<1x128xbf16>
    %c0_140 = arith.constant 0 : index
    %c0_141 = arith.constant 0 : index
    %219 = vector.load %arg8[%c0_140, %c0_141] : memref<128x128xbf16, #tpu.memory_space<vmem>>, vector<128x128xbf16>
    %cst_142 = arith.constant dense<0.000000e+00> : vector<1x128xf32>
    %220 = tpu.matmul %218, %219, %cst_142 {dimension_numbers = #tpu.dot_dimension_numbers<[1], [0], [0], [1], [0, 0, 1, 1], [], []>} : vector<1x128xbf16>, vector<128x128xbf16>, vector<1x128xf32> -> vector<1x128xf32>
    %221 = arith.addf %220, %4 : vector<1x128xf32>
    %c0_143 = arith.constant 0 : index
    %c0_144 = arith.constant 0 : index
    %c0_145 = arith.constant 0 : index
    %222 = vector.load %arg9[%c0_143, %c0_144, %c0_145] : memref<1x1x128xf32, #tpu.memory_space<vmem>>, vector<1x1x128xf32>
    %223 = vector.shape_cast %222 : vector<1x1x128xf32> to vector<1x128xf32>
    %224 = vector.shape_cast %221 : vector<1x128xf32> to vector<1x1x128xf32>
    tpu.vector_store %arg9[%c0_143, %c0_144, %c0_145], %224 {strides = array<i32>} : memref<1x1x128xf32, #tpu.memory_space<vmem>>, vector<1x1x128xf32>,
    return
  }
  func.func @transform_0(%arg0: i32) -> (i32, i32, i32) {
    %c0_i32 = arith.constant 0 : i32
    %c0_i32_0 = arith.constant 0 : i32
    %c0_i32_1 = arith.constant 0 : i32
    return %arg0, %c0_i32, %c0_i32_0 : i32, i32, i32
  }
  func.func @transform_1(%arg0: i32) -> (i32, i32) {
    %c0_i32 = arith.constant 0 : i32
    %c0_i32_0 = arith.constant 0 : i32
    %c0_i32_1 = arith.constant 0 : i32
    return %c0_i32, %c0_i32_0 : i32, i32
  }
  func.func @transform_2(%arg0: i32) -> (i32, i32) {
    %c0_i32 = arith.constant 0 : i32
    %c0_i32_0 = arith.constant 0 : i32
    %c0_i32_1 = arith.constant 0 : i32
    return %c0_i32, %c0_i32_0 : i32, i32
  }
  func.func @transform_3(%arg0: i32) -> (i32, i32) {
    %c0_i32 = arith.constant 0 : i32
    %c0_i32_0 = arith.constant 0 : i32
    %c0_i32_1 = arith.constant 0 : i32
    return %c0_i32, %c0_i32_0 : i32, i32
  }
  func.func @transform_4(%arg0: i32) -> (i32, i32) {
    %c0_i32 = arith.constant 0 : i32
    %c0_i32_0 = arith.constant 0 : i32
    %c0_i32_1 = arith.constant 0 : i32
    return %c0_i32, %c0_i32_0 : i32, i32
  }
  func.func @transform_5(%arg0: i32) -> (i32, i32, i32) {
    %c0_i32 = arith.constant 0 : i32
    %c0_i32_0 = arith.constant 0 : i32
    %c0_i32_1 = arith.constant 0 : i32
    %c0_i32_2 = arith.constant 0 : i32
    return %c0_i32, %c0_i32_0, %c0_i32_1 : i32, i32, i32
  }
  func.func @transform_6(%arg0: i32) -> (i32, i32, i32) {
    %c0_i32 = arith.constant 0 : i32
    %c0_i32_0 = arith.constant 0 : i32
    %c0_i32_1 = arith.constant 0 : i32
    %c0_i32_2 = arith.constant 0 : i32
    return %c0_i32, %c0_i32_0, %c0_i32_1 : i32, i32, i32
  }
  func.func @transform_7(%arg0: i32) -> (i32, i32) {
    %c0_i32 = arith.constant 0 : i32
    %c0_i32_0 = arith.constant 0 : i32
    %c0_i32_1 = arith.constant 0 : i32
    return %c0_i32, %c0_i32_0 : i32, i32
  }
  func.func @transform_8(%arg0: i32) -> (i32, i32, i32) {
    %c0_i32 = arith.constant 0 : i32
    %c0_i32_0 = arith.constant 0 : i32
    %c0_i32_1 = arith.constant 0 : i32
    return %arg0, %c0_i32, %c0_i32_0 : i32, i32, i32
  }
}

</mosaic_0001>

<bundles_post_ra>
// kernel: sample_convnet_forward.1
= control target key start
LH: loop header
LB: loop body
LE: loop exit
PB: predicated region body
PF: predicated region fallthrough
CT: control target
= control target key end

     0   :  { %13 = vsyncpa [#allocation3], 0  ;;  %s10535_s0 = inlined_call_operand.vmem [shape: bf16[2,196,192], index: 0, kind: input, shape index: {}]   ;;  %s10536_s1 = inlined_call_operand.vmem [shape: bf16[192,128], index: 1, kind: input, shape index: {}]   ;;  %s10537_s2 = inlined_call_operand.vmem [shape: f32[8,128], index: 2, kind: input, shape index: {}]   ;;  %s10538_s3 = inlined_call_operand.vmem [shape: f32[181,128], index: 3, kind: input, shape index: {}]   ;;  %s10539_s4 = inlined_call_operand.vmem [shape: bf16[512,181], index: 4, kind: input, shape index: {}]   ;;  %s10540_s5 = inlined_call_operand.vmem [shape: bf16[16,128,128], index: 5, kind: input, shape index: {}]   ;;  %s10541_s6 = inlined_call_operand.vmem [shape: bf16[16,128,128], index: 6, kind: input, shape index: {}]   ;;  %s10542_s7 = inlined_call_operand.vmem [shape: bf16[128,128], index: 7, kind: input, shape index: {}]   ;;  %s10543_s8 = inlined_call_operand.hbm [shape: f32[2,1,128], index: 8, kind: output, shape index: {}]  }
   0x1   :  { %15 = vsyncpa [#allocation3 + $0x1], 0  ;;  %s8435_s27 = smov 0   ;;  %s8437_s28 = smov 0  }
   0x2   :  { %s8439_s29 = smov 0   ;;  %s8441_s30 = smov 0  }
   0x3 LB: > { %s8456_s9 = sadd.s32 4294967295, %s8383_s30   ;;  %s5842_s10 = sadd.s32 4294967294, %s8383_s30   ;;  %s8383_s30 = sphi %s8441_s30, %s10557_s30   ;;  %s8379_s29 = sphi %s8439_s29, %s10556_s29   ;;  %s8375_s28 = sphi %s8437_s28, %s10555_s28   ;;  %s8371_s27 = sphi %s8435_s27, %s10554_s27  }
   0x4   : > { %s8460_s11 = sadd.s32 1, %s8383_s30   ;;  %s201_s12 = sadd.s32 1, %s8379_s29 }
   0x5   : > { %s198_s13 = ssub.s32 %s8383_s30, %s8460_s11  ;;  %p211_p0 = scmp.ne.s32.totalorder %s8379_s29, %s8375_s28 }
   0x6   : > { %p199_p1 = scmp.eq.s32.totalorder %s198_s13, 0  ;;  %p212_p2 = scmp.eq.s32.totalorder %s8456_s9, 1 }
   0x7   : > { %p217_p3 = scmp.ne.s32.totalorder %s8375_s28, %s8371_s27  ;;  %p218_p4 = scmp.eq.s32.totalorder %s5842_s10, 1 }
   0x8   : > { %s8471_s14 = scalar_select %p199_p1, %s8379_s29, %s201_s12  }
   0x9   : > { %p8473_p5 = por %p212_p2, %p211_p0  ;;  %p8477_p6 = por %p218_p4, %p217_p3 }
   0xa   : > { %p5845_p7 = scmp.ge.s32.totalorder %s8383_s30, 1  ;;  %p265_p8 = scmp.lt.s32.totalorder %s8383_s30, 3 }
   0xc   : > { %p266_p9 = pnand %p5845_p7, %p265_p8 }
   0xe   : > { %269 = sbr.rel (%p266_p9) target bundleno = 2409 (0x969), region = 52 }
  0x15   : > { %v7909_v0 = vld [vmem:[%s10536_s1] sm:$0xff]   ;;  %v10544_v1 = vmov 0   ;;  %p298_p10 = scmp.lt.s32.totalorder %s8456_s9, 1  ;;  %v7910_v2 = vld [vmem:[%s10536_s1 + $0x8] sm:$0xff]   ;;  %v7911_v3 = vld [vmem:[%s10536_s1 + $0x10] sm:$0xff]   ;;  %vm544_vm0 = vcmask 523264  }
  0x16   : > { %584 = vmatprep.subr.bf16.mxu0 %v10544_v1  ;;  %7716 = vmatprep.subr.bf16.mxu1 %v10544_v1  ;;  %v7912_v4 = vld [vmem:[%s10536_s1 + $0x18] sm:$0xff]   ;;  %v7913_v6 = vld [vmem:[%s10536_s1 + $0x20] sm:$0xff]   ;;  %v7914_v7 = vld [vmem:[%s10536_s1 + $0x28] sm:$0xff]   ;;  %vm743_vm1 = vcmask 1046528   ;;  %vm871_vm2 = vcmask 1041408   ;;  %vm1055_vm3 = vcmask 1044480  }
  0x17   : > { %585 = vmatpush1.bf16.msra.mxu0 %v7909_v0  ;;  %s299_s21 = scalar_select %p298_p10, %s8456_s9, 1  ;;  %v7915_v8 = vld [vmem:[%s10536_s1 + $0x30] sm:$0xff]   ;;  %v7916_v9 = vld [vmem:[%s10536_s1 + $0x38] sm:$0xff]   ;;  %v7917_v10 = vld [vmem:[%s10536_s1 + $0x40] sm:$0xff]   ;;  %vm1585_vm4 = vcmask 433152   ;;  %vm1682_vm5 = vcmask 1042432  }
  0x18   : > { %586 = vmatprep.subr.bf16.mxu0 %v10544_v1  ;;  %v7918_v11 = vld [vmem:[%s10536_s1 + $0x48] sm:$0xff]   ;;  %v7919_v12 = vld [vmem:[%s10536_s1 + $0x50] sm:$0xff]   ;;  %v7920_v13 = vld [vmem:[%s10536_s1 + $0x58] sm:$0xff]   ;;  %vm8388_vm6 = vmmov 0   ;;  %s296_s12 = sand.u32 1, %s8375_s28   ;;  %s6740_s19 = sshll.u32 %s8456_s9, 4 }
  0x19   : > { %s7865_s24 = smul.u32 200, %s299_s21  ;;  %s297_s20 = scalar_lea.vmem [#allocation2], %s296_s12 }
  0x1a   : > { %s10493_s23 = scalar_lea.hbm %s10543_s8, %s6740_s19  ;;  %s8389_s25 = smov [#allocation2]  }
  0x1b   : > { %587 = vmatpush1.bf16.msra.mxu0 %v7910_v2  ;;  %s8504_s13 = scalar_lea.vmem %s10535_s0, %s7865_s24  ;;  %s5775_s24 = scalar_lea.sflag [#allocation3], %s296_s12 }
  0x1c   : > { %588 = vmatprep.subr.bf16.mxu0 %v10544_v1  ;;  %v7923_v5 = vld [vmem:[%s8504_s13 + $0x4] ss:$8 sps:$4 sm:$0xff]   ;;  %v7921_v14 = vld [vmem:[%s8504_s13] ss:$8 sps:$4 sm:$0xff]   ;;  %v7924_v15 = vld [vmem:[%s8504_s13 + $0x14] ss:$8 sps:$4 sm:$0xff]  }
  0x1d   : > { %5885 = vmatprep.mubr.msk.bf16.mxu0 %vm544_vm0, %v7923_v5  ;;  %v7926_v16 = vld [vmem:[%s8504_s13 + $0x10] ss:$8 sps:$4 sm:$0xff]   ;;  %v7927_v17 = vld [vmem:[%s8504_s13 + $0x24] ss:$8 sps:$4 sm:$0xff]   ;;  %v7929_v18 = vld [vmem:[%s8504_s13 + $0x20] ss:$8 sps:$4 sm:$0xff]  }
  0x1e   : > { %v7930_v19 = vld [vmem:[%s8504_s13 + $0x34] ss:$8 sps:$4 sm:$0xff]   ;;  %v7932_v20 = vld [vmem:[%s8504_s13 + $0x30] ss:$8 sps:$4 sm:$0xff]   ;;  %v7933_v21 = vld [vmem:[%s8504_s13 + $0x44] ss:$8 sps:$4 sm:$0xff]  }
  0x1f   : > { %589 = vmatpush1.bf16.msra.mxu0 %v7911_v3  ;;  %v7935_v22 = vld [vmem:[%s8504_s13 + $0x40] ss:$8 sps:$4 sm:$0xff]   ;;  %v7936_v23 = vld [vmem:[%s8504_s13 + $0x54] ss:$8 sps:$4 sm:$0xff]   ;;  %v7938_v24 = vld [vmem:[%s8504_s13 + $0x50] ss:$8 sps:$4 sm:$0xff]  }
  0x20   : > { %590 = vmatprep.subr.bf16.mxu0 %v10544_v1  ;;  %v7939_v25 = vld [vmem:[%s8504_s13 + $0x64] ss:$8 sps:$4 sm:$0xff]   ;;  %v7941_v26 = vld [vmem:[%s8504_s13 + $0x60] ss:$8 sps:$4 sm:$0xff]   ;;  %v7942_v27 = vld [vmem:[%s8504_s13 + $0x74] ss:$8 sps:$4 sm:$0xff]  }
  0x21   : > { %v7944_v28 = vld [vmem:[%s8504_s13 + $0x70] ss:$8 sps:$4 sm:$0xff]   ;;  %v7945_v29 = vld [vmem:[%s8504_s13 + $0x84] ss:$8 sps:$4 sm:$0xff]   ;;  %v7947_v30 = vld [vmem:[%s8504_s13 + $0x80] ss:$8 sps:$4 sm:$0xff]  }
  0x22   : > { %v7948_v31 = vld [vmem:[%s8504_s13 + $0x94] ss:$8 sps:$4 sm:$0xff]   ;;  %v7950_v32 = vld [vmem:[%s8504_s13 + $0x90] ss:$8 sps:$4 sm:$0xff]   ;;  %v7951_v33 = vld [vmem:[%s8504_s13 + $0xa4] ss:$8 sps:$4 sm:$0xff]  }
  0x23   : > { %591 = vmatpush1.bf16.msra.mxu0 %v7912_v4  ;;  %v7953_v34 = vld [vmem:[%s8504_s13 + $0xa0] ss:$8 sps:$4 sm:$0xff]   ;;  %v7954_v35 = vld [vmem:[%s8504_s13 + $0xb4] ss:$8 sps:$4 sm:$0xff]   ;;  %v7956_v37 = vld [vmem:[%s8504_s13 + $0xb0] ss:$8 sps:$4 sm:$0xff]  }
  0x24   : > { %592 = vmatprep.subr.bf16.mxu0 %v10544_v1  ;;  %v333_v36 = vld [vmem:[%s8504_s13 + $0xc0] sm:$0x33]  ;;  %s5787_s13 = sshll.u32 %s297_s20, 4  ;;  %s8325_s26 = sshll.u32 %s8389_s25, 4  ;;  %s10495_s13 = int_to_ptr.vmem [resolvable:$true] %s5787_s13  ;;  %s8326_s26 = int_to_ptr.vmem [resolvable:$false] %s8325_s26 }
  0x25   : > { %v5872_v38 = vcombine.high %v333_v36, %v333_v36  ;;  %v5871_v39 = vcombine.low %v333_v36, %v333_v36  ;;  %s8321_s9 = scalar_lea.vmem %s10495_s13, 16  ;;  %s8327_s10 = scalar_lea.vmem %s8326_s26, 32 }
  0x26   : > { %p8322_p11 = scmp.ne.s32.totalorder %s10495_s13, %s8321_s9  ;;  %p8328_p0 = scmp.lt.s32.totalorder %s10495_s13, %s8326_s26 }
  0x27   : > { %593 = vmatpush1.bf16.msra.mxu0 %v7913_v6  ;;  %p8329_p1 = scmp.lt.s32.totalorder %s8327_s10, %s8321_s9 }
  0x28   : > { %594 = vmatprep.subr.bf16.mxu0 %v10544_v1  ;;  %p8323_p12 = pnand %p8322_p11, %p8473_p5 }
  0x29   : > { %p8330_p2 = por %p8329_p1, %p8328_p0 }
  0x2a   : > { %p8324_p13 = pneg %p8323_p12 }
  0x2b   : > { %595 = vmatpush1.bf16.msra.mxu0 %v7914_v7 }
  0x2c   : > { %596 = vmatprep.subr.bf16.mxu0 %v10544_v1  ;;  %p8331_p3 = pnand %p8330_p2, %p8324_p13 }
  0x2f   : > { %597 = vmatpush1.bf16.msra.mxu0 %v7915_v8 }
  0x30   : > { %598 = vmatprep.subr.bf16.mxu0 %v10544_v1 }
  0x33   : > { %599 = vmatpush1.bf16.msra.mxu0 %v7916_v9 }
  0x34   : > { %600 = vmatprep.subr.bf16.mxu0 %v10544_v1 }
  0x37   : > { %601 = vmatpush1.bf16.msra.mxu0 %v7917_v10 }
  0x38   : > { %602 = vmatprep.subr.bf16.mxu0 %v10544_v1 }
  0x3b   : > { %603 = vmatpush1.bf16.msra.mxu0 %v7918_v11 }
  0x3c   : > { %604 = vmatprep.subr.bf16.mxu0 %v10544_v1 }
  0x3f   : > { %605 = vmatpush1.bf16.msra.mxu0 %v7919_v12 }
  0x40   : > { %606 = vmatprep.subr.bf16.mxu0 %v10544_v1 }
  0x43   : > { %607 = vmatpush1.bf16.msra.mxu0 %v7920_v13 }
  0x44   : > { %1688 = vmatprep.subr.bf16.mxu0 %v10544_v1 }
  0x46   : > { %617 = vmatmul.mubr.bf16.vlgmr.msra.gmra.mrb[0].mxu0 %v7921_v14 }
  0x47   : > { %5886 = vmatprep.mubr.msk.bf16.mxu0 %vm544_vm0, %v7924_v15 }
  0x4e   : > { %625 = vmatmul.mubr.bf16.gmra.mrb[4].mxu0 %v7926_v16 }
  0x4f   : > { %5887 = vmatprep.mubr.msk.bf16.mxu0 %vm544_vm0, %v7927_v17  ;;  %v8591_v17 = vld [vmem:[%s10538_s3] sm:$0xff] }
  0x56   : > { %633 = vmatmul.mubr.bf16.gmra.mrb[8].mxu0 %v7929_v18  ;;  %v8596_v18 = vld [vmem:[%s10538_s3 + $0x8] sm:$0xff] }
  0x57   : > { %5888 = vmatprep.mubr.msk.bf16.mxu0 %vm544_vm0, %v7930_v19 }
  0x5e   : > { %641 = vmatmul.mubr.bf16.gmra.mrb[12].mxu0 %v7932_v20 }
  0x5f   : > { %5889 = vmatprep.mubr.msk.bf16.mxu0 %vm544_vm0, %v7933_v21 }
  0x66   : > { %649 = vmatmul.mubr.bf16.gmra.mrb[16].mxu0 %v7935_v22 }
  0x67   : > { %5890 = vmatprep.mubr.msk.bf16.mxu0 %vm544_vm0, %v7936_v23 }
  0x6e   : > { %657 = vmatmul.mubr.bf16.gmra.mrb[20].mxu0 %v7938_v24 }
  0x6f   : > { %5891 = vmatprep.mubr.msk.bf16.mxu0 %vm544_vm0, %v7939_v25 }
  0x76   : > { %665 = vmatmul.mubr.bf16.gmra.mrb[24].mxu0 %v7941_v26  ;;  %v8605_v26 = vld [vmem:[%s10538_s3 + $0x10] sm:$0xff] }
  0x77   : > { %5892 = vmatprep.mubr.msk.bf16.mxu0 %vm544_vm0, %v7942_v27 }
  0x7e   : > { %673 = vmatmul.mubr.bf16.gmra.mrb[28].mxu0 %v7944_v28 }
  0x7f   : > { %5893 = vmatprep.mubr.msk.bf16.mxu0 %vm544_vm0, %v7945_v29 }
  0x86   : > { %681 = vmatmul.mubr.bf16.gmra.mrb[32].mxu0 %v7947_v30 }
  0x87   : > { %5894 = vmatprep.mubr.msk.bf16.mxu0 %vm544_vm0, %v7948_v31 }
  0x8e   : > { %689 = vmatmul.mubr.bf16.gmra.mrb[36].mxu0 %v7950_v32 }
  0x8f   : > { %5895 = vmatprep.mubr.msk.bf16.mxu0 %vm544_vm0, %v7951_v33 }
  0x96   : > { %697 = vmatmul.mubr.bf16.gmra.mrb[40].mxu0 %v7953_v34 }
  0x97   : > { %5896 = vmatprep.mubr.msk.bf16.mxu0 %vm544_vm0, %v7954_v35 }
  0x9e   : > { %705 = vmatmul.mubr.bf16.gmra.mrb[44].mxu0 %v7956_v37 }
  0x9f   : > { %5897 = vmatprep.mubr.msk.bf16.mxu0 %vm544_vm0, %v5872_v38 }
  0xa6   : > { %713 = vmatmul.mubr.bf16.gmra.mrb[48].mxu0 %v5871_v39 }
 0x119   : > { %v618_v40 = vpop.f32.mrb[0].mxu0 }
 0x11a   : > { %v620_v41 = vpop.f32.mrb[1].mxu0  ;;  %v744_v43 = vrot.slane %v618_v40, 1 }
 0x11b   : > { %v621_v42 = vpop.f32.mrb[2].mxu0 }
 0x11c   : > { %v745_v44 = vrot.slane %v621_v42, 1  ;;  %v623_v45 = vpop.f32.mrb[3].mxu0 }
 0x11e   : > { %v746_v46 = vsel %vm743_vm1, %v744_v43, %v745_v44  ;;  %v8621_v43 = vld [vmem:[%s10538_s3 + $0x18] sm:$0xff] }
 0x11f   : > { %v812_v47 = vmax.f32 %v618_v40, %v746_v46 }
 0x121   : > { %v626_v48 = vpop.f32.mrb[4].mxu0 }
 0x122   : > { %v747_v49 = vrot.slane %v626_v48, 1  ;;  %v628_v50 = vpop.f32.mrb[5].mxu0 }
 0x123   : > { %v629_v51 = vpop.f32.mrb[6].mxu0 }
 0x124   : > { %v748_v52 = vsel %vm743_vm1, %v745_v44, %v747_v49  ;;  %v749_v53 = vrot.slane %v629_v51, 1  ;;  %v631_v54 = vpop.f32.mrb[7].mxu0 }
 0x125   : > { %v813_v55 = vmax.f32 %v621_v42, %v748_v52 }
 0x126   : > { %v750_v56 = vsel %vm743_vm1, %v747_v49, %v749_v53 }
 0x127   : > { %v814_v57 = vmax.f32 %v626_v48, %v750_v56  ;;  %v872_v58 = vrot.slane %v813_v55, 6 }
 0x129   : > { %v873_v59 = vrot.slane %v814_v57, 6  ;;  %v634_v60 = vpop.f32.mrb[8].mxu0 }
 0x12a   : > { %v751_v61 = vrot.slane %v634_v60, 1  ;;  %v636_v62 = vpop.f32.mrb[9].mxu0 }
 0x12b   : > { %v874_v63 = vsel %vm871_vm2, %v872_v58, %v873_v59  ;;  %v637_v0 = vpop.f32.mrb[10].mxu0 }
 0x12c   : > { %v8582_v2 = vmax.f32 %v812_v47, %v874_v63  ;;  %v752_v3 = vsel %vm743_vm1, %v749_v53, %v751_v61  ;;  %v753_v4 = vrot.slane %v637_v0, 1  ;;  %v639_v5 = vpop.f32.mrb[11].mxu0 }
 0x12d   : > { %v815_v6 = vmax.f32 %v629_v51, %v752_v3  ;;  %v8630_v51 = vld [vmem:[%s10538_s3 + $0x20] sm:$0xff]  ;;  %v8643_v5 = vld [vmem:[%s10538_s3 + $0x28] sm:$0xff] }
 0x12e   : > { %v754_v7 = vsel %vm743_vm1, %v751_v61, %v753_v4  ;;  %v10546_v13 = vmax.f32 %v8582_v2, 0.0 }
 0x12f   : > { %v875_v8 = vrot.slane %v815_v6, 6  ;;  %v816_v9 = vmax.f32 %v634_v60, %v754_v7 }
 0x130   : > { %v1011_v28 = vmul.f32 %v8591_v17, %v10546_v13 }
 0x131   : > { %v876_v10 = vsel %vm871_vm2, %v873_v59, %v875_v8  ;;  %v877_v11 = vrot.slane %v816_v9, 6  ;;  %v642_v12 = vpop.f32.mrb[12].mxu0 }
 0x132   : > { %v943_v14 = vmax.f32 %v813_v55, %v876_v10  ;;  %v755_v15 = vrot.slane %v642_v12, 1  ;;  %v644_v16 = vpop.f32.mrb[13].mxu0 }
 0x133   : > { %v878_v19 = vsel %vm871_vm2, %v875_v8, %v877_v11  ;;  %v645_v20 = vpop.f32.mrb[14].mxu0 }
 0x134   : > { %v8599_v21 = vmax.f32 %v943_v14, 0.0  ;;  %v944_v22 = vmax.f32 %v814_v57, %v878_v19  ;;  %v756_v23 = vsel %vm743_vm1, %v753_v4, %v755_v15  ;;  %v757_v24 = vrot.slane %v645_v20, 1  ;;  %v647_v25 = vpop.f32.mrb[15].mxu0  ;;  %v8652_v14 = vld [vmem:[%s10538_s3 + $0x30] sm:$0xff] }
 0x135   : > { %v817_v27 = vmax.f32 %v637_v0, %v756_v23 }
 0x136   : > { %v1012_v29 = vmul.f32 %v8596_v18, %v8599_v21  ;;  %v8612_v30 = vmax.f32 %v944_v22, 0.0  ;;  %v758_v31 = vsel %vm743_vm1, %v755_v15, %v757_v24 }
 0x137   : > { %v879_v32 = vrot.slane %v817_v27, 6  ;;  %v818_v33 = vmax.f32 %v642_v12, %v758_v31 }
 0x138   : > { %v1034_v34 = vadd.f32 %v1012_v29, %v1011_v28  ;;  %v1013_v35 = vmul.f32 %v8605_v26, %v8612_v30 }
 0x139   : > { %v880_v36 = vsel %vm871_vm2, %v877_v11, %v879_v32  ;;  %v881_v37 = vrot.slane %v818_v33, 6  ;;  %v650_v38 = vpop.f32.mrb[16].mxu0 }
 0x13a   : > { %v1035_v39 = vadd.f32 %v1034_v34, %v1013_v35  ;;  %v945_v40 = vmax.f32 %v815_v6, %v880_v36  ;;  %v759_v41 = vrot.slane %v650_v38, 1  ;;  %v652_v42 = vpop.f32.mrb[17].mxu0  ;;  %v8665_v35 = vld [vmem:[%s10538_s3 + $0x38] sm:$0xff] }
 0x13b   : > { %v882_v44 = vsel %vm871_vm2, %v879_v32, %v881_v37  ;;  %v653_v45 = vpop.f32.mrb[18].mxu0 }
 0x13c   : > { %v8624_v46 = vmax.f32 %v945_v40, 0.0  ;;  %v946_v47 = vmax.f32 %v816_v9, %v882_v44  ;;  %v760_v48 = vsel %vm743_vm1, %v757_v24, %v759_v41  ;;  %v761_v49 = vrot.slane %v653_v45, 1  ;;  %v655_v50 = vpop.f32.mrb[19].mxu0  ;;  %v8674_v44 = vld [vmem:[%s10538_s3 + $0x40] sm:$0xff] }
 0x13d   : > { %v819_v52 = vmax.f32 %v645_v20, %v760_v48 }
 0x13e   : > { %v1014_v53 = vmul.f32 %v8621_v43, %v8624_v46  ;;  %v8634_v54 = vmax.f32 %v946_v47, 0.0  ;;  %v762_v55 = vsel %vm743_vm1, %v759_v41, %v761_v49 }
 0x13f   : > { %v883_v56 = vrot.slane %v819_v52, 6  ;;  %v820_v57 = vmax.f32 %v650_v38, %v762_v55 }
 0x140   : > { %v1036_v58 = vadd.f32 %v1035_v39, %v1014_v53  ;;  %v1015_v59 = vmul.f32 %v8630_v51, %v8634_v54 }
 0x141   : > { %v884_v60 = vsel %vm871_vm2, %v881_v37, %v883_v56  ;;  %v885_v61 = vrot.slane %v820_v57, 6  ;;  %v658_v62 = vpop.f32.mrb[20].mxu0 }
 0x142   : > { %v1037_v63 = vadd.f32 %v1036_v58, %v1015_v59  ;;  %v947_v0 = vmax.f32 %v817_v27, %v884_v60  ;;  %v763_v3 = vrot.slane %v658_v62, 1  ;;  %v660_v4 = vpop.f32.mrb[21].mxu0 }
 0x143   : > { %v886_v6 = vsel %vm871_vm2, %v883_v56, %v885_v61  ;;  %v661_v7 = vpop.f32.mrb[22].mxu0 }
 0x144   : > { %v8646_v8 = vmax.f32 %v947_v0, 0.0  ;;  %v948_v9 = vmax.f32 %v818_v33, %v886_v6  ;;  %v764_v10 = vsel %vm743_vm1, %v761_v49, %v763_v3  ;;  %v765_v11 = vrot.slane %v661_v7, 1  ;;  %v663_v12 = vpop.f32.mrb[23].mxu0 }
 0x145   : > { %v821_v15 = vmax.f32 %v653_v45, %v764_v10 }
 0x146   : > { %v1016_v16 = vmul.f32 %v8643_v5, %v8646_v8  ;;  %v8656_v19 = vmax.f32 %v948_v9, 0.0  ;;  %v766_v20 = vsel %vm743_vm1, %v763_v3, %v765_v11 }
 0x147   : > { %v887_v22 = vrot.slane %v821_v15, 6  ;;  %v822_v23 = vmax.f32 %v658_v62, %v766_v20 }
 0x148   : > { %v1038_v24 = vadd.f32 %v1037_v63, %v1016_v16  ;;  %v1017_v25 = vmul.f32 %v8652_v14, %v8656_v19  ;;  %v8687_v63 = vld [vmem:[%s10538_s3 + $0x48] sm:$0xff] }
 0x149   : > { %v888_v27 = vsel %vm871_vm2, %v885_v61, %v887_v22  ;;  %v889_v28 = vrot.slane %v822_v23, 6  ;;  %v666_v29 = vpop.f32.mrb[24].mxu0 }
 0x14a   : > { %v1039_v31 = vadd.f32 %v1038_v24, %v1017_v25  ;;  %v949_v32 = vmax.f32 %v819_v52, %v888_v27  ;;  %v767_v33 = vrot.slane %v666_v29, 1  ;;  %v668_v34 = vpop.f32.mrb[25].mxu0 }
 0x14b   : > { %v890_v36 = vsel %vm871_vm2, %v887_v22, %v889_v28  ;;  %v669_v37 = vpop.f32.mrb[26].mxu0 }
 0x14c   : > { %v8668_v38 = vmax.f32 %v949_v32, 0.0  ;;  %v950_v39 = vmax.f32 %v820_v57, %v890_v36  ;;  %v768_v40 = vsel %vm743_vm1, %v765_v11, %v767_v33  ;;  %v769_v41 = vrot.slane %v669_v37, 1  ;;  %v671_v42 = vpop.f32.mrb[27].mxu0  ;;  %v8696_v11 = vld [vmem:[%s10538_s3 + $0x50] sm:$0xff]  ;;  %v8709_v36 = vld [vmem:[%s10538_s3 + $0x58] sm:$0xff] }
 0x14d   : > { %v823_v45 = vmax.f32 %v661_v7, %v768_v40 }
 0x14e   : > { %v1018_v47 = vmul.f32 %v8665_v35, %v8668_v38  ;;  %v8678_v48 = vmax.f32 %v950_v39, 0.0  ;;  %v770_v49 = vsel %vm743_vm1, %v767_v33, %v769_v41 }
 0x14f   : > { %v891_v50 = vrot.slane %v823_v45, 6  ;;  %v824_v52 = vmax.f32 %v666_v29, %v770_v49 }
 0x150   : > { %v1040_v53 = vadd.f32 %v1039_v31, %v1018_v47  ;;  %v1019_v55 = vmul.f32 %v8674_v44, %v8678_v48 }
 0x151   : > { %v892_v56 = vsel %vm871_vm2, %v889_v28, %v891_v50  ;;  %v893_v57 = vrot.slane %v824_v52, 6  ;;  %v674_v58 = vpop.f32.mrb[28].mxu0 }
 0x152   : > { %v1041_v59 = vadd.f32 %v1040_v53, %v1019_v55  ;;  %v951_v60 = vmax.f32 %v821_v15, %v892_v56  ;;  %v771_v61 = vrot.slane %v674_v58, 1  ;;  %v676_v62 = vpop.f32.mrb[29].mxu0 }
 0x153   : > { %v894_v0 = vsel %vm871_vm2, %v891_v50, %v893_v57  ;;  %v677_v3 = vpop.f32.mrb[30].mxu0 }
 0x154   : > { %v8690_v4 = vmax.f32 %v951_v60, 0.0  ;;  %v952_v6 = vmax.f32 %v822_v23, %v894_v0  ;;  %v772_v7 = vsel %vm743_vm1, %v769_v41, %v771_v61  ;;  %v773_v9 = vrot.slane %v677_v3, 1  ;;  %v679_v10 = vpop.f32.mrb[31].mxu0 }
 0x155   : > { %v825_v12 = vmax.f32 %v669_v37, %v772_v7 }
 0x156   : > { %v1020_v15 = vmul.f32 %v8687_v63, %v8690_v4  ;;  %v8700_v16 = vmax.f32 %v952_v6, 0.0  ;;  %v774_v20 = vsel %vm743_vm1, %v771_v61, %v773_v9 }
 0x157   : > { %v895_v22 = vrot.slane %v825_v12, 6  ;;  %v826_v24 = vmax.f32 %v674_v58, %v774_v20 }
 0x158   : > { %v1042_v23 = vadd.f32 %v1041_v59, %v1020_v15  ;;  %v1021_v25 = vmul.f32 %v8696_v11, %v8700_v16 }
 0x159   : > { %v896_v27 = vsel %vm871_vm2, %v893_v57, %v895_v22  ;;  %v897_v28 = vrot.slane %v826_v24, 6  ;;  %v682_v29 = vpop.f32.mrb[32].mxu0 }
 0x15a   : > { %v1043_v31 = vadd.f32 %v1042_v23, %v1021_v25  ;;  %v953_v32 = vmax.f32 %v823_v45, %v896_v27  ;;  %v775_v33 = vrot.slane %v682_v29, 1  ;;  %v684_v34 = vpop.f32.mrb[33].mxu0  ;;  %v8718_v45 = vld [vmem:[%s10538_s3 + $0x60] sm:$0xff] }
 0x15b   : > { %v898_v37 = vsel %vm871_vm2, %v895_v22, %v897_v28  ;;  %v685_v39 = vpop.f32.mrb[34].mxu0 }
 0x15c   : > { %v8712_v40 = vmax.f32 %v953_v32, 0.0  ;;  %v954_v41 = vmax.f32 %v824_v52, %v898_v37  ;;  %v776_v42 = vsel %vm743_vm1, %v773_v9, %v775_v33  ;;  %v777_v47 = vrot.slane %v685_v39, 1  ;;  %v687_v49 = vpop.f32.mrb[35].mxu0  ;;  %v8731_v9 = vld [vmem:[%s10538_s3 + $0x68] sm:$0xff] }
 0x15d   : > { %v827_v50 = vmax.f32 %v677_v3, %v776_v42 }
 0x15e   : > { %v1022_v53 = vmul.f32 %v8709_v36, %v8712_v40  ;;  %v8722_v55 = vmax.f32 %v954_v41, 0.0  ;;  %v778_v56 = vsel %vm743_vm1, %v775_v33, %v777_v47 }
 0x15f   : > { %v899_v57 = vrot.slane %v827_v50, 6  ;;  %v828_v58 = vmax.f32 %v682_v29, %v778_v56 }
 0x160   : > { %v1044_v52 = vadd.f32 %v1043_v31, %v1022_v53  ;;  %v1023_v59 = vmul.f32 %v8718_v45, %v8722_v55 }
 0x161   : > { %v900_v60 = vsel %vm871_vm2, %v897_v28, %v899_v57  ;;  %v901_v61 = vrot.slane %v828_v58, 6  ;;  %v690_v62 = vpop.f32.mrb[36].mxu0 }
 0x162   : > { %v1045_v0 = vadd.f32 %v1044_v52, %v1023_v59  ;;  %v955_v6 = vmax.f32 %v825_v12, %v900_v60  ;;  %v779_v3 = vrot.slane %v690_v62, 1  ;;  %v692_v7 = vpop.f32.mrb[37].mxu0  ;;  %v8740_v12 = vld [vmem:[%s10538_s3 + $0x70] sm:$0xff] }
 0x163   : > { %v902_v10 = vsel %vm871_vm2, %v899_v57, %v901_v61  ;;  %v693_v15 = vpop.f32.mrb[38].mxu0  ;;  %v8753_v57 = vld [vmem:[%s10538_s3 + $0x78] sm:$0xff] }
 0x164   : > { %v8734_v20 = vmax.f32 %v955_v6, 0.0  ;;  %v956_v22 = vmax.f32 %v826_v24, %v902_v10  ;;  %v780_v23 = vsel %vm743_vm1, %v777_v47, %v779_v3  ;;  %v781_v25 = vrot.slane %v693_v15, 1  ;;  %v695_v27 = vpop.f32.mrb[39].mxu0 }
 0x165   : > { %v829_v28 = vmax.f32 %v685_v39, %v780_v23 }
 0x166   : > { %v1024_v29 = vmul.f32 %v8731_v9, %v8734_v20  ;;  %v8744_v31 = vmax.f32 %v956_v22, 0.0  ;;  %v782_v32 = vsel %vm743_vm1, %v779_v3, %v781_v25 }
 0x167   : > { %v903_v33 = vrot.slane %v829_v28, 6  ;;  %v830_v34 = vmax.f32 %v690_v62, %v782_v32 }
 0x168   : > { %v1046_v24 = vadd.f32 %v1045_v0, %v1024_v29  ;;  %v1025_v37 = vmul.f32 %v8740_v12, %v8744_v31 }
 0x169   : > { %v904_v41 = vsel %vm871_vm2, %v901_v61, %v903_v33  ;;  %v905_v42 = vrot.slane %v830_v34, 6  ;;  %v698_v47 = vpop.f32.mrb[40].mxu0 }
 0x16a   : > { %v1047_v49 = vadd.f32 %v1046_v24, %v1025_v37  ;;  %v957_v53 = vmax.f32 %v827_v50, %v904_v41  ;;  %v783_v39 = vrot.slane %v698_v47, 1  ;;  %v700_v56 = vpop.f32.mrb[41].mxu0  ;;  %v8762_v50 = vld [vmem:[%s10538_s3 + $0x80] sm:$0xff] }
 0x16b   : > { %v906_v52 = vsel %vm871_vm2, %v903_v33, %v905_v42  ;;  %v701_v59 = vpop.f32.mrb[42].mxu0 }
 0x16c   : > { %v8756_v60 = vmax.f32 %v957_v53, 0.0  ;;  %v958_v62 = vmax.f32 %v828_v58, %v906_v52  ;;  %v784_v0 = vsel %vm743_vm1, %v781_v25, %v783_v39  ;;  %v785_v61 = vrot.slane %v701_v59, 1  ;;  %v703_v6 = vpop.f32.mrb[43].mxu0  ;;  %v8775_v53 = vld [vmem:[%s10538_s3 + $0x88] sm:$0xff] }
 0x16d   : > { %v831_v3 = vmax.f32 %v693_v15, %v784_v0 }
 0x16e   : > { %v1026_v7 = vmul.f32 %v8753_v57, %v8756_v60  ;;  %v8766_v10 = vmax.f32 %v958_v62, 0.0  ;;  %v786_v22 = vsel %vm743_vm1, %v783_v39, %v785_v61 }
 0x16f   : > { %v907_v23 = vrot.slane %v831_v3, 6  ;;  %v832_v27 = vmax.f32 %v698_v47, %v786_v22 }
 0x170   : > { %v1048_v58 = vadd.f32 %v1047_v49, %v1026_v7  ;;  %v1027_v25 = vmul.f32 %v8762_v50, %v8766_v10 }
 0x171   : > { %v908_v29 = vsel %vm871_vm2, %v905_v42, %v907_v23  ;;  %v909_v32 = vrot.slane %v832_v27, 6  ;;  %v706_v33 = vpop.f32.mrb[44].mxu0 }
 0x172   : > { %v1049_v24 = vadd.f32 %v1048_v58, %v1027_v25  ;;  %v959_v37 = vmax.f32 %v829_v28, %v908_v29  ;;  %v787_v15 = vrot.slane %v706_v33, 1  ;;  %v708_v41 = vpop.f32.mrb[45].mxu0  ;;  %v8784_v28 = vld [vmem:[%s10538_s3 + $0x90] sm:$0xff] }
 0x173   : > { %v910_v39 = vsel %vm871_vm2, %v907_v23, %v909_v32  ;;  %v709_v47 = vpop.f32.mrb[46].mxu0  ;;  %10550 = vst [vmem:[#allocation5_spill] sm:$0xff] %v8784_v28 }
 0x174   : > { %v8778_v49 = vmax.f32 %v959_v37, 0.0  ;;  %v960_v56 = vmax.f32 %v830_v34, %v910_v39  ;;  %v788_v52 = vsel %vm743_vm1, %v785_v61, %v787_v15  ;;  %v711_v42 = vpop.f32.mrb[47].mxu0  ;;  %v837_v0 = vrot.slane %v709_v47, 1 }
 0x175   : > { %v833_v62 = vmax.f32 %v701_v59, %v788_v52 }
 0x176   : > { %v1028_v6 = vmul.f32 %v8775_v53, %v8778_v49  ;;  %v8788_v7 = vmax.f32 %v960_v56, 0.0  ;;  %v838_v23 = vsel %vm743_vm1, %v787_v15, %v837_v0  ;;  %v8797_v56 = vld [vmem:[%s10538_s3 + $0x98] sm:$0xff] }
 0x177   : > { %v911_v22 = vrot.slane %v833_v62, 6  ;;  %v844_v61 = vmax.f32 %v706_v33, %v838_v23 }
 0x178   : > { %v1050_v58 = vadd.f32 %v1049_v24, %v1028_v6  ;;  %v1029_v34 = vmul.f32 %v8784_v28, %v8788_v7 }
 0x179   : > { %v912_v25 = vsel %vm871_vm2, %v909_v32, %v911_v22  ;;  %v714_v29 = vpop.f32.mrb[48].mxu0  ;;  %v913_v59 = vrot.slane %v844_v61, 6 }
 0x17a   : > { %v1051_v37 = vadd.f32 %v1050_v58, %v1029_v34  ;;  %v961_v41 = vmax.f32 %v831_v3, %v912_v25  ;;  %v839_v39 = vrot.slane %v714_v29, 1  ;;  %v716_v52 = vpop.f32.mrb[49].mxu0  ;;  %v8805_v58 = vld [vmem:[%s10538_s3 + $0xa0] sm:$0xff] }
 0x17b   : > { %v717_v42 = vpop.f32.mrb[50].mxu0  ;;  %v914_v24 = vsel %vm871_vm2, %v911_v22, %v913_v59  ;;  %v834_v52 = vmax.f32 %v706_v33, %v787_v15 }
 0x17c   : > { %v984_v1 = vmax.f32 %v961_v41, 0.0  ;;  %v840_v6 = vsel %vm743_vm1, %v837_v0, %v839_v39  ;;  %v846_v23 = vmax.f32 %v714_v29, %v839_v39  ;;  %v718_v13 = vpop.f32.mrb[51].mxu0  ;;  %v962_v32 = vmax.f32 %v832_v27, %v914_v24  ;;  %v8813_v29 = vld [vmem:[%s10538_s3 + $0xa8] sm:$0xff]  ;;  %v8818_v39 = vld [vmem:[%s10538_s3 + $0xb0] sm:$0x1f] }
 0x17d   : > { %v845_v28 = vmax.f32 %v709_v47, %v840_v6 }
 0x17e   : > { %v1030_v3 = vmul.f32 %v8797_v56, %v984_v1  ;;  %v917_v34 = vrot.slane %v846_v23, 6  ;;  %v985_v61 = vmax.f32 %v962_v32, 0.0 }
 0x17f   : > { %v915_v25 = vrot.slane %v845_v28, 6 }
 0x180   : > { %v1052_v41 = vadd.f32 %v1051_v37, %v1030_v3  ;;  %v1031_v22 = vmul.f32 %v8805_v58, %v985_v61 }
 0x181   : > { %v916_v0 = vsel %vm871_vm2, %v913_v59, %v915_v25  ;;  %v918_v13 = vsel %vm871_vm2, %v915_v25, %v917_v34 }
 0x182   : > { %v963_v27 = vmax.f32 %v833_v62, %v916_v0  ;;  %v964_v47 = vmax.f32 %v834_v52, %v918_v13  ;;  %v1053_v33 = vadd.f32 %v1052_v41, %v1031_v22  ;;  %v10551_v22 = vmax.f32 %v8582_v2, 0.0 }
 0x184   : > { %v986_v15 = vmax.f32 %v963_v27, 0.0  ;;  %v987_v28 = vmax.f32 %v964_v47, 0.0 }
 0x186   : > { %v1032_v37 = vmul.f32 %v8813_v29, %v986_v15  ;;  %v1033_v59 = vmul.f32 %v8818_v39, %v987_v28 }
 0x188   : > { %v1054_v62 = vadd.f32 %v1053_v33, %v1032_v37  ;;  %v1056_v42 = vsel %vm1055_vm3, %v1033_v59, 0.0 }
 0x18a   : > { %v1057_v24 = vadd.f32 %v1056_v42, %v1054_v62 }
 0x18c   : > { %v1058_v6 = vrot.slane %v1057_v24, 4 }
 0x18e   : > { %v1059_v23 = vadd.f32 %v1058_v6, %v1057_v24 }
 0x190   : > { %v1060_v32 = vrot.slane %v1059_v23, 2 }
 0x192   : > { %v1061_v3 = vadd.f32 %v1060_v32, %v1059_v23 }
 0x194   : > { %v1062_v34 = vrot.slane %v1061_v3, 1 }
 0x196   : > { %v1063_v25 = vadd.f32 %v1062_v34, %v1061_v3 }
 0x198   : > { %v1064_v52 = vmul.f32 0.00591716, %v1063_v25 }
 0x19a   : > { %v8823_v0 = vsub.f32 %v986_v15, %v1064_v52  ;;  %v8825_v41 = vsub.f32 %v987_v28, %v1064_v52  ;;  %v8829_v13 = vsub.f32 %v10551_v22, %v1064_v52  ;;  %v8832_v27 = vsub.f32 %v8599_v21, %v1064_v52 }
 0x19b   : > { %v8835_v47 = vsub.f32 %v8612_v30, %v1064_v52  ;;  %v8838_v33 = vsub.f32 %v8624_v46, %v1064_v52  ;;  %v8841_v37 = vsub.f32 %v8634_v54, %v1064_v52  ;;  %v8844_v15 = vsub.f32 %v8646_v8, %v1064_v52 }
 0x19c   : > { %v8847_v28 = vsub.f32 %v8656_v19, %v1064_v52  ;;  %v8850_v2 = vsub.f32 %v8668_v38, %v1064_v52  ;;  %v8853_v21 = vsub.f32 %v8678_v48, %v1064_v52  ;;  %v8856_v30 = vsub.f32 %v8690_v4, %v1064_v52 }
 0x19d   : > { %v8859_v46 = vsub.f32 %v8700_v16, %v1064_v52  ;;  %v8862_v54 = vsub.f32 %v8712_v40, %v1064_v52  ;;  %v8865_v8 = vsub.f32 %v8722_v55, %v1064_v52  ;;  %v8868_v19 = vsub.f32 %v8734_v20, %v1064_v52 }
 0x19e   : > { %v8871_v38 = vsub.f32 %v8744_v31, %v1064_v52  ;;  %v8874_v48 = vsub.f32 %v8756_v60, %v1064_v52  ;;  %v8877_v4 = vsub.f32 %v8766_v10, %v1064_v52  ;;  %v8880_v16 = vsub.f32 %v8778_v49, %v1064_v52  ;;  %v7961_v49 = vld [vmem:[%s10539_s4 + $0x4] ss:$8 sps:$4 sm:$0xff]  }
 0x19f   : > { %v8883_v40 = vsub.f32 %v8788_v7, %v1064_v52  ;;  %v8885_v55 = vsub.f32 %v984_v1, %v1064_v52  ;;  %v8887_v59 = vsub.f32 %v985_v61, %v1064_v52  ;;  %v1088_v20 = vmul.f32 %v8829_v13, %v8591_v17  ;;  %5963 = vmatprep.mubr.msk.bf16.mxu0 %vm1585_vm4, %v7961_v49 }
 0x1a0   : > { %v1089_v31 = vmul.f32 %v8832_v27, %v8596_v18  ;;  %v1090_v60 = vmul.f32 %v8835_v47, %v8605_v26  ;;  %v1091_v1 = vmul.f32 %v8838_v33, %v8621_v43  ;;  %v1092_v7 = vmul.f32 %v8841_v37, %v8630_v51 }
 0x1a1   : > { %v1111_v10 = vmul.f32 %v1088_v20, %v1088_v20  ;;  %v1093_v18 = vmul.f32 %v8844_v15, %v8643_v5  ;;  %v1094_v24 = vmul.f32 %v8847_v28, %v8652_v14  ;;  %v1095_v43 = vmul.f32 %v8850_v2, %v8665_v35 }
 0x1a2   : > { %v1112_v62 = vmul.f32 %v1089_v31, %v1089_v31  ;;  %v1113_v61 = vmul.f32 %v1090_v60, %v1090_v60  ;;  %v1114_v26 = vmul.f32 %v1091_v1, %v1091_v1  ;;  %v1115_v6 = vmul.f32 %v1092_v7, %v1092_v7 }
 0x1a3   : > { %v1116_v32 = vmul.f32 %v1093_v18, %v1093_v18  ;;  %v1096_v3 = vmul.f32 %v8853_v21, %v8674_v44  ;;  %v1117_v34 = vmul.f32 %v1094_v24, %v1094_v24  ;;  %v1097_v5 = vmul.f32 %v8856_v30, %v8687_v63 }
 0x1a4   : > { %v1134_v17 = vadd.f32 %v1112_v62, %v1111_v10  ;;  %v1118_v52 = vmul.f32 %v1095_v43, %v1095_v43  ;;  %v1098_v14 = vmul.f32 %v8859_v46, %v8696_v11  ;;  %v1099_v35 = vmul.f32 %v8862_v54, %v8709_v36  ;;  %v10552_v43 = vld [vmem:[#allocation5_spill] sm:$0xff] }
 0x1a5   : > { %v1119_v20 = vmul.f32 %v1096_v3, %v1096_v3  ;;  %v1120_v60 = vmul.f32 %v1097_v5, %v1097_v5  ;;  %v1100_v44 = vmul.f32 %v8865_v8, %v8718_v45  ;;  %v1101_v63 = vmul.f32 %v8868_v19, %v8731_v9 }
 0x1a6   : > { %v1135_v42 = vadd.f32 %v1134_v17, %v1113_v61  ;;  %v1121_v62 = vmul.f32 %v1098_v14, %v1098_v14  ;;  %v1122_v1 = vmul.f32 %v1099_v35, %v1099_v35  ;;  %v1102_v11 = vmul.f32 %v8871_v38, %v8740_v12 }
 0x1a7   : > { %v1123_v61 = vmul.f32 %v1100_v44, %v1100_v44  ;;  %v1103_v36 = vmul.f32 %v8874_v48, %v8753_v57  ;;  %v1124_v18 = vmul.f32 %v1101_v63, %v1101_v63  ;;  %v1104_v45 = vmul.f32 %v8877_v4, %v8762_v50 }
 0x1a8   : > { %v1136_v23 = vadd.f32 %v1135_v42, %v1114_v26  ;;  %v1125_v42 = vmul.f32 %v1102_v11, %v1102_v11  ;;  %v1105_v9 = vmul.f32 %v8880_v16, %v8775_v53  ;;  %v1106_v12 = vmul.f32 %v8883_v40, %v10552_v43 }
 0x1a9   : > { %v1107_v57 = vmul.f32 %v8885_v55, %v8797_v56  ;;  %v1108_v50 = vmul.f32 %v8887_v59, %v8805_v58  ;;  %v1110_v53 = vmul.f32 %v8825_v41, %v8818_v39  ;;  %v7982_v39 = vld [vmem:[%s10539_s4 + $0x74] ss:$8 sps:$4 sm:$0xff]  }
 0x1aa   : > { %v1137_v51 = vadd.f32 %v1136_v23, %v1115_v6  ;;  %v1126_v6 = vmul.f32 %v1103_v36, %v1103_v36  ;;  %v1128_v3 = vmul.f32 %v1105_v9, %v1105_v9  ;;  %5970 = vmatprep.mubr.msk.bf16.mxu1 %vm1585_vm4, %v7982_v39  ;;  %v8952_v9 = vld [vmem:[%s10537_s2 + $0x1] ss:$0 sm:$0xff] }
 0x1ab   : > { %v1133_v35 = vmul.f32 %v1110_v53, %v1110_v53 }
 0x1ac   : > { %v1138_v25 = vadd.f32 %v1137_v51, %v1116_v32  ;;  %v1127_v32 = vmul.f32 %v1104_v45, %v1104_v45 }
 0x1ad   : > { %v1155_v44 = vsel %vm1055_vm3, %v1133_v35, 0.0 }
 0x1ae   : > { %v1139_v22 = vadd.f32 %v1138_v25, %v1117_v34  ;;  %v1129_v25 = vmul.f32 %v1106_v12, %v1106_v12 }
 0x1b0   : > { %v1140_v31 = vadd.f32 %v1139_v22, %v1118_v52  ;;  %v1109_v52 = vmul.f32 %v8823_v0, %v8813_v29  ;;  %v1130_v22 = vmul.f32 %v1107_v57, %v1107_v57 }
 0x1b2   : > { %v1141_v10 = vadd.f32 %v1140_v31, %v1119_v20  ;;  %v1131_v20 = vmul.f32 %v1108_v50, %v1108_v50 }
 0x1b4   : > { %v1142_v49 = vadd.f32 %v1141_v10, %v1120_v60  ;;  %v1132_v60 = vmul.f32 %v1109_v52, %v1109_v52 }
 0x1b6   : > { %v1143_v7 = vadd.f32 %v1142_v49, %v1121_v62 }
 0x1b8   : > { %v1144_v17 = vadd.f32 %v1143_v7, %v1122_v1 }
 0x1ba   : > { %v1145_v26 = vadd.f32 %v1144_v17, %v1123_v61  ;;  %v1167_v17 = vlaneseq }
 0x1bc   : > { %v1146_v24 = vadd.f32 %v1145_v26, %v1124_v18  ;;  %v1168_v36 = vshrl.u32 %v1167_v17, 7  ;;  %v304_v18 = vld [vmem:[%s10537_s2] sm:$0x1] }
 0x1be   : > { %v1147_v23 = vadd.f32 %v1146_v24, %v1125_v42  ;;  %v1169_v26 = vsub.s32 0, %v1168_v36 }
 0x1c0   : > { %v1148_v51 = vadd.f32 %v1147_v23, %v1126_v6 }
 0x1c2   : > { %v1149_v34 = vadd.f32 %v1148_v51, %v1127_v32 }
 0x1c4   : > { %v1150_v5 = vadd.f32 %v1149_v34, %v1128_v3 }
 0x1c6   : > { %v1151_v14 = vadd.f32 %v1150_v5, %v1129_v25 }
 0x1c8   : > { %v1152_v31 = vadd.f32 %v1151_v14, %v1130_v22 }
 0x1ca   : > { %v1153_v56 = vadd.f32 %v1152_v31, %v1131_v20 }
 0x1cc   : > { %v1154_v10 = vadd.f32 %v1153_v56, %v1132_v60 }
 0x1ce   : > { %v1156_v62 = vadd.f32 %v1155_v44, %v1154_v10 }
 0x1d0   : > { %v1157_v58 = vrot.slane %v1156_v62, 4 }
 0x1d2   : > { %v1158_v49 = vadd.f32 %v1157_v58, %v1156_v62 }
 0x1d4   : > { %v1159_v63 = vrot.slane %v1158_v49, 2 }
 0x1d6   : > { %v1160_v1 = vadd.f32 %v1159_v63, %v1158_v49 }
 0x1d8   : > { %v1161_v29 = vrot.slane %v1160_v1, 1 }
 0x1da   : > { %v1162_v7 = vadd.f32 %v1161_v29, %v1160_v1 }
 0x1dc   : > { %v1163_v11 = vmul.f32 0.00591716, %v1162_v7 }
 0x1de   : > { %v1164_v61 = vadd.f32 1e-05, %v1163_v11 }
 0x1e0   : > { %8319 = vrsqrt.f32 %v1164_v61 }
 0x1ea   : > { %v8320_v45 = vpop.eup %8319 }
 0x1eb   : > { %v1166_v42 = vmul.f32 %v8320_v45, %v304_v18 }
 0x1ed   : > { %v8947_v24 = vrot.slane %v1166_v42, %v1169_v26 }
 0x1ef   : > { %v1171_v6 = vmul.f32 %v8947_v24, %v8829_v13  ;;  %v1172_v23 = vmul.f32 %v8947_v24, %v8832_v27  ;;  %v1173_v43 = vmul.f32 %v8947_v24, %v8835_v47  ;;  %v1174_v12 = vmul.f32 %v8947_v24, %v8838_v33 }
 0x1f0   : > { %v1175_v57 = vmul.f32 %v8947_v24, %v8841_v37  ;;  %v1176_v27 = vmul.f32 %v8947_v24, %v8844_v15  ;;  %v10553_v47 = vmov 0   ;;  %v1177_v33 = vmul.f32 %v8947_v24, %v8847_v28 }
 0x1f1   : > { %v1198_v32 = vadd.f32 %v8952_v9, %v1171_v6  ;;  %v1199_v51 = vadd.f32 %v8952_v9, %v1172_v23  ;;  %v1200_v34 = vadd.f32 %v8952_v9, %v1173_v43  ;;  %v1201_v13 = vadd.f32 %v8952_v9, %v1174_v12  ;;  %v7959_v6 = vld [vmem:[%s10539_s4] ss:$8 sps:$4 sm:$0xff]   ;;  %v7980_v23 = vld [vmem:[%s10539_s4 + $0x70] ss:$8 sps:$4 sm:$0xff]   ;;  %v7962_v43 = vld [vmem:[%s10539_s4 + $0x14] ss:$8 sps:$4 sm:$0xff]  }
 0x1f2   : > { %v1178_v37 = vmul.f32 %v8947_v24, %v8850_v2  ;;  %v1202_v25 = vadd.f32 %v8952_v9, %v1175_v57  ;;  %v1203_v5 = vadd.f32 %v8952_v9, %v1176_v27  ;;  %v1204_v15 = vadd.f32 %v8952_v9, %v1177_v33  ;;  %v7983_v12 = vld [vmem:[%s10539_s4 + $0x84] ss:$8 sps:$4 sm:$0xff]   ;;  %v7964_v57 = vld [vmem:[%s10539_s4 + $0x10] ss:$8 sps:$4 sm:$0xff]   ;;  %v7967_v33 = vld [vmem:[%s10539_s4 + $0x20] ss:$8 sps:$4 sm:$0xff]  }
 0x1f3   : > { %v1221_v3 = vpack.c.bf16 %v1199_v51, %v1198_v32  ;;  %v1222_v50 = vpack.c.bf16 %v1201_v13, %v1200_v34  ;;  %v1179_v28 = vmul.f32 %v8947_v24, %v8853_v21  ;;  %v1180_v2 = vmul.f32 %v8947_v24, %v8856_v30  ;;  %v7999_v32 = vld [vmem:[%s10540_s5 + $0x8] sm:$0xff]   ;;  %v8002_v51 = vld [vmem:[%s10540_s5 + $0x10] sm:$0xff]   ;;  %v8004_v27 = vld [vmem:[%s10540_s5 + $0x18] sm:$0xff]  }
 0x1f4   : > { %v1205_v53 = vadd.f32 %v8952_v9, %v1178_v37  ;;  %v1223_v52 = vpack.c.bf16 %v1203_v5, %v1202_v25  ;;  %v1181_v31 = vmul.f32 %v8947_v24, %v8859_v46  ;;  %v1182_v21 = vmul.f32 %v8947_v24, %v8862_v54  ;;  %v7965_v34 = vld [vmem:[%s10539_s4 + $0x24] ss:$8 sps:$4 sm:$0xff]   ;;  %v7986_v13 = vld [vmem:[%s10539_s4 + $0x94] ss:$8 sps:$4 sm:$0xff]   ;;  %v7988_v37 = vld [vmem:[%s10539_s4 + $0x90] ss:$8 sps:$4 sm:$0xff]  }
 0x1f5   : > { %1689 = vmatpush1.bf16.msra.mxu0 %v1221_v3  ;;  %7728 = vmatpush1.bf16.msra.mxu1 %v1221_v3  ;;  %v1206_v14 = vadd.f32 %v8952_v9, %v1179_v28  ;;  %v1207_v20 = vadd.f32 %v8952_v9, %v1180_v2  ;;  %v1183_v30 = vmul.f32 %v8947_v24, %v8865_v8  ;;  %v7985_v3 = vld [vmem:[%s10539_s4 + $0x80] ss:$8 sps:$4 sm:$0xff]   ;;  %v7989_v25 = vld [vmem:[%s10539_s4 + $0xa4] ss:$8 sps:$4 sm:$0xff]   ;;  %v7992_v28 = vld [vmem:[%s10539_s4 + $0xb4] ss:$8 sps:$4 sm:$0xff]  }
 0x1f6   : > { %1690 = vmatprep.subr.bf16.mxu0 %v10553_v47  ;;  %7717 = vmatprep.subr.bf16.mxu1 %v10553_v47  ;;  %v1224_v22 = vpack.c.bf16 %v1205_v53, %v1204_v15  ;;  %v1208_v60 = vadd.f32 %v8952_v9, %v1181_v31  ;;  %v1209_v56 = vadd.f32 %v8952_v9, %v1182_v21  ;;  %v8006_v5 = vld [vmem:[%s10540_s5 + $0x28] sm:$0xff]   ;;  %v7970_v15 = vld [vmem:[%s10539_s4 + $0x30] ss:$8 sps:$4 sm:$0xff]  }
 0x1f7   : > { %v1225_v35 = vpack.c.bf16 %v1207_v20, %v1206_v14  ;;  %v1184_v46 = vmul.f32 %v8947_v24, %v8868_v19  ;;  %v1210_v54 = vadd.f32 %v8952_v9, %v1183_v30  ;;  %v1185_v8 = vmul.f32 %v8947_v24, %v8871_v38  ;;  %v7991_v53 = vld [vmem:[%s10539_s4 + $0xa0] ss:$8 sps:$4 sm:$0xff]   ;;  %v7974_v14 = vld [vmem:[%s10539_s4 + $0x54] ss:$8 sps:$4 sm:$0xff]   ;;  %v7995_v20 = vld [vmem:[%s10539_s4 + $0xc4] ss:$8 sps:$4 sm:$0xff]  }
 0x1f8   : > { %v1226_v10 = vpack.c.bf16 %v1209_v56, %v1208_v60  ;;  %v1186_v62 = vmul.f32 %v8947_v24, %v8874_v48  ;;  %v1187_v19 = vmul.f32 %v8947_v24, %v8877_v4  ;;  %v1188_v38 = vmul.f32 %v8947_v24, %v8880_v16  ;;  %v7973_v2 = vld [vmem:[%s10539_s4 + $0x40] ss:$8 sps:$4 sm:$0xff]   ;;  %v7976_v31 = vld [vmem:[%s10539_s4 + $0x50] ss:$8 sps:$4 sm:$0xff]   ;;  %v7977_v30 = vld [vmem:[%s10539_s4 + $0x64] ss:$8 sps:$4 sm:$0xff]  }
 0x1f9   : > { %1691 = vmatpush1.bf16.msra.mxu0 %v1222_v50  ;;  %7729 = vmatpush1.bf16.msra.mxu1 %v1222_v50  ;;  %v1211_v44 = vadd.f32 %v8952_v9, %v1184_v46  ;;  %v1212_v49 = vadd.f32 %v8952_v9, %v1185_v8  ;;  %v1189_v48 = vmul.f32 %v8947_v24, %v8883_v40  ;;  %v7968_v50 = vld [vmem:[%s10539_s4 + $0x34] ss:$8 sps:$4 sm:$0xff]   ;;  %v7998_v21 = vld [vmem:[%s10539_s4 + $0xc0] ss:$8 sps:$4 sm:$0xff]   ;;  %v8003_v56 = vld [vmem:[%s10539_s4 + $0xd0] ss:$8 sps:$4 sm:$0xff]  }
 0x1fa   : > { %1692 = vmatprep.subr.bf16.mxu0 %v10553_v47  ;;  %7718 = vmatprep.subr.bf16.mxu1 %v10553_v47  ;;  %v1213_v63 = vadd.f32 %v8952_v9, %v1186_v62  ;;  %v1214_v4 = vadd.f32 %v8952_v9, %v1187_v19  ;;  %v1215_v1 = vadd.f32 %v8952_v9, %v1188_v38  ;;  %v7979_v60 = vld [vmem:[%s10539_s4 + $0x60] ss:$8 sps:$4 sm:$0xff]   ;;  %v8007_v46 = vld [vmem:[%s10540_s5 + $0x30] sm:$0xff]  }
 0x1fb   : > { %v1227_v58 = vpack.c.bf16 %v1211_v44, %v1210_v54  ;;  %v1190_v29 = vmul.f32 %v8947_v24, %v8885_v55  ;;  %v1216_v16 = vadd.f32 %v8952_v9, %v1189_v48  ;;  %v1191_v7 = vmul.f32 %v8947_v24, %v8887_v59  ;;  %v8008_v54 = vld [vmem:[%s10540_s5 + $0x38] sm:$0xff]   ;;  %v8011_v44 = vld [vmem:[%s10540_s5 + $0x40] sm:$0xff]  }
 0x1fc   : > { %v1228_v39 = vpack.c.bf16 %v1213_v63, %v1212_v49  ;;  %v1229_v40 = vpack.c.bf16 %v1215_v1, %v1214_v4  ;;  %v1192_v61 = vmul.f32 %v8947_v24, %v8823_v0  ;;  %v1193_v55 = vmul.f32 %v8947_v24, %v8825_v41  ;;  %v7997_v24 = vld [vmem:[%s10540_s5] sm:$0xff]   ;;  %v8014_v62 = vld [vmem:[%s10539_s4 + $0xf4] ss:$8 sps:$4 sm:$0xff]   ;;  %v8017_v19 = vld [vmem:[%s10539_s4 + $0xf0] ss:$8 sps:$4 sm:$0xff]  }
 0x1fd   : > { %1693 = vmatpush1.bf16.msra.mxu0 %v1223_v52  ;;  %7730 = vmatpush1.bf16.msra.mxu1 %v1223_v52  ;;  %v1217_v11 = vadd.f32 %v8952_v9, %v1190_v29  ;;  %v1218_v36 = vadd.f32 %v8952_v9, %v1191_v7  ;;  %v8386_v0 = vmov 65535   ;;  %v7971_v52 = vld [vmem:[%s10539_s4 + $0x44] ss:$8 sps:$4 sm:$0xff]   ;;  %v8012_v8 = vld [vmem:[%s10539_s4 + $0xe0] ss:$8 sps:$4 sm:$0xff]  }
 0x1fe   : > { %1694 = vmatprep.subr.bf16.mxu0 %v10553_v47  ;;  %7719 = vmatprep.subr.bf16.mxu1 %v10553_v47  ;;  %v1219_v59 = vadd.f32 %v8952_v9, %v1192_v61  ;;  %v1220_v18 = vadd.f32 %v8952_v9, %v1193_v55  ;;  %v1683_v26 = vsel %vm871_vm2, 4294967295, %v8386_v0  ;;  %v8026_v49 = vld [vmem:[%s10539_s4 + $0x100] ss:$8 sps:$4 sm:$0xff]   ;;  %v8028_v63 = vld [vmem:[%s10539_s4 + $0x114] ss:$8 sps:$4 sm:$0xff]  }
 0x1ff   : > { %v1230_v17 = vpack.c.bf16 %v1217_v11, %v1216_v16  ;;  %v1684_v42 = vsel %vm1682_vm5, %v1683_v26, 0  ;;  %v8031_v38 = vld [vmem:[%s10539_s4 + $0x110] ss:$8 sps:$4 sm:$0xff]   ;;  %v8037_v48 = vld [vmem:[%s10539_s4 + $0x124] ss:$8 sps:$4 sm:$0xff]  }
 0x200   : > { %v1231_v41 = vpack.c.bf16 %v1219_v59, %v1218_v36  ;;  %v1232_v45 = vpack.c.bf16 %v1220_v18, %v1220_v18  ;;  %v8042_v4 = vld [vmem:[%s10539_s4 + $0x134] ss:$8 sps:$4 sm:$0xff]   ;;  %v8045_v1 = vld [vmem:[%s10539_s4 + $0x130] ss:$8 sps:$4 sm:$0xff]   ;;  %v8051_v29 = vld [vmem:[%s10539_s4 + $0x144] ss:$8 sps:$4 sm:$0xff]  }
 0x201   : > { %1695 = vmatpush1.bf16.msra.mxu0 %v1224_v22  ;;  %7731 = vmatpush1.bf16.msra.mxu1 %v1224_v22  ;;  %v7994_v22 = vld [vmem:[%s10539_s4 + $0xb0] ss:$8 sps:$4 sm:$0xff]   ;;  %v8054_v16 = vld [vmem:[%s10539_s4 + $0x140] ss:$8 sps:$4 sm:$0xff]   ;;  %v8056_v7 = vld [vmem:[%s10539_s4 + $0x154] ss:$8 sps:$4 sm:$0xff]  }
 0x202   : > { %1696 = vmatprep.subr.bf16.mxu0 %v10553_v47  ;;  %7720 = vmatprep.subr.bf16.mxu1 %v10553_v47  ;;  %v1686_v9 = vand.u32 %v1684_v42, %v1232_v45 }
 0x205   : > { %1697 = vmatpush1.bf16.msra.mxu0 %v1225_v35  ;;  %7732 = vmatpush1.bf16.msra.mxu1 %v1225_v35  ;;  %v8000_v35 = vld [vmem:[%s10539_s4 + $0xd4] ss:$8 sps:$4 sm:$0xff]  }
 0x206   : > { %1698 = vmatprep.subr.bf16.mxu0 %v10553_v47  ;;  %7721 = vmatprep.subr.bf16.mxu1 %v10553_v47 }
 0x209   : > { %1699 = vmatpush1.bf16.msra.mxu0 %v1226_v10  ;;  %7733 = vmatpush1.bf16.msra.mxu1 %v1226_v10  ;;  %v8009_v10 = vld [vmem:[%s10539_s4 + $0xe4] ss:$8 sps:$4 sm:$0xff]  }
 0x20a   : > { %1700 = vmatprep.subr.bf16.mxu0 %v10553_v47  ;;  %7722 = vmatprep.subr.bf16.mxu1 %v10553_v47 }
 0x20d   : > { %1701 = vmatpush1.bf16.msra.mxu0 %v1227_v58  ;;  %7734 = vmatpush1.bf16.msra.mxu1 %v1227_v58  ;;  %v8023_v58 = vld [vmem:[%s10539_s4 + $0x104] ss:$8 sps:$4 sm:$0xff]  }
 0x20e   : > { %1702 = vmatprep.subr.bf16.mxu0 %v10553_v47  ;;  %7723 = vmatprep.subr.bf16.mxu1 %v10553_v47 }
 0x211   : > { %1703 = vmatpush1.bf16.msra.mxu0 %v1228_v39  ;;  %7735 = vmatpush1.bf16.msra.mxu1 %v1228_v39  ;;  %v8040_v39 = vld [vmem:[%s10539_s4 + $0x120] ss:$8 sps:$4 sm:$0xff]  }
 0x212   : > { %1704 = vmatprep.subr.bf16.mxu0 %v10553_v47  ;;  %7724 = vmatprep.subr.bf16.mxu1 %v10553_v47 }
 0x215   : > { %1705 = vmatpush1.bf16.msra.mxu0 %v1229_v40  ;;  %7736 = vmatpush1.bf16.msra.mxu1 %v1229_v40  ;;  %v8059_v40 = vld [vmem:[%s10539_s4 + $0x150] ss:$8 sps:$4 sm:$0xff]  }
 0x216   : > { %1706 = vmatprep.subr.bf16.mxu0 %v10553_v47  ;;  %7725 = vmatprep.subr.bf16.mxu1 %v10553_v47 }
 0x219   : > { %1707 = vmatpush1.bf16.msra.mxu0 %v1230_v17  ;;  %7737 = vmatpush1.bf16.msra.mxu1 %v1230_v17 }
 0x21a   : > { %1708 = vmatprep.subr.bf16.mxu0 %v10553_v47  ;;  %7726 = vmatprep.subr.bf16.mxu1 %v10553_v47 }
 0x21d   : > { %1709 = vmatpush1.bf16.msra.mxu0 %v1231_v41  ;;  %7738 = vmatpush1.bf16.msra.mxu1 %v1231_v41 }
 0x21e   : > { %1710 = vmatprep.subr.bf16.mxu0 %v10553_v47  ;;  %7727 = vmatprep.subr.bf16.mxu1 %v10553_v47  ;;  %v8005_v47 = vld [vmem:[%s10540_s5 + $0x20] sm:$0xff]  }
 0x221   : > { %1711 = vmatpush1.bf16.msra.mxu0 %v1686_v9  ;;  %7739 = vmatpush1.bf16.msra.mxu1 %v1686_v9 }
 0x222   : > { %7056 = vmatprep.subr.bf16.mxu0 %v7997_v24 }
 0x224   : > { %1721 = vmatmul.mubr.bf16.vlgmr.msra.gmra.mrb[52].mxu0 %v7959_v6  ;;  %1777 = vmatmul.mubr.bf16.vlgmr.msra.gmra.mrb[0].mxu1 %v7980_v23 }
 0x225   : > { %5964 = vmatprep.mubr.msk.bf16.mxu0 %vm1585_vm4, %v7962_v43  ;;  %5971 = vmatprep.mubr.msk.bf16.mxu1 %vm1585_vm4, %v7983_v12  ;;  %v8065_v43 = vld [vmem:[%s10539_s4 + $0x164] ss:$8 sps:$4 sm:$0xff]  }
 0x226   : > { %7057 = vmatpush3.bf16.msra.mxu0 %v7997_v24 }
 0x227   : > { %7058 = vmatprep.subr.bf16.mxu0 %v7999_v32 }
 0x22a   : > { %7059 = vmatpush3.bf16.msra.mxu0 %v7999_v32  ;;  %v8013_v32 = vld [vmem:[%s10540_s5 + $0x48] sm:$0xff]  }
 0x22b   : > { %7060 = vmatprep.subr.bf16.mxu0 %v8002_v51 }
 0x22c   : > { %1729 = vmatmul.mubr.bf16.gmra.mrb[56].mxu0 %v7964_v57  ;;  %1785 = vmatmul.mubr.bf16.gmra.mrb[4].mxu1 %v7985_v3 }
 0x22d   : > { %5965 = vmatprep.mubr.msk.bf16.mxu0 %vm1585_vm4, %v7965_v34  ;;  %5972 = vmatprep.mubr.msk.bf16.mxu1 %vm1585_vm4, %v7986_v13  ;;  %v8068_v34 = vld [vmem:[%s10539_s4 + $0x160] ss:$8 sps:$4 sm:$0xff]   ;;  %v8016_v13 = vld [vmem:[%s10540_s5 + $0x50] sm:$0xff]  }
 0x22e   : > { %7061 = vmatpush3.bf16.msra.mxu0 %v8002_v51 }
 0x22f   : > { %7062 = vmatprep.subr.bf16.mxu0 %v8004_v27 }
 0x232   : > { %7063 = vmatpush3.bf16.msra.mxu0 %v8004_v27 }
 0x233   : > { %7064 = vmatprep.subr.bf16.mxu0 %v8005_v47 }
 0x234   : > { %1737 = vmatmul.mubr.bf16.gmra.mrb[60].mxu0 %v7967_v33  ;;  %1793 = vmatmul.mubr.bf16.gmra.mrb[8].mxu1 %v7988_v37 }
 0x235   : > { %5966 = vmatprep.mubr.msk.bf16.mxu0 %vm1585_vm4, %v7968_v50  ;;  %5973 = vmatprep.mubr.msk.bf16.mxu1 %vm1585_vm4, %v7989_v25 }
 0x236   : > { %7065 = vmatpush3.bf16.msra.mxu0 %v8005_v47 }
 0x237   : > { %7066 = vmatprep.subr.bf16.mxu0 %v8006_v5 }
 0x23a   : > { %7067 = vmatpush3.bf16.msra.mxu0 %v8006_v5  ;;  %v8070_v5 = vld [vmem:[%s10539_s4 + $0x174] ss:$8 sps:$4 sm:$0xff]  }
 0x23b   : > { %7068 = vmatprep.subr.bf16.mxu0 %v8007_v46 }
 0x23c   : > { %1745 = vmatmul.mubr.bf16.gmra.mrb[64].mxu0 %v7970_v15  ;;  %1801 = vmatmul.mubr.bf16.gmra.mrb[12].mxu1 %v7991_v53  ;;  %v8018_v15 = vld [vmem:[%s10540_s5 + $0x58] sm:$0xff]  }
 0x23d   : > { %5967 = vmatprep.mubr.msk.bf16.mxu0 %vm1585_vm4, %v7971_v52  ;;  %5974 = vmatprep.mubr.msk.bf16.mxu1 %vm1585_vm4, %v7992_v28 }
 0x23e   : > { %7069 = vmatpush3.bf16.msra.mxu0 %v8007_v46 }
 0x23f   : > { %7070 = vmatprep.subr.bf16.mxu0 %v8008_v54 }
 0x242   : > { %7071 = vmatpush3.bf16.msra.mxu0 %v8008_v54 }
 0x243   : > { %7076 = vmatprep.subr.bf16.mxu0 %v8011_v44 }
 0x244   : > { %1753 = vmatmul.mubr.bf16.gmra.mrb[68].mxu0 %v7973_v2  ;;  %1809 = vmatmul.mubr.bf16.gmra.mrb[16].mxu1 %v7994_v22  ;;  %v8073_v2 = vld [vmem:[%s10539_s4 + $0x170] ss:$8 sps:$4 sm:$0xff]  }
 0x245   : > { %5968 = vmatprep.mubr.msk.bf16.mxu0 %vm1585_vm4, %v7974_v14  ;;  %5975 = vmatprep.mubr.msk.bf16.mxu1 %vm1585_vm4, %v7995_v20  ;;  %v8019_v14 = vld [vmem:[%s10540_s5 + $0x60] sm:$0xff]  }
 0x24c   : > { %1761 = vmatmul.mubr.bf16.gmra.mrb[72].mxu0 %v7976_v31  ;;  %1817 = vmatmul.mubr.bf16.gmra.mrb[20].mxu1 %v7998_v21 }
 0x24d   : > { %5969 = vmatprep.mubr.msk.bf16.mxu0 %vm1585_vm4, %v7977_v30  ;;  %5976 = vmatprep.mubr.msk.bf16.mxu1 %vm1585_vm4, %v8000_v35  ;;  %v8020_v30 = vld [vmem:[%s10540_s5 + $0x68] sm:$0xff]  }
 0x254   : > { %1769 = vmatmul.mubr.bf16.gmra.mrb[76].mxu0 %v7979_v60  ;;  %1825 = vmatmul.mubr.bf16.gmra.mrb[24].mxu1 %v8003_v56  ;;  %v8021_v56 = vld [vmem:[%s10540_s5 + $0x70] sm:$0xff]  }
 0x255   : > { %5977 = vmatprep.mubr.msk.bf16.mxu1 %vm1585_vm4, %v8009_v10 }
 0x25c   : > { %1833 = vmatmul.mubr.bf16.gmra.mrb[28].mxu1 %v8012_v8  ;;  %v8022_v8 = vld [vmem:[%s10540_s5 + $0x78] sm:$0xff]  }
 0x25d   : > { %5978 = vmatprep.mubr.msk.bf16.mxu1 %vm1585_vm4, %v8014_v62 }
 0x264   : > { %1841 = vmatmul.mubr.bf16.gmra.mrb[32].mxu1 %v8017_v19 }
 0x265   : > { %5979 = vmatprep.mubr.msk.bf16.mxu1 %vm1585_vm4, %v8023_v58 }
 0x26c   : > { %1849 = vmatmul.mubr.bf16.gmra.mrb[36].mxu1 %v8026_v49 }
 0x26d   : > { %5980 = vmatprep.mubr.msk.bf16.mxu1 %vm1585_vm4, %v8028_v63  ;;  %v8025_v63 = vld [vmem:[%s10540_s5 + $0x80] sm:$0xff]  }
 0x274   : > { %1857 = vmatmul.mubr.bf16.gmra.mrb[40].mxu1 %v8031_v38 }
 0x275   : > { %5981 = vmatprep.mubr.msk.bf16.mxu1 %vm1585_vm4, %v8037_v48 }
 0x27c   : > { %1865 = vmatmul.mubr.bf16.gmra.mrb[44].mxu1 %v8040_v39 }
 0x27d   : > { %5982 = vmatprep.mubr.msk.bf16.mxu1 %vm1585_vm4, %v8042_v4 }
 0x284   : > { %1873 = vmatmul.mubr.bf16.gmra.mrb[48].mxu1 %v8045_v1 }
 0x285   : > { %5983 = vmatprep.mubr.msk.bf16.mxu1 %vm1585_vm4, %v8051_v29 }
 0x28c   : > { %1881 = vmatmul.mubr.bf16.gmra.mrb[52].mxu1 %v8054_v16 }
 0x28d   : > { %5984 = vmatprep.mubr.msk.bf16.mxu1 %vm1585_vm4, %v8056_v7 }
 0x294   : > { %1889 = vmatmul.mubr.bf16.gmra.mrb[56].mxu1 %v8059_v40  ;;  %v8079_v40 = vld [vmem:[%s10539_s4 + $0x184] ss:$8 sps:$4 sm:$0xff]  }
 0x295   : > { %5985 = vmatprep.mubr.msk.bf16.mxu1 %vm1585_vm4, %v8065_v43  ;;  %v8032_v43 = vld [vmem:[%s10540_s5 + $0x98] sm:$0xff]  }
 0x29c   : > { %1897 = vmatmul.mubr.bf16.gmra.mrb[60].mxu1 %v8068_v34  ;;  %v8034_v34 = vld [vmem:[%s10540_s5 + $0xa8] sm:$0xff]  }
 0x29d   : > { %5986 = vmatprep.mubr.msk.bf16.mxu1 %vm1585_vm4, %v8070_v5  ;;  %v8039_v5 = vld [vmem:[%s10540_s5 + $0xc0] sm:$0xff]  }
 0x2a4   : > { %1905 = vmatmul.mubr.bf16.gmra.mrb[64].mxu1 %v8073_v2 }
 0x2a5   : > { %5987 = vmatprep.mubr.msk.bf16.mxu1 %vm1585_vm4, %v8079_v40  ;;  %v8107_v40 = vld [vmem:[%s10539_s4 + $0x1c4] ss:$8 sps:$4 sm:$0xff]  }
 0x2f7   : > { %v1722_v11 = vpop.f32.mrb[52].mxu0  ;;  %v9220_v61 = vpop.f32.mrb[0].mxu1 }
 0x2f8   : > { %v1724_v55 = vpop.f32.mrb[53].mxu0  ;;  %v1780_v17 = vpop.f32.mrb[1].mxu1 }
 0x2f9   : > { %v1725_v36 = vpop.f32.mrb[54].mxu0  ;;  %v9222_v59 = vpop.f32.mrb[2].mxu1 }
 0x2fa   : > { %v1977_v18 = vpack.c.bf16 %v1725_v36, %v1722_v11  ;;  %v1727_v0 = vpop.f32.mrb[55].mxu0  ;;  %v1984_v26 = vpack.c.bf16 %v9222_v59, %v9220_v61  ;;  %v1783_v41 = vpop.f32.mrb[3].mxu1  ;;  %v8027_v11 = vld [vmem:[%s10540_s5 + $0x88] sm:$0xff]   ;;  %v8060_v61 = vld [vmem:[%s10540_s5 + $0x118] sm:$0xff]  }
 0x2fb   : > { %v8030_v41 = vld [vmem:[%s10540_s5 + $0x90] sm:$0xff]  }
 0x2fc   : > { %7072 = vmatprep.mubr.bf16.mxu0 %v1977_v18  ;;  %v8082_v18 = vld [vmem:[%s10539_s4 + $0x180] ss:$8 sps:$4 sm:$0xff]   ;;  %v8115_v59 = vld [vmem:[%s10539_s4 + $0x1d0] ss:$8 sps:$4 sm:$0xff]  }
 0x2fd   : > { %1913 = vmatmul.mubr.bf16.gmra.mrb[68].mxu1 %v8082_v18 }
 0x2ff   : > { %v1730_v45 = vpop.f32.mrb[56].mxu0  ;;  %v9226_v42 = vpop.f32.mrb[4].mxu1 }
 0x300   : > { %v1732_v24 = vpop.f32.mrb[57].mxu0  ;;  %v1788_v9 = vpop.f32.mrb[5].mxu1 }
 0x301   : > { %v1733_v6 = vpop.f32.mrb[58].mxu0  ;;  %v9228_v23 = vpop.f32.mrb[6].mxu1 }
 0x302   : > { %v1978_v12 = vpack.c.bf16 %v1733_v6, %v1730_v45  ;;  %v1735_v51 = vpop.f32.mrb[59].mxu0  ;;  %v1985_v57 = vpack.c.bf16 %v9228_v23, %v9226_v42  ;;  %v1791_v3 = vpop.f32.mrb[7].mxu1  ;;  %v8084_v6 = vld [vmem:[%s10539_s4 + $0x194] ss:$8 sps:$4 sm:$0xff]   ;;  %v8062_v42 = vld [vmem:[%s10540_s5 + $0x128] sm:$0xff]  }
 0x303   : > { %v8087_v51 = vld [vmem:[%s10539_s4 + $0x190] ss:$8 sps:$4 sm:$0xff]   ;;  %5988 = vmatprep.mubr.msk.bf16.mxu1 %vm1585_vm4, %v8084_v6  ;;  %v8033_v3 = vld [vmem:[%s10540_s5 + $0xa0] sm:$0xff]  }
 0x304   : > { %7073 = vmatmul.mubr.bf16.vlgmr.msra.gmra.mrb[80].mxu0 %v1978_v12  ;;  %v8063_v23 = vld [vmem:[%s10540_s5 + $0x130] sm:$0xff]  }
 0x305   : > { %7077 = vmatpush3.bf16.msra.mxu0 %v8011_v44  ;;  %1921 = vmatmul.mubr.bf16.gmra.mrb[72].mxu1 %v8087_v51 }
 0x306   : > { %7078 = vmatprep.subr.bf16.mxu0 %v8013_v32 }
 0x307   : > { %v1738_v27 = vpop.f32.mrb[60].mxu0  ;;  %v9245_v47 = vpop.f32.mrb[8].mxu1 }
 0x308   : > { %v1740_v33 = vpop.f32.mrb[61].mxu0  ;;  %v1796_v37 = vpop.f32.mrb[9].mxu1 }
 0x309   : > { %7079 = vmatpush3.bf16.msra.mxu0 %v8013_v32  ;;  %v1741_v50 = vpop.f32.mrb[62].mxu0  ;;  %v9247_v25 = vpop.f32.mrb[10].mxu1  ;;  %v8036_v33 = vld [vmem:[%s10540_s5 + $0xb8] sm:$0xff]  }
 0x30a   : > { %7080 = vmatprep.subr.bf16.mxu0 %v8016_v13  ;;  %v1979_v53 = vpack.c.bf16 %v1741_v50, %v1738_v27  ;;  %v1743_v52 = vpop.f32.mrb[63].mxu0  ;;  %v1986_v28 = vpack.c.bf16 %v9247_v25, %v9245_v47  ;;  %v1799_v22 = vpop.f32.mrb[11].mxu1  ;;  %v8128_v47 = vld [vmem:[%s10539_s4 + $0x1f0] ss:$8 sps:$4 sm:$0xff]  }
 0x30b   : > { %v8074_v25 = vld [vmem:[%s10540_s5 + $0x158] sm:$0xff]  }
 0x30c   : > { %7092 = vmatprep.mubr.bf16.mxu0 %v1979_v53 }
 0x30d   : > { %7081 = vmatpush3.bf16.msra.mxu0 %v8016_v13  ;;  %v8035_v13 = vld [vmem:[%s10540_s5 + $0xb0] sm:$0xff]  }
 0x30e   : > { %7082 = vmatprep.subr.bf16.mxu0 %v8018_v15 }
 0x30f   : > { %v1746_v20 = vpop.f32.mrb[64].mxu0  ;;  %v9270_v44 = vpop.f32.mrb[12].mxu1 }
 0x310   : > { %v1748_v31 = vpop.f32.mrb[65].mxu0  ;;  %v1804_v58 = vpop.f32.mrb[13].mxu1 }
 0x311   : > { %7083 = vmatpush3.bf16.msra.mxu0 %v8018_v15  ;;  %v1749_v21 = vpop.f32.mrb[66].mxu0  ;;  %v9275_v49 = vpop.f32.mrb[14].mxu1 }
 0x312   : > { %7084 = vmatprep.subr.bf16.mxu0 %v8019_v14  ;;  %v1980_v35 = vpack.c.bf16 %v1749_v21, %v1746_v20  ;;  %v1751_v60 = vpop.f32.mrb[67].mxu0  ;;  %v1987_v38 = vpack.c.bf16 %v9275_v49, %v9270_v44  ;;  %v1807_v48 = vpop.f32.mrb[15].mxu1  ;;  %v8041_v20 = vld [vmem:[%s10540_s5 + $0xc8] sm:$0xff]   ;;  %v8077_v49 = vld [vmem:[%s10540_s5 + $0x170] sm:$0xff]  }
 0x313   : > { %v8096_v21 = vld [vmem:[%s10539_s4 + $0x1a0] ss:$8 sps:$4 sm:$0xff]   ;;  %v8098_v60 = vld [vmem:[%s10539_s4 + $0x1b4] ss:$8 sps:$4 sm:$0xff]  }
 0x314   : > { %v8053_v48 = vld [vmem:[%s10540_s5 + $0x100] sm:$0xff]   ;;  %v8076_v44 = vld [vmem:[%s10540_s5 + $0x168] sm:$0xff]  }
 0x315   : > { %7085 = vmatpush3.bf16.msra.mxu0 %v8019_v14  ;;  %v8093_v14 = vld [vmem:[%s10539_s4 + $0x1a4] ss:$8 sps:$4 sm:$0xff]  }
 0x316   : > { %7086 = vmatprep.subr.bf16.mxu0 %v8020_v30  ;;  %5989 = vmatprep.mubr.msk.bf16.mxu1 %vm1585_vm4, %v8093_v14  ;;  %v8126_v14 = vld [vmem:[%s10539_s4 + $0x1f4] ss:$8 sps:$4 sm:$0xff]  }
 0x317   : > { %v1754_v46 = vpop.f32.mrb[68].mxu0  ;;  %v9284_v4 = vpop.f32.mrb[16].mxu1  ;;  %1929 = vmatmul.mubr.bf16.gmra.mrb[76].mxu1 %v8096_v21 }
 0x318   : > { %v1756_v54 = vpop.f32.mrb[69].mxu0  ;;  %v1812_v29 = vpop.f32.mrb[17].mxu1  ;;  %5990 = vmatprep.mubr.msk.bf16.mxu1 %vm1585_vm4, %v8098_v60 }
 0x319   : > { %7087 = vmatpush3.bf16.msra.mxu0 %v8020_v30  ;;  %v1757_v10 = vpop.f32.mrb[70].mxu0  ;;  %v9286_v7 = vpop.f32.mrb[18].mxu1  ;;  %v8047_v54 = vld [vmem:[%s10540_s5 + $0xe0] sm:$0xff]  }
 0x31a   : > { %7088 = vmatprep.subr.bf16.mxu0 %v8021_v56  ;;  %v1981_v62 = vpack.c.bf16 %v1757_v10, %v1754_v46  ;;  %v1759_v19 = vpop.f32.mrb[71].mxu0  ;;  %v1988_v36 = vpack.c.bf16 %v9286_v7, %v9284_v4  ;;  %v1815_v0 = vpop.f32.mrb[19].mxu1  ;;  %v8101_v46 = vld [vmem:[%s10539_s4 + $0x1b0] ss:$8 sps:$4 sm:$0xff]   ;;  %v8048_v10 = vld [vmem:[%s10540_s5 + $0xe8] sm:$0xff]   ;;  %v8089_v4 = vld [vmem:[%s10540_s5 + $0x1a0] sm:$0xff]  }
 0x31b   : > { %v8050_v19 = vld [vmem:[%s10540_s5 + $0xf8] sm:$0xff]   ;;  %v8090_v7 = vld [vmem:[%s10540_s5 + $0x1a8] sm:$0xff]  }
 0x31d   : > { %7089 = vmatpush3.bf16.msra.mxu0 %v8021_v56  ;;  %v8046_v56 = vld [vmem:[%s10540_s5 + $0xd8] sm:$0xff]  }
 0x31e   : > { %7090 = vmatprep.subr.bf16.mxu0 %v8022_v8 }
 0x31f   : > { %v9282_v39 = vpop.f32.mrb[72].mxu0  ;;  %v9323_v27 = vpop.f32.mrb[20].mxu1  ;;  %1937 = vmatmul.mubr.bf16.gmra.mrb[80].mxu1 %v8101_v46 }
 0x320   : > { %v1764_v1 = vpop.f32.mrb[73].mxu0  ;;  %v1820_v37 = vpop.f32.mrb[21].mxu1  ;;  %5991 = vmatprep.mubr.msk.bf16.mxu1 %vm1585_vm4, %v8107_v40  ;;  %v8095_v40 = vld [vmem:[%s10540_s5 + $0x1c0] sm:$0xff]  }
 0x321   : > { %7091 = vmatpush3.bf16.msra.mxu0 %v8022_v8  ;;  %v1765_v16 = vpop.f32.mrb[74].mxu0  ;;  %v9328_v50 = vpop.f32.mrb[22].mxu1  ;;  %v8049_v8 = vld [vmem:[%s10540_s5 + $0xf0] sm:$0xff]   ;;  %v8069_v37 = vld [vmem:[%s10540_s5 + $0x148] sm:$0xff]  }
 0x322   : > { %7096 = vmatprep.subr.bf16.mxu0 %v8025_v63  ;;  %v1982_v55 = vpack.c.bf16 %v1765_v16, %v9282_v39  ;;  %v1767_v17 = vpop.f32.mrb[75].mxu0  ;;  %v1989_v15 = vpack.c.bf16 %v9328_v50, %v9323_v27  ;;  %v1823_v53 = vpop.f32.mrb[23].mxu1  ;;  %v8092_v50 = vld [vmem:[%s10540_s5 + $0x1b8] sm:$0xff]  }
 0x323   : > { %v8110_v17 = vld [vmem:[%s10539_s4 + $0x1c0] ss:$8 sps:$4 sm:$0xff]  }
 0x324   : > { %7093 = vmatmul.mubr.bf16.vlgmr.msra.gmra.mrb[80].mxu0 %v1980_v35  ;;  %v8044_v35 = vld [vmem:[%s10540_s5 + $0xd0] sm:$0xff]  }
 0x325   : > { %7097 = vmatpush3.bf16.msra.mxu0 %v8025_v63  ;;  %7112 = vmatprep.mubr.bf16.mxu0 %v1981_v62 }
 0x326   : > { %7098 = vmatprep.subr.bf16.mxu0 %v8027_v11 }
 0x327   : > { %v1770_v45 = vpop.f32.mrb[76].mxu0  ;;  %v9335_v52 = vpop.f32.mrb[24].mxu1  ;;  %1945 = vmatmul.mubr.bf16.gmra.mrb[84].mxu1 %v8110_v17 }
 0x328   : > { %v1772_v24 = vpop.f32.mrb[77].mxu0  ;;  %v1828_v2 = vpop.f32.mrb[25].mxu1 }
 0x329   : > { %7099 = vmatpush3.bf16.msra.mxu0 %v8027_v11  ;;  %v1773_v9 = vpop.f32.mrb[78].mxu0  ;;  %v9337_v22 = vpop.f32.mrb[26].mxu1  ;;  %v8055_v11 = vld [vmem:[%s10540_s5 + $0x108] sm:$0xff]   ;;  %v8064_v24 = vld [vmem:[%s10540_s5 + $0x138] sm:$0xff]   ;;  %v8072_v2 = vld [vmem:[%s10540_s5 + $0x150] sm:$0xff]  }
 0x32a   : > { %7100 = vmatprep.subr.bf16.mxu0 %v8030_v41  ;;  %v1983_v12 = vpack.c.bf16 %v1773_v9, %v1770_v45  ;;  %v1775_v32 = vpop.f32.mrb[79].mxu0  ;;  %v1990_v31 = vpack.c.bf16 %v9337_v22, %v9335_v52  ;;  %v1831_v30 = vpop.f32.mrb[27].mxu1  ;;  %v8112_v45 = vld [vmem:[%s10539_s4 + $0x1d4] ss:$8 sps:$4 sm:$0xff]   ;;  %v8103_v52 = vld [vmem:[%s10540_s5 + $0x1e0] sm:$0xff]   ;;  %v8104_v22 = vld [vmem:[%s10540_s5 + $0x1e8] sm:$0xff]  }
 0x32b   : > { %5992 = vmatprep.mubr.msk.bf16.mxu1 %vm1585_vm4, %v8112_v45 }
 0x32d   : > { %7101 = vmatpush3.bf16.msra.mxu0 %v8030_v41  ;;  %v8058_v41 = vld [vmem:[%s10540_s5 + $0x110] sm:$0xff]  }
 0x32e   : > { %7102 = vmatprep.subr.bf16.mxu0 %v8032_v43 }
 0x32f   : > { %v9373_v62 = vpop.f32.mrb[28].mxu1  ;;  %1953 = vmatmul.mubr.bf16.gmra.mrb[88].mxu1 %v8115_v59 }
 0x330   : > { %v1836_v58 = vpop.f32.mrb[29].mxu1 }
 0x331   : > { %7103 = vmatpush3.bf16.msra.mxu0 %v8032_v43  ;;  %v9378_v63 = vpop.f32.mrb[30].mxu1  ;;  %v8067_v43 = vld [vmem:[%s10540_s5 + $0x140] sm:$0xff]  }
 0x332   : > { %7104 = vmatprep.subr.bf16.mxu0 %v8033_v3  ;;  %v1991_v39 = vpack.c.bf16 %v9378_v63, %v9373_v62  ;;  %v1839_v1 = vpop.f32.mrb[31].mxu1  ;;  %v8106_v63 = vld [vmem:[%s10540_s5 + $0x1f8] sm:$0xff]  }
 0x333   : > { %v8088_v1 = vld [vmem:[%s10540_s5 + $0x198] sm:$0xff]  }
 0x335   : > { %7105 = vmatpush3.bf16.msra.mxu0 %v8033_v3 }
 0x336   : > { %7106 = vmatprep.subr.bf16.mxu0 %v8034_v34 }
 0x337   : > { %v9385_v29 = vpop.f32.mrb[32].mxu1 }
 0x338   : > { %v1844_v16 = vpop.f32.mrb[33].mxu1 }
 0x339   : > { %7107 = vmatpush3.bf16.msra.mxu0 %v8034_v34 }
 0x33a   : > { %7108 = vmatprep.subr.bf16.mxu0 %v8035_v13 }
 0x33d   : > { %7109 = vmatpush3.bf16.msra.mxu0 %v8035_v13  ;;  %v8121_v13 = vld [vmem:[%s10539_s4 + $0x1e4] ss:$8 sps:$4 sm:$0xff]  }
 0x33e   : > { %7110 = vmatprep.subr.bf16.mxu0 %v8036_v33  ;;  %5993 = vmatprep.mubr.msk.bf16.mxu1 %vm1585_vm4, %v8121_v13 }
 0x341   : > { %7111 = vmatpush3.bf16.msra.mxu0 %v8036_v33  ;;  %v8123_v33 = vld [vmem:[%s10539_s4 + $0x1e0] ss:$8 sps:$4 sm:$0xff]  }
 0x342   : > { %7116 = vmatprep.subr.bf16.mxu0 %v8039_v5  ;;  %1961 = vmatmul.mubr.bf16.gmra.mrb[92].mxu1 %v8123_v33 }
 0x343   : > { %5994 = vmatprep.mubr.msk.bf16.mxu1 %vm1585_vm4, %v8126_v14  ;;  %v8114_v14 = vld [vmem:[%s10540_s5 + $0x210] sm:$0xff]  }
 0x344   : > { %7113 = vmatmul.mubr.bf16.vlgmr.msra.gmra.mrb[80].mxu0 %v1982_v55  ;;  %v9393_v55 = vpop.f32.mrb[34].mxu1 }
 0x345   : > { %7117 = vmatpush3.bf16.msra.mxu0 %v8039_v5  ;;  %7132 = vmatprep.mubr.bf16.mxu0 %v1983_v12  ;;  %v1992_v18 = vpack.c.bf16 %v9393_v55, %v9385_v29  ;;  %v1847_v0 = vpop.f32.mrb[35].mxu1  ;;  %v8117_v29 = vld [vmem:[%s10540_s5 + $0x220] sm:$0xff]   ;;  %v8118_v55 = vld [vmem:[%s10540_s5 + $0x228] sm:$0xff]  }
 0x346   : > { %7118 = vmatprep.subr.bf16.mxu0 %v8041_v20 }
 0x349   : > { %7119 = vmatpush3.bf16.msra.mxu0 %v8041_v20  ;;  %v8078_v20 = vld [vmem:[%s10540_s5 + $0x178] sm:$0xff]  }
 0x34a   : > { %7120 = vmatprep.subr.bf16.mxu0 %v8044_v35  ;;  %1969 = vmatmul.mubr.bf16.gmra.mrb[96].mxu1 %v8128_v47  ;;  %v8116_v47 = vld [vmem:[%s10540_s5 + $0x218] sm:$0xff]  }
 0x34d   : > { %7121 = vmatpush3.bf16.msra.mxu0 %v8044_v35  ;;  %v8081_v35 = vld [vmem:[%s10540_s5 + $0x180] sm:$0xff]  }
 0x34e   : > { %7122 = vmatprep.subr.bf16.mxu0 %v8046_v56 }
 0x351   : > { %7123 = vmatpush3.bf16.msra.mxu0 %v8046_v56 }
 0x352   : > { %7124 = vmatprep.subr.bf16.mxu0 %v8047_v54 }
 0x355   : > { %7125 = vmatpush3.bf16.msra.mxu0 %v8047_v54 }
 0x356   : > { %7126 = vmatprep.subr.bf16.mxu0 %v8048_v10 }
 0x359   : > { %7127 = vmatpush3.bf16.msra.mxu0 %v8048_v10 }
 0x35a   : > { %7128 = vmatprep.subr.bf16.mxu0 %v8049_v8 }
 0x35d   : > { %7129 = vmatpush3.bf16.msra.mxu0 %v8049_v8  ;;  %v8083_v8 = vld [vmem:[%s10540_s5 + $0x188] sm:$0xff]  }
 0x35e   : > { %7130 = vmatprep.subr.bf16.mxu0 %v8050_v19 }
 0x361   : > { %7131 = vmatpush3.bf16.msra.mxu0 %v8050_v19 }
 0x362   : > { %7136 = vmatprep.subr.bf16.mxu0 %v8053_v48 }
 0x364   : > { %7133 = vmatmul.mubr.bf16.vlgmr.msra.gmra.mrb[80].mxu0 %v1984_v26  ;;  %v8061_v26 = vld [vmem:[%s10540_s5 + $0x120] sm:$0xff]  }
 0x365   : > { %7137 = vmatpush3.bf16.msra.mxu0 %v8053_v48  ;;  %7152 = vmatprep.mubr.bf16.mxu0 %v1985_v57  ;;  %v9429_v57 = vpop.f32.mrb[36].mxu1  ;;  %v8086_v48 = vld [vmem:[%s10540_s5 + $0x190] sm:$0xff]  }
 0x366   : > { %7138 = vmatprep.subr.bf16.mxu0 %v8055_v11  ;;  %v1852_v9 = vpop.f32.mrb[37].mxu1 }
 0x367   : > { %v9434_v6 = vpop.f32.mrb[38].mxu1  ;;  %v8109_v9 = vld [vmem:[%s10540_s5 + $0x200] sm:$0xff]  }
 0x368   : > { %v1993_v12 = vpack.c.bf16 %v9434_v6, %v9429_v57  ;;  %v1855_v32 = vpop.f32.mrb[39].mxu1  ;;  %v8120_v6 = vld [vmem:[%s10540_s5 + $0x238] sm:$0xff]  }
 0x369   : > { %7139 = vmatpush3.bf16.msra.mxu0 %v8055_v11  ;;  %v9441_v51 = vpop.f32.mrb[40].mxu1 }
 0x36a   : > { %7140 = vmatprep.subr.bf16.mxu0 %v8058_v41  ;;  %v1860_v3 = vpop.f32.mrb[41].mxu1 }
 0x36b   : > { %v9443_v34 = vpop.f32.mrb[42].mxu1 }
 0x36c   : > { %v1994_v5 = vpack.c.bf16 %v9443_v34, %v9441_v51  ;;  %v1863_v53 = vpop.f32.mrb[43].mxu1  ;;  %v8131_v51 = vld [vmem:[%s10540_s5 + $0x260] sm:$0xff]   ;;  %v8132_v34 = vld [vmem:[%s10540_s5 + $0x268] sm:$0xff]  }
 0x36d   : > { %7141 = vmatpush3.bf16.msra.mxu0 %v8058_v41 }
 0x36e   : > { %7142 = vmatprep.subr.bf16.mxu0 %v8060_v61 }
 0x371   : > { %7143 = vmatpush3.bf16.msra.mxu0 %v8060_v61  ;;  %v8097_v61 = vld [vmem:[%s10540_s5 + $0x1c8] sm:$0xff]  }
 0x372   : > { %7144 = vmatprep.subr.bf16.mxu0 %v8061_v26 }
 0x375   : > { %7145 = vmatpush3.bf16.msra.mxu0 %v8061_v26 }
 0x376   : > { %7146 = vmatprep.subr.bf16.mxu0 %v8062_v42 }
 0x379   : > { %7147 = vmatpush3.bf16.msra.mxu0 %v8062_v42  ;;  %v8100_v42 = vld [vmem:[%s10540_s5 + $0x1d0] sm:$0xff]  }
 0x37a   : > { %7148 = vmatprep.subr.bf16.mxu0 %v8063_v23 }
 0x37d   : > { %7149 = vmatpush3.bf16.msra.mxu0 %v8063_v23  ;;  %v8102_v23 = vld [vmem:[%s10540_s5 + $0x1d8] sm:$0xff]  }
 0x37e   : > { %7150 = vmatprep.subr.bf16.mxu0 %v8064_v24 }
 0x381   : > { %7151 = vmatpush3.bf16.msra.mxu0 %v8064_v24 }
 0x382   : > { %7156 = vmatprep.subr.bf16.mxu0 %v8067_v43 }
 0x384   : > { %7153 = vmatmul.mubr.bf16.vlgmr.msra.gmra.mrb[80].mxu0 %v1986_v28  ;;  %v8075_v28 = vld [vmem:[%s10540_s5 + $0x160] sm:$0xff]  }
 0x385   : > { %7157 = vmatpush3.bf16.msra.mxu0 %v8067_v43  ;;  %7172 = vmatprep.mubr.bf16.mxu0 %v1987_v38  ;;  %v9485_v38 = vpop.f32.mrb[44].mxu1 }
 0x386   : > { %7158 = vmatprep.subr.bf16.mxu0 %v8069_v37  ;;  %v1868_v21 = vpop.f32.mrb[45].mxu1 }
 0x387   : > { %v9490_v30 = vpop.f32.mrb[46].mxu1 }
 0x388   : > { %v1995_v60 = vpack.c.bf16 %v9490_v30, %v9485_v38  ;;  %v1871_v56 = vpop.f32.mrb[47].mxu1  ;;  %v8134_v30 = vld [vmem:[%s10540_s5 + $0x278] sm:$0xff]  }
 0x389   : > { %7159 = vmatpush3.bf16.msra.mxu0 %v8069_v37  ;;  %v9497_v46 = vpop.f32.mrb[48].mxu1  ;;  %v8111_v37 = vld [vmem:[%s10540_s5 + $0x208] sm:$0xff]  }
 0x38a   : > { %7160 = vmatprep.subr.bf16.mxu0 %v8072_v2  ;;  %v1876_v54 = vpop.f32.mrb[49].mxu1  ;;  %v8125_v56 = vld [vmem:[%s10540_s5 + $0x248] sm:$0xff]  }
 0x38b   : > { %v9499_v10 = vpop.f32.mrb[50].mxu1 }
 0x38c   : > { %v1996_v19 = vpack.c.bf16 %v9499_v10, %v9497_v46  ;;  %v1879_v58 = vpop.f32.mrb[51].mxu1  ;;  %v8139_v46 = vld [vmem:[%s10540_s5 + $0x2a0] sm:$0xff]   ;;  %v8140_v10 = vld [vmem:[%s10540_s5 + $0x2a8] sm:$0xff]  }
 0x38d   : > { %7161 = vmatpush3.bf16.msra.mxu0 %v8072_v2  ;;  %v9527_v27 = vpop.f32.mrb[52].mxu1  ;;  %v8129_v58 = vld [vmem:[%s10540_s5 + $0x250] sm:$0xff]  }
 0x38e   : > { %7162 = vmatprep.subr.bf16.mxu0 %v8074_v25 }
 0x391   : > { %7163 = vmatpush3.bf16.msra.mxu0 %v8074_v25 }
 0x392   : > { %7164 = vmatprep.subr.bf16.mxu0 %v8075_v28 }
 0x395   : > { %7165 = vmatpush3.bf16.msra.mxu0 %v8075_v28  ;;  %v8124_v28 = vld [vmem:[%s10540_s5 + $0x240] sm:$0xff]  }
 0x396   : > { %7166 = vmatprep.subr.bf16.mxu0 %v8076_v44 }
 0x399   : > { %7167 = vmatpush3.bf16.msra.mxu0 %v8076_v44 }
 0x39a   : > { %7168 = vmatprep.subr.bf16.mxu0 %v8077_v49 }
 0x39d   : > { %7169 = vmatpush3.bf16.msra.mxu0 %v8077_v49 }
 0x39e   : > { %7170 = vmatprep.subr.bf16.mxu0 %v8078_v20 }
 0x3a1   : > { %7171 = vmatpush3.bf16.msra.mxu0 %v8078_v20 }
 0x3a2   : > { %7176 = vmatprep.subr.bf16.mxu0 %v8081_v35 }
 0x3a4   : > { %7173 = vmatmul.mubr.bf16.vlgmr.msra.gmra.mrb[80].mxu0 %v1988_v36  ;;  %v8091_v36 = vld [vmem:[%s10540_s5 + $0x1b0] sm:$0xff]  }
 0x3a5   : > { %7177 = vmatpush3.bf16.msra.mxu0 %v8081_v35  ;;  %7192 = vmatprep.mubr.bf16.mxu0 %v1989_v15  ;;  %v1884_v15 = vpop.f32.mrb[53].mxu1 }
 0x3a6   : > { %7178 = vmatprep.subr.bf16.mxu0 %v8083_v8  ;;  %v9532_v16 = vpop.f32.mrb[54].mxu1 }
 0x3a7   : > { %v1997_v11 = vpack.c.bf16 %v9532_v16, %v9527_v27  ;;  %v1887_v17 = vpop.f32.mrb[55].mxu1  ;;  %v8142_v16 = vld [vmem:[%s10540_s5 + $0x2b8] sm:$0xff]  }
 0x3a8   : > { %v9539_v0 = vpop.f32.mrb[56].mxu1  ;;  %v8136_v17 = vld [vmem:[%s10540_s5 + $0x288] sm:$0xff]  }
 0x3a9   : > { %7179 = vmatpush3.bf16.msra.mxu0 %v8083_v8  ;;  %v1892_v41 = vpop.f32.mrb[57].mxu1 }
 0x3aa   : > { %7180 = vmatprep.subr.bf16.mxu0 %v8086_v48  ;;  %v9541_v45 = vpop.f32.mrb[58].mxu1 }
 0x3ab   : > { %v1998_v59 = vpack.c.bf16 %v9541_v45, %v9539_v0  ;;  %v1895_v26 = vpop.f32.mrb[59].mxu1  ;;  %v8147_v0 = vld [vmem:[%s10540_s5 + $0x2e0] sm:$0xff]   ;;  %v8148_v45 = vld [vmem:[%s10540_s5 + $0x2e8] sm:$0xff]  }
 0x3ac   : > { %v9569_v62 = vpop.f32.mrb[60].mxu1  ;;  %v8137_v26 = vld [vmem:[%s10540_s5 + $0x290] sm:$0xff]  }
 0x3ad   : > { %7181 = vmatpush3.bf16.msra.mxu0 %v8086_v48  ;;  %v8130_v48 = vld [vmem:[%s10540_s5 + $0x258] sm:$0xff]  }
 0x3ae   : > { %7182 = vmatprep.subr.bf16.mxu0 %v8088_v1 }
 0x3b1   : > { %7183 = vmatpush3.bf16.msra.mxu0 %v8088_v1 }
 0x3b2   : > { %7184 = vmatprep.subr.bf16.mxu0 %v8089_v4 }
 0x3b5   : > { %7185 = vmatpush3.bf16.msra.mxu0 %v8089_v4  ;;  %v8135_v4 = vld [vmem:[%s10540_s5 + $0x280] sm:$0xff]  }
 0x3b6   : > { %7186 = vmatprep.subr.bf16.mxu0 %v8090_v7 }
 0x3b9   : > { %7187 = vmatpush3.bf16.msra.mxu0 %v8090_v7 }
 0x3ba   : > { %7188 = vmatprep.subr.bf16.mxu0 %v8091_v36 }
 0x3bd   : > { %7189 = vmatpush3.bf16.msra.mxu0 %v8091_v36 }
 0x3be   : > { %7190 = vmatprep.subr.bf16.mxu0 %v8092_v50 }
 0x3c1   : > { %7191 = vmatpush3.bf16.msra.mxu0 %v8092_v50 }
 0x3c2   : > { %7196 = vmatprep.subr.bf16.mxu0 %v8095_v40 }
 0x3c4   : > { %7193 = vmatmul.mubr.bf16.vlgmr.msra.gmra.mrb[80].mxu0 %v1990_v31  ;;  %v8105_v31 = vld [vmem:[%s10540_s5 + $0x1f0] sm:$0xff]  }
 0x3c5   : > { %7197 = vmatpush3.bf16.msra.mxu0 %v8095_v40  ;;  %7212 = vmatprep.mubr.bf16.mxu0 %v1991_v39  ;;  %v1900_v39 = vpop.f32.mrb[61].mxu1 }
 0x3c6   : > { %7198 = vmatprep.subr.bf16.mxu0 %v8097_v61  ;;  %v9574_v24 = vpop.f32.mrb[62].mxu1 }
 0x3c7   : > { %v1999_v43 = vpack.c.bf16 %v9574_v24, %v9569_v62  ;;  %v1903_v32 = vpop.f32.mrb[63].mxu1  ;;  %v8150_v24 = vld [vmem:[%s10540_s5 + $0x2f8] sm:$0xff]  }
 0x3c8   : > { %v9581_v3 = vpop.f32.mrb[64].mxu1  ;;  %v8144_v32 = vld [vmem:[%s10540_s5 + $0x2c8] sm:$0xff]  }
 0x3c9   : > { %7199 = vmatpush3.bf16.msra.mxu0 %v8097_v61  ;;  %v1908_v13 = vpop.f32.mrb[65].mxu1 }
 0x3ca   : > { %7200 = vmatprep.subr.bf16.mxu0 %v8100_v42  ;;  %v9583_v33 = vpop.f32.mrb[66].mxu1 }
 0x3cb   : > { %v2000_v53 = vpack.c.bf16 %v9583_v33, %v9581_v3  ;;  %v1911_v2 = vpop.f32.mrb[67].mxu1  ;;  %v8184_v3 = vld [vmem:[%s10541_s6 + $0x8] sm:$0xff]   ;;  %v8154_v33 = vld [vmem:[%s10540_s5 + $0x318] sm:$0xff]  }
 0x3cc   : > { %v8145_v2 = vld [vmem:[%s10540_s5 + $0x2d0] sm:$0xff]  }
 0x3cd   : > { %7201 = vmatpush3.bf16.msra.mxu0 %v8100_v42  ;;  %v8138_v42 = vld [vmem:[%s10540_s5 + $0x298] sm:$0xff]  }
 0x3ce   : > { %7202 = vmatprep.subr.bf16.mxu0 %v8102_v23 }
 0x3d0   : > { %v9611_v57 = vpop.f32.mrb[68].mxu1 }
 0x3d1   : > { %7203 = vmatpush3.bf16.msra.mxu0 %v8102_v23 }
 0x3d2   : > { %7204 = vmatprep.subr.bf16.mxu0 %v8103_v52 }
 0x3d5   : > { %7205 = vmatpush3.bf16.msra.mxu0 %v8103_v52  ;;  %v8143_v52 = vld [vmem:[%s10540_s5 + $0x2c0] sm:$0xff]  }
 0x3d6   : > { %7206 = vmatprep.subr.bf16.mxu0 %v8104_v22 }
 0x3d9   : > { %7207 = vmatpush3.bf16.msra.mxu0 %v8104_v22 }
 0x3da   : > { %7208 = vmatprep.subr.bf16.mxu0 %v8105_v31 }
 0x3dd   : > { %7209 = vmatpush3.bf16.msra.mxu0 %v8105_v31 }
 0x3de   : > { %7210 = vmatprep.subr.bf16.mxu0 %v8106_v63 }
 0x3e1   : > { %7211 = vmatpush3.bf16.msra.mxu0 %v8106_v63 }
 0x3e2   : > { %7216 = vmatprep.subr.bf16.mxu0 %v8109_v9 }
 0x3e4   : > { %7213 = vmatmul.mubr.bf16.vlgmr.msra.gmra.mrb[80].mxu0 %v1992_v18  ;;  %v8119_v18 = vld [vmem:[%s10540_s5 + $0x230] sm:$0xff]  }
 0x3e5   : > { %7217 = vmatpush3.bf16.msra.mxu0 %v8109_v9  ;;  %7232 = vmatprep.mubr.bf16.mxu0 %v1993_v12  ;;  %v1916_v12 = vpop.f32.mrb[69].mxu1 }
 0x3e6   : > { %7218 = vmatprep.subr.bf16.mxu0 %v8111_v37  ;;  %v9616_v25 = vpop.f32.mrb[70].mxu1 }
 0x3e7   : > { %v2001_v44 = vpack.c.bf16 %v9616_v25, %v9611_v57  ;;  %v1919_v49 = vpop.f32.mrb[71].mxu1  ;;  %v8155_v57 = vld [vmem:[%s10540_s5 + $0x320] sm:$0xff]   ;;  %v8186_v25 = vld [vmem:[%s10541_s6 + $0x18] sm:$0xff]  }
 0x3e8   : > { %v9623_v20 = vpop.f32.mrb[72].mxu1  ;;  %v8152_v49 = vld [vmem:[%s10540_s5 + $0x308] sm:$0xff]  }
 0x3e9   : > { %7219 = vmatpush3.bf16.msra.mxu0 %v8111_v37  ;;  %v1924_v21 = vpop.f32.mrb[73].mxu1 }
 0x3ea   : > { %7220 = vmatprep.subr.bf16.mxu0 %v8114_v14  ;;  %v9625_v35 = vpop.f32.mrb[74].mxu1 }
 0x3eb   : > { %v2002_v54 = vpack.c.bf16 %v9625_v35, %v9623_v20  ;;  %v1927_v8 = vpop.f32.mrb[75].mxu1  ;;  %v8163_v20 = vld [vmem:[%s10540_s5 + $0x360] sm:$0xff]   ;;  %v8164_v35 = vld [vmem:[%s10540_s5 + $0x368] sm:$0xff]  }
 0x3ec   : > { %v9653_v38 = vpop.f32.mrb[76].mxu1  ;;  %v8183_v8 = vld [vmem:[%s10541_s6] sm:$0xff]  }
 0x3ed   : > { %7221 = vmatpush3.bf16.msra.mxu0 %v8114_v14  ;;  %v8146_v14 = vld [vmem:[%s10540_s5 + $0x2d8] sm:$0xff]  }
 0x3ee   : > { %7222 = vmatprep.subr.bf16.mxu0 %v8116_v47 }
 0x3f1   : > { %7223 = vmatpush3.bf16.msra.mxu0 %v8116_v47 }
 0x3f2   : > { %7224 = vmatprep.subr.bf16.mxu0 %v8117_v29 }
 0x3f5   : > { %7225 = vmatpush3.bf16.msra.mxu0 %v8117_v29 }
 0x3f6   : > { %7226 = vmatprep.subr.bf16.mxu0 %v8118_v55 }
 0x3f9   : > { %7227 = vmatpush3.bf16.msra.mxu0 %v8118_v55 }
 0x3fa   : > { %7228 = vmatprep.subr.bf16.mxu0 %v8119_v18 }
 0x3fd   : > { %7229 = vmatpush3.bf16.msra.mxu0 %v8119_v18  ;;  %v8151_v18 = vld [vmem:[%s10540_s5 + $0x300] sm:$0xff]  }
 0x3fe   : > { %7230 = vmatprep.subr.bf16.mxu0 %v8120_v6 }
 0x401   : > { %7231 = vmatpush3.bf16.msra.mxu0 %v8120_v6 }
 0x402   : > { %7236 = vmatprep.subr.bf16.mxu0 %v8124_v28 }
 0x404   : > { %7233 = vmatmul.mubr.bf16.vlgmr.msra.gmra.mrb[80].mxu0 %v1994_v5  ;;  %v8133_v5 = vld [vmem:[%s10540_s5 + $0x270] sm:$0xff]  }
 0x405   : > { %7237 = vmatpush3.bf16.msra.mxu0 %v8124_v28  ;;  %7252 = vmatprep.mubr.bf16.mxu0 %v1995_v60  ;;  %v1932_v60 = vpop.f32.mrb[77].mxu1 }
 0x406   : > { %7238 = vmatprep.subr.bf16.mxu0 %v8125_v56  ;;  %v9658_v1 = vpop.f32.mrb[78].mxu1  ;;  %v8160_v60 = vld [vmem:[%s10540_s5 + $0x348] sm:$0xff]  }
 0x407   : > { %v2003_v7 = vpack.c.bf16 %v9658_v1, %v9653_v38  ;;  %v1935_v36 = vpop.f32.mrb[79].mxu1  ;;  %v8166_v38 = vld [vmem:[%s10540_s5 + $0x378] sm:$0xff]   ;;  %v8167_v1 = vld [vmem:[%s10540_s5 + $0x380] sm:$0xff]  }
 0x408   : > { %v9665_v50 = vpop.f32.mrb[80].mxu1  ;;  %v8162_v36 = vld [vmem:[%s10540_s5 + $0x358] sm:$0xff]  }
 0x409   : > { %7239 = vmatpush3.bf16.msra.mxu0 %v8125_v56  ;;  %v1940_v15 = vpop.f32.mrb[81].mxu1 }
 0x40a   : > { %7240 = vmatprep.subr.bf16.mxu0 %v8129_v58  ;;  %v9667_v40 = vpop.f32.mrb[82].mxu1  ;;  %v8169_v15 = vld [vmem:[%s10540_s5 + $0x390] sm:$0xff]  }
 0x40b   : > { %v2004_v41 = vpack.c.bf16 %v9667_v40, %v9665_v50  ;;  %v1943_v61 = vpop.f32.mrb[83].mxu1  ;;  %v8171_v50 = vld [vmem:[%s10540_s5 + $0x3a0] sm:$0xff]   ;;  %v8172_v40 = vld [vmem:[%s10540_s5 + $0x3a8] sm:$0xff]  }
 0x40c   : > { %v9695_v27 = vpop.f32.mrb[84].mxu1  ;;  %v8174_v61 = vld [vmem:[%s10540_s5 + $0x3b8] sm:$0xff]  }
 0x40d   : > { %7241 = vmatpush3.bf16.msra.mxu0 %v8129_v58  ;;  %v8153_v58 = vld [vmem:[%s10540_s5 + $0x310] sm:$0xff]  }
 0x40e   : > { %7242 = vmatprep.subr.bf16.mxu0 %v8130_v48 }
 0x411   : > { %7243 = vmatpush3.bf16.msra.mxu0 %v8130_v48  ;;  %v8387_v48 = vmov 0.0  }
 0x412   : > { %7244 = vmatprep.subr.bf16.mxu0 %v8131_v51  ;;  %7376 = vmatprep.subr.bf16.mxu1 %v8387_v48 }
 0x413   : > { %7377 = vmatpush3.bf16.msra.mxu1 %v8183_v8  ;;  %7392 = vmatprep.mubr.msk.bf16.mxu1 %vm8388_vm6, %v8387_v48 }
 0x414   : > { %7378 = vmatprep.subr.bf16.mxu1 %v8387_v48 }
 0x415   : > { %7245 = vmatpush3.bf16.msra.mxu0 %v8131_v51  ;;  %v8187_v51 = vld [vmem:[%s10541_s6 + $0x20] sm:$0xff]  }
 0x416   : > { %7246 = vmatprep.subr.bf16.mxu0 %v8132_v34 }
 0x417   : > { %7379 = vmatpush3.bf16.msra.mxu1 %v8184_v3 }
 0x418   : > { %7380 = vmatprep.subr.bf16.mxu1 %v8387_v48 }
 0x419   : > { %7247 = vmatpush3.bf16.msra.mxu0 %v8132_v34  ;;  %v8157_v34 = vld [vmem:[%s10540_s5 + $0x330] sm:$0xff]  }
 0x41a   : > { %7248 = vmatprep.subr.bf16.mxu0 %v8133_v5 }
 0x41d   : > { %7249 = vmatpush3.bf16.msra.mxu0 %v8133_v5  ;;  %v8158_v5 = vld [vmem:[%s10540_s5 + $0x338] sm:$0xff]  }
 0x41e   : > { %7250 = vmatprep.subr.bf16.mxu0 %v8134_v30 }
 0x421   : > { %7251 = vmatpush3.bf16.msra.mxu0 %v8134_v30  ;;  %v8159_v30 = vld [vmem:[%s10540_s5 + $0x340] sm:$0xff]  }
 0x422   : > { %7256 = vmatprep.subr.bf16.mxu0 %v8135_v4 }
 0x424   : > { %7253 = vmatmul.mubr.bf16.vlgmr.msra.gmra.mrb[80].mxu0 %v1996_v19  ;;  %v8141_v19 = vld [vmem:[%s10540_s5 + $0x2b0] sm:$0xff]  }
 0x425   : > { %7257 = vmatpush3.bf16.msra.mxu0 %v8135_v4  ;;  %7272 = vmatprep.mubr.bf16.mxu0 %v1997_v11  ;;  %v1948_v11 = vpop.f32.mrb[85].mxu1  ;;  %v8161_v4 = vld [vmem:[%s10540_s5 + $0x350] sm:$0xff]  }
 0x426   : > { %7258 = vmatprep.subr.bf16.mxu0 %v8136_v17  ;;  %v9700_v23 = vpop.f32.mrb[86].mxu1  ;;  %v8182_v11 = vld [vmem:[%s10540_s5 + $0x3f8] sm:$0xff]  }
 0x427   : > { %v2005_v22 = vpack.c.bf16 %v9700_v23, %v9695_v27  ;;  %v1951_v31 = vpop.f32.mrb[87].mxu1  ;;  %v8180_v27 = vld [vmem:[%s10540_s5 + $0x3e8] sm:$0xff]  }
 0x428   : > { %v9707_v63 = vpop.f32.mrb[88].mxu1  ;;  %v8188_v23 = vld [vmem:[%s10541_s6 + $0x28] sm:$0xff]   ;;  %v5995_v31 = vld [vmem:[%s10537_s2 + $0x2] ss:$0 sm:$0xff] }
 0x429   : > { %7259 = vmatpush3.bf16.msra.mxu0 %v8136_v17  ;;  %v1956_v39 = vpop.f32.mrb[89].mxu1  ;;  %v8170_v17 = vld [vmem:[%s10540_s5 + $0x398] sm:$0xff]  }
 0x42a   : > { %7260 = vmatprep.subr.bf16.mxu0 %v8137_v26  ;;  %v9709_v9 = vpop.f32.mrb[90].mxu1 }
 0x42b   : > { %v2006_v13 = vpack.c.bf16 %v9709_v9, %v9707_v63  ;;  %v1959_v37 = vpop.f32.mrb[91].mxu1 }
 0x42c   : > { %v9737_v62 = vpop.f32.mrb[92].mxu1 }
 0x42d   : > { %7261 = vmatpush3.bf16.msra.mxu0 %v8137_v26  ;;  %v8175_v26 = vld [vmem:[%s10540_s5 + $0x3c0] sm:$0xff]  }
 0x42e   : > { %7262 = vmatprep.subr.bf16.mxu0 %v8138_v42 }
 0x431   : > { %7263 = vmatpush3.bf16.msra.mxu0 %v8138_v42  ;;  %v8176_v42 = vld [vmem:[%s10540_s5 + $0x3c8] sm:$0xff]  }
 0x432   : > { %7264 = vmatprep.subr.bf16.mxu0 %v8139_v46 }
 0x435   : > { %7265 = vmatpush3.bf16.msra.mxu0 %v8139_v46  ;;  %v8177_v46 = vld [vmem:[%s10540_s5 + $0x3d0] sm:$0xff]  }
 0x436   : > { %7266 = vmatprep.subr.bf16.mxu0 %v8140_v10 }
 0x439   : > { %7267 = vmatpush3.bf16.msra.mxu0 %v8140_v10  ;;  %v8178_v10 = vld [vmem:[%s10540_s5 + $0x3d8] sm:$0xff]  }
 0x43a   : > { %7268 = vmatprep.subr.bf16.mxu0 %v8141_v19 }
 0x43d   : > { %7269 = vmatpush3.bf16.msra.mxu0 %v8141_v19  ;;  %v8179_v19 = vld [vmem:[%s10540_s5 + $0x3e0] sm:$0xff]  }
 0x43e   : > { %7270 = vmatprep.subr.bf16.mxu0 %v8142_v16 }
 0x441   : > { %7271 = vmatpush3.bf16.msra.mxu0 %v8142_v16  ;;  %v8181_v16 = vld [vmem:[%s10540_s5 + $0x3f0] sm:$0xff]  }
 0x442   : > { %7276 = vmatprep.subr.bf16.mxu0 %v8143_v52 }
 0x444   : > { %7273 = vmatmul.mubr.bf16.vlgmr.msra.gmra.mrb[80].mxu0 %v1998_v59  ;;  %v8149_v59 = vld [vmem:[%s10540_s5 + $0x2f0] sm:$0xff]  }
 0x445   : > { %7277 = vmatpush3.bf16.msra.mxu0 %v8143_v52  ;;  %7292 = vmatprep.mubr.bf16.mxu0 %v1999_v43  ;;  %v1964_v43 = vpop.f32.mrb[93].mxu1  ;;  %v8189_v52 = vld [vmem:[%s10541_s6 + $0x30] sm:$0xff]  }
 0x446   : > { %7278 = vmatprep.subr.bf16.mxu0 %v8144_v32  ;;  %v9742_v47 = vpop.f32.mrb[94].mxu1 }
 0x447   : > { %v2007_v29 = vpack.c.bf16 %v9742_v47, %v9737_v62  ;;  %v1967_v55 = vpop.f32.mrb[95].mxu1 }
 0x448   : > { %v9749_v6 = vpop.f32.mrb[96].mxu1 }
 0x449   : > { %7279 = vmatpush3.bf16.msra.mxu0 %v8144_v32  ;;  %v1972_v12 = vpop.f32.mrb[97].mxu1 }
 0x44a   : > { %7280 = vmatprep.subr.bf16.mxu0 %v8145_v2  ;;  %v9751_v28 = vpop.f32.mrb[98].mxu1 }
 0x44b   : > { %v2008_v21 = vpack.c.bf16 %v9751_v28, %v9749_v6  ;;  %v1975_v56 = vpop.f32.mrb[99].mxu1 }
 0x44d   : > { %7281 = vmatpush3.bf16.msra.mxu0 %v8145_v2 }
 0x44e   : > { %7282 = vmatprep.subr.bf16.mxu0 %v8146_v14 }
 0x451   : > { %7283 = vmatpush3.bf16.msra.mxu0 %v8146_v14 }
 0x452   : > { %7284 = vmatprep.subr.bf16.mxu0 %v8147_v0 }
 0x455   : > { %7285 = vmatpush3.bf16.msra.mxu0 %v8147_v0 }
 0x456   : > { %7286 = vmatprep.subr.bf16.mxu0 %v8148_v45 }
 0x459   : > { %7287 = vmatpush3.bf16.msra.mxu0 %v8148_v45 }
 0x45a   : > { %7288 = vmatprep.subr.bf16.mxu0 %v8149_v59 }
 0x45d   : > { %7289 = vmatpush3.bf16.msra.mxu0 %v8149_v59 }
 0x45e   : > { %7290 = vmatprep.subr.bf16.mxu0 %v8150_v24 }
 0x461   : > { %7291 = vmatpush3.bf16.msra.mxu0 %v8150_v24 }
 0x462   : > { %7296 = vmatprep.subr.bf16.mxu0 %v8151_v18 }
 0x464   : > { %7293 = vmatmul.mubr.bf16.vlgmr.msra.gmra.mrb[80].mxu0 %v2000_v53  ;;  %v8185_v53 = vld [vmem:[%s10541_s6 + $0x10] sm:$0xff]  }
 0x465   : > { %7297 = vmatpush3.bf16.msra.mxu0 %v8151_v18  ;;  %7312 = vmatprep.mubr.bf16.mxu0 %v2001_v44  ;;  %v8156_v44 = vld [vmem:[%s10540_s5 + $0x328] sm:$0xff]  }
 0x466   : > { %7298 = vmatprep.subr.bf16.mxu0 %v8152_v49  ;;  %7381 = vmatpush3.bf16.msra.mxu1 %v8185_v53 }
 0x467   : > { %7382 = vmatprep.subr.bf16.mxu1 %v8387_v48 }
 0x469   : > { %7299 = vmatpush3.bf16.msra.mxu0 %v8152_v49 }
 0x46a   : > { %7300 = vmatprep.subr.bf16.mxu0 %v8153_v58  ;;  %7383 = vmatpush3.bf16.msra.mxu1 %v8186_v25 }
 0x46b   : > { %7384 = vmatprep.subr.bf16.mxu1 %v8387_v48 }
 0x46d   : > { %7301 = vmatpush3.bf16.msra.mxu0 %v8153_v58 }
 0x46e   : > { %7302 = vmatprep.subr.bf16.mxu0 %v8154_v33  ;;  %7385 = vmatpush3.bf16.msra.mxu1 %v8187_v51  ;;  %v8193_v51 = vld [vmem:[%s10541_s6 + $0x50] sm:$0xff]  }
 0x46f   : > { %7386 = vmatprep.subr.bf16.mxu1 %v8387_v48 }
 0x471   : > { %7303 = vmatpush3.bf16.msra.mxu0 %v8154_v33 }
 0x472   : > { %7304 = vmatprep.subr.bf16.mxu0 %v8155_v57  ;;  %7387 = vmatpush3.bf16.msra.mxu1 %v8188_v23  ;;  %v8217_v23 = vld [vmem:[%s10541_s6 + $0x110] sm:$0xff]  }
 0x473   : > { %7388 = vmatprep.subr.bf16.mxu1 %v8387_v48 }
 0x475   : > { %7305 = vmatpush3.bf16.msra.mxu0 %v8155_v57  ;;  %v8191_v57 = vld [vmem:[%s10541_s6 + $0x40] sm:$0xff]  }
 0x476   : > { %7306 = vmatprep.subr.bf16.mxu0 %v8156_v44  ;;  %7389 = vmatpush3.bf16.msra.mxu1 %v8189_v52  ;;  %v8218_v52 = vld [vmem:[%s10541_s6 + $0x118] sm:$0xff]  }
 0x477   : > { %7390 = vmatprep.subr.bf16.mxu1 %v8387_v48 }
 0x479   : > { %7307 = vmatpush3.bf16.msra.mxu0 %v8156_v44  ;;  %v8192_v44 = vld [vmem:[%s10541_s6 + $0x48] sm:$0xff]  }
 0x47a   : > { %7308 = vmatprep.subr.bf16.mxu0 %v8157_v34 }
 0x47d   : > { %7309 = vmatpush3.bf16.msra.mxu0 %v8157_v34  ;;  %v8194_v34 = vld [vmem:[%s10541_s6 + $0x58] sm:$0xff]  }
 0x47e   : > { %7310 = vmatprep.subr.bf16.mxu0 %v8158_v5 }
 0x481   : > { %7311 = vmatpush3.bf16.msra.mxu0 %v8158_v5  ;;  %v8195_v5 = vld [vmem:[%s10541_s6 + $0x60] sm:$0xff]  }
 0x482   : > { %7316 = vmatprep.subr.bf16.mxu0 %v8159_v30 }
 0x484   : > { %7313 = vmatmul.mubr.bf16.vlgmr.msra.gmra.mrb[80].mxu0 %v2002_v54  ;;  %v8165_v54 = vld [vmem:[%s10540_s5 + $0x370] sm:$0xff]  }
 0x485   : > { %7317 = vmatpush3.bf16.msra.mxu0 %v8159_v30  ;;  %7332 = vmatprep.mubr.bf16.mxu0 %v2003_v7  ;;  %v8168_v7 = vld [vmem:[%s10540_s5 + $0x388] sm:$0xff]  }
 0x486   : > { %7318 = vmatprep.subr.bf16.mxu0 %v8160_v60  ;;  %v8196_v30 = vld [vmem:[%s10541_s6 + $0x68] sm:$0xff]  }
 0x489   : > { %7319 = vmatpush3.bf16.msra.mxu0 %v8160_v60  ;;  %v8197_v60 = vld [vmem:[%s10541_s6 + $0x70] sm:$0xff]  }
 0x48a   : > { %7320 = vmatprep.subr.bf16.mxu0 %v8161_v4 }
 0x48d   : > { %7321 = vmatpush3.bf16.msra.mxu0 %v8161_v4  ;;  %v8198_v4 = vld [vmem:[%s10541_s6 + $0x78] sm:$0xff]  }
 0x48e   : > { %7322 = vmatprep.subr.bf16.mxu0 %v8162_v36 }
 0x491   : > { %7323 = vmatpush3.bf16.msra.mxu0 %v8162_v36  ;;  %v8199_v36 = vld [vmem:[%s10541_s6 + $0x80] sm:$0xff]  }
 0x492   : > { %7324 = vmatprep.subr.bf16.mxu0 %v8163_v20 }
 0x495   : > { %7325 = vmatpush3.bf16.msra.mxu0 %v8163_v20 }
 0x496   : > { %7326 = vmatprep.subr.bf16.mxu0 %v8164_v35 }
 0x499   : > { %7327 = vmatpush3.bf16.msra.mxu0 %v8164_v35  ;;  %v8200_v35 = vld [vmem:[%s10541_s6 + $0x88] sm:$0xff]  }
 0x49a   : > { %7328 = vmatprep.subr.bf16.mxu0 %v8165_v54 }
 0x49d   : > { %7329 = vmatpush3.bf16.msra.mxu0 %v8165_v54  ;;  %v8201_v54 = vld [vmem:[%s10541_s6 + $0x90] sm:$0xff]  }
 0x49e   : > { %7330 = vmatprep.subr.bf16.mxu0 %v8166_v38 }
 0x4a1   : > { %7331 = vmatpush3.bf16.msra.mxu0 %v8166_v38  ;;  %v8202_v38 = vld [vmem:[%s10541_s6 + $0x98] sm:$0xff]  }
 0x4a2   : > { %7336 = vmatprep.subr.bf16.mxu0 %v8167_v1 }
 0x4a4   : > { %7333 = vmatmul.mubr.bf16.vlgmr.msra.gmra.mrb[80].mxu0 %v2004_v41  ;;  %v8173_v41 = vld [vmem:[%s10540_s5 + $0x3b0] sm:$0xff]  }
 0x4a5   : > { %7337 = vmatpush3.bf16.msra.mxu0 %v8167_v1  ;;  %7352 = vmatprep.mubr.bf16.mxu0 %v2005_v22  ;;  %v8190_v22 = vld [vmem:[%s10541_s6 + $0x38] sm:$0xff]   ;;  %v8203_v1 = vld [vmem:[%s10541_s6 + $0xa0] sm:$0xff]  }
 0x4a6   : > { %7338 = vmatprep.subr.bf16.mxu0 %v8168_v7  ;;  %7391 = vmatpush3.bf16.msra.mxu1 %v8190_v22  ;;  %v8219_v22 = vld [vmem:[%s10541_s6 + $0x120] sm:$0xff]  }
 0x4a7   : > { %7396 = vmatprep.subr.bf16.mxu1 %v8387_v48 }
 0x4a9   : > { %7339 = vmatpush3.bf16.msra.mxu0 %v8168_v7  ;;  %v8204_v7 = vld [vmem:[%s10541_s6 + $0xa8] sm:$0xff]  }
 0x4aa   : > { %7340 = vmatprep.subr.bf16.mxu0 %v8169_v15 }
 0x4ad   : > { %7341 = vmatpush3.bf16.msra.mxu0 %v8169_v15  ;;  %v8205_v15 = vld [vmem:[%s10541_s6 + $0xb0] sm:$0xff]  }
 0x4ae   : > { %7342 = vmatprep.subr.bf16.mxu0 %v8170_v17 }
 0x4b1   : > { %7343 = vmatpush3.bf16.msra.mxu0 %v8170_v17  ;;  %v8206_v17 = vld [vmem:[%s10541_s6 + $0xb8] sm:$0xff]  }
 0x4b2   : > { %7344 = vmatprep.subr.bf16.mxu0 %v8171_v50 }
 0x4b5   : > { %7345 = vmatpush3.bf16.msra.mxu0 %v8171_v50  ;;  %v8207_v50 = vld [vmem:[%s10541_s6 + $0xc0] sm:$0xff]  }
 0x4b6   : > { %7346 = vmatprep.subr.bf16.mxu0 %v8172_v40 }
 0x4b9   : > { %7347 = vmatpush3.bf16.msra.mxu0 %v8172_v40 }
 0x4ba   : > { %7348 = vmatprep.subr.bf16.mxu0 %v8173_v41 }
 0x4bd   : > { %7349 = vmatpush3.bf16.msra.mxu0 %v8173_v41  ;;  %v8208_v41 = vld [vmem:[%s10541_s6 + $0xc8] sm:$0xff]  }
 0x4be   : > { %7350 = vmatprep.subr.bf16.mxu0 %v8174_v61 }
 0x4c1   : > { %7351 = vmatpush3.bf16.msra.mxu0 %v8174_v61  ;;  %v8209_v61 = vld [vmem:[%s10541_s6 + $0xd0] sm:$0xff]  }
 0x4c2   : > { %7356 = vmatprep.subr.bf16.mxu0 %v8175_v26 }
 0x4c4   : > { %7353 = vmatmul.mubr.bf16.vlgmr.msra.gmra.mrb[80].mxu0 %v2006_v13 }
 0x4c5   : > { %7357 = vmatpush3.bf16.msra.mxu0 %v8175_v26  ;;  %7372 = vmatprep.mubr.bf16.mxu0 %v2007_v29  ;;  %v8210_v26 = vld [vmem:[%s10541_s6 + $0xd8] sm:$0xff]  }
 0x4c6   : > { %7358 = vmatprep.subr.bf16.mxu0 %v8176_v42 }
 0x4c9   : > { %7359 = vmatpush3.bf16.msra.mxu0 %v8176_v42  ;;  %v8211_v42 = vld [vmem:[%s10541_s6 + $0xe0] sm:$0xff]  }
 0x4ca   : > { %7360 = vmatprep.subr.bf16.mxu0 %v8177_v46 }
 0x4cd   : > { %7361 = vmatpush3.bf16.msra.mxu0 %v8177_v46  ;;  %v8212_v46 = vld [vmem:[%s10541_s6 + $0xe8] sm:$0xff]  }
 0x4ce   : > { %7362 = vmatprep.subr.bf16.mxu0 %v8178_v10 }
 0x4d1   : > { %7363 = vmatpush3.bf16.msra.mxu0 %v8178_v10  ;;  %v8213_v10 = vld [vmem:[%s10541_s6 + $0xf0] sm:$0xff]  }
 0x4d2   : > { %7364 = vmatprep.subr.bf16.mxu0 %v8179_v19 }
 0x4d5   : > { %7365 = vmatpush3.bf16.msra.mxu0 %v8179_v19  ;;  %v8214_v19 = vld [vmem:[%s10541_s6 + $0xf8] sm:$0xff]  }
 0x4d6   : > { %7366 = vmatprep.subr.bf16.mxu0 %v8180_v27 }
 0x4d9   : > { %7367 = vmatpush3.bf16.msra.mxu0 %v8180_v27  ;;  %v8215_v27 = vld [vmem:[%s10541_s6 + $0x100] sm:$0xff]  }
 0x4da   : > { %7368 = vmatprep.subr.bf16.mxu0 %v8181_v16 }
 0x4dd   : > { %7369 = vmatpush3.bf16.msra.mxu0 %v8181_v16 }
 0x4de   : > { %7370 = vmatprep.subr.bf16.mxu0 %v8182_v11 }
 0x4e1   : > { %7371 = vmatpush3.bf16.msra.mxu0 %v8182_v11  ;;  %v8216_v11 = vld [vmem:[%s10541_s6 + $0x108] sm:$0xff]  }
 0x4e2   : > { %7696 = vmatprep.subr.bf16.mxu0 %v8387_v48 }
 0x4e4   : > { %7373 = vmatmul.mubr.bf16.vlgmr.msra.gmra.mrb[80].mxu0 %v2008_v21 }
 0x4e5   : > { %7712 = vmatprep.mubr.msk.bf16.mxu0 %vm8388_vm6, %v8387_v48 }
 0x5b7   : > { %v7374_v63 = vpop.f32.mrb[80].mxu0 }
 0x5b8   : > { %v7740_v39 = vadd.f32 %v7374_v63, %v5995_v31  ;;  %v3881_v9 = vpop.f32.mrb[81].mxu0  ;;  %v8221_v63 = vld [vmem:[%s10541_s6 + $0x130] sm:$0xff]  }
 0x5b9   : > { %v7741_v32 = vadd.f32 %v5995_v31, %v3881_v9  ;;  %v7375_v13 = vpop.f32.mrb[82].mxu0  ;;  %v8223_v9 = vld [vmem:[%s10541_s6 + $0x140] sm:$0xff]  }
 0x5ba   : > { %v3906_v37 = vrot.slane %v7740_v39, 1  ;;  %v7742_v2 = vadd.f32 %v7375_v13, %v5995_v31  ;;  %v3884_v14 = vpop.f32.mrb[83].mxu0  ;;  %v8224_v13 = vld [vmem:[%s10541_s6 + $0x148] sm:$0xff]  }
 0x5bb   : > { %v7743_v0 = vadd.f32 %v5995_v31, %v3884_v14  ;;  %v3903_v62 = vrot.slane %v7741_v32, 1  ;;  %v8220_v31 = vld [vmem:[%s10541_s6 + $0x128] sm:$0xff]   ;;  %v8227_v14 = vld [vmem:[%s10541_s6 + $0x160] sm:$0xff]  }
 0x5bc   : > { %v3913_v45 = vmax.f32 %v7740_v39, %v3906_v37  ;;  %v3915_v59 = vrot.slane %v7742_v2, 1  ;;  %v8226_v2 = vld [vmem:[%s10541_s6 + $0x158] sm:$0xff]  }
 0x5bd   : > { %v3904_v24 = vrot.slane %v7743_v0, 1 }
 0x5be   : > { %v3916_v43 = vsel %vm743_vm1, %v3906_v37, %v3915_v59  ;;  %v8230_v59 = vld [vmem:[%s10541_s6 + $0x178] sm:$0xff]  }
 0x5bf   : > { %v3918_v47 = vmax.f32 %v7740_v39, %v3916_v43  ;;  %v3905_v29 = vsel %vm743_vm1, %v3903_v62, %v3904_v24  ;;  %v3907_v55 = vsel %vm743_vm1, %v3904_v24, %v3906_v37  ;;  %v8222_v39 = vld [vmem:[%s10541_s6 + $0x138] sm:$0xff]   ;;  %v8225_v37 = vld [vmem:[%s10541_s6 + $0x150] sm:$0xff]   ;;  %v8231_v62 = vld [vmem:[%s10541_s6 + $0x180] sm:$0xff]  }
 0x5c0   : > { %v3911_v18 = vmax.f32 %v7741_v32, %v3905_v29  ;;  %v3912_v6 = vmax.f32 %v7743_v0, %v3907_v55  ;;  %v8228_v0 = vld [vmem:[%s10541_s6 + $0x168] sm:$0xff]   ;;  %v8234_v29 = vld [vmem:[%s10541_s6 + $0x198] sm:$0xff]   ;;  %v8235_v55 = vld [vmem:[%s10541_s6 + $0x1a0] sm:$0xff]  }
 0x5c1   : > { %v3925_v12 = vrot.slane %v3918_v47, 5  ;;  %v8232_v43 = vld [vmem:[%s10541_s6 + $0x188] sm:$0xff]   ;;  %v8233_v47 = vld [vmem:[%s10541_s6 + $0x190] sm:$0xff]  }
 0x5c2   : > { %v3922_v28 = vrot.slane %v3911_v18, 5  ;;  %v3923_v49 = vrot.slane %v3912_v6, 5 }
 0x5c3   : > { %v9919_v21 = vmax.f32 %v3913_v45, %v3925_v12  ;;  %v8229_v45 = vld [vmem:[%s10541_s6 + $0x170] sm:$0xff]  }
 0x5c4   : > { %v3924_v56 = vsel %vm1682_vm5, %v3922_v28, %v3923_v49  ;;  %v3926_v8 = vsel %vm1682_vm5, %v3923_v49, %v3925_v12  ;;  %v8238_v12 = vld [vmem:[%s10541_s6 + $0x1b8] sm:$0xff]   ;;  %v8239_v28 = vld [vmem:[%s10541_s6 + $0x1c0] sm:$0xff]  }
 0x5c5   : > { %v3930_v58 = vmax.f32 %v3911_v18, %v3924_v56  ;;  %v3931_v3 = vmax.f32 %v3912_v6, %v3926_v8  ;;  %v8236_v18 = vld [vmem:[%s10541_s6 + $0x1a8] sm:$0xff]   ;;  %v8237_v6 = vld [vmem:[%s10541_s6 + $0x1b0] sm:$0xff]  }
 0x5c6   : > { %v8240_v56 = vld [vmem:[%s10541_s6 + $0x1c8] sm:$0xff]   ;;  %v8241_v8 = vld [vmem:[%s10541_s6 + $0x1d0] sm:$0xff]  }
 0x5c7   : > { %v3933_v33 = vmax.f32 %v3930_v58, 0.0  ;;  %v3934_v53 = vmax.f32 %v3931_v3, 0.0  ;;  %v8242_v58 = vld [vmem:[%s10541_s6 + $0x1d8] sm:$0xff]   ;;  %v8243_v3 = vld [vmem:[%s10541_s6 + $0x1e0] sm:$0xff]  }
 0x5c9   : > { %v9926_v25 = vpack.c.bf16 %v3934_v53, %v3933_v33  ;;  %v8244_v33 = vld [vmem:[%s10541_s6 + $0x1e8] sm:$0xff]   ;;  %v8245_v53 = vld [vmem:[%s10541_s6 + $0x1f0] sm:$0xff]  }
 0x5cb   : > { %7393 = vmatmul.mubr.bf16.vlgmr.msra.gmra.mrb[100].mxu1 %v9926_v25  ;;  %v9963_v20 = vshrl.u32 %v9926_v25, 16  ;;  %v4171_v40 = vrot.slane %v9926_v25, 1  ;;  %v4495_v24 = vrot.slane %v9926_v25, 3 }
 0x5cc   : > { %7397 = vmatpush3.bf16.msra.mxu1 %v8191_v57  ;;  %7412 = vmatprep.mubr.msk.bf16.mxu1 %vm8388_vm6, %v8387_v48  ;;  %v8246_v57 = vld [vmem:[%s10541_s6 + $0x1f8] sm:$0xff]  }
 0x5cd   : > { %7398 = vmatprep.subr.bf16.mxu1 %v8387_v48  ;;  %v4279_v16 = vrot.slane %v9963_v20, 1  ;;  %v4387_v32 = vrot.slane %v9963_v20, 2  ;;  %v4603_v49 = vrot.slane %v9963_v20, 3 }
 0x5d0   : > { %7399 = vmatpush3.bf16.msra.mxu1 %v8192_v44  ;;  %v8247_v44 = vld [vmem:[%s10541_s6 + $0x200] sm:$0xff]  }
 0x5d1   : > { %7400 = vmatprep.subr.bf16.mxu1 %v8387_v48 }
 0x5d4   : > { %7401 = vmatpush3.bf16.msra.mxu1 %v8193_v51  ;;  %v4711_v51 = vrot.slane %v9926_v25, 4 }
 0x5d5   : > { %7402 = vmatprep.subr.bf16.mxu1 %v8387_v48 }
 0x5d8   : > { %7403 = vmatpush3.bf16.msra.mxu1 %v8194_v34  ;;  %v8248_v34 = vld [vmem:[%s10541_s6 + $0x208] sm:$0xff]  }
 0x5d9   : > { %7404 = vmatprep.subr.bf16.mxu1 %v8387_v48 }
 0x5dc   : > { %7405 = vmatpush3.bf16.msra.mxu1 %v8195_v5  ;;  %v8249_v5 = vld [vmem:[%s10541_s6 + $0x210] sm:$0xff]  }
 0x5dd   : > { %7406 = vmatprep.subr.bf16.mxu1 %v8387_v48 }
 0x5e0   : > { %7407 = vmatpush3.bf16.msra.mxu1 %v8196_v30  ;;  %v8250_v30 = vld [vmem:[%s10541_s6 + $0x218] sm:$0xff]  }
 0x5e1   : > { %7408 = vmatprep.subr.bf16.mxu1 %v8387_v48 }
 0x5e4   : > { %7409 = vmatpush3.bf16.msra.mxu1 %v8197_v60  ;;  %v8251_v60 = vld [vmem:[%s10541_s6 + $0x220] sm:$0xff]  }
 0x5e5   : > { %7410 = vmatprep.subr.bf16.mxu1 %v8387_v48 }
 0x5e8   : > { %7411 = vmatpush3.bf16.msra.mxu1 %v8198_v4  ;;  %v8252_v4 = vld [vmem:[%s10541_s6 + $0x228] sm:$0xff]  }
 0x5e9   : > { %7416 = vmatprep.subr.bf16.mxu1 %v8387_v48 }
 0x5eb   : > { %7413 = vmatmul.mubr.bf16.vlgmr.msra.gmra.mrb[100].mxu1 %v9963_v20 }
 0x5ec   : > { %7417 = vmatpush3.bf16.msra.mxu1 %v8199_v36  ;;  %7432 = vmatprep.mubr.msk.bf16.mxu1 %vm8388_vm6, %v8387_v48  ;;  %v8253_v36 = vld [vmem:[%s10541_s6 + $0x230] sm:$0xff]  }
 0x5ed   : > { %7418 = vmatprep.subr.bf16.mxu1 %v8387_v48 }
 0x5f0   : > { %7419 = vmatpush3.bf16.msra.mxu1 %v8200_v35  ;;  %v8254_v35 = vld [vmem:[%s10541_s6 + $0x238] sm:$0xff]  }
 0x5f1   : > { %7420 = vmatprep.subr.bf16.mxu1 %v8387_v48 }
 0x5f4   : > { %7421 = vmatpush3.bf16.msra.mxu1 %v8201_v54  ;;  %v8255_v54 = vld [vmem:[%s10541_s6 + $0x240] sm:$0xff]  }
 0x5f5   : > { %7422 = vmatprep.subr.bf16.mxu1 %v8387_v48 }
 0x5f8   : > { %7423 = vmatpush3.bf16.msra.mxu1 %v8202_v38  ;;  %v4819_v38 = vrot.slane %v9926_v25, 5 }
 0x5f9   : > { %7424 = vmatprep.subr.bf16.mxu1 %v8387_v48 }
 0x5fc   : > { %7425 = vmatpush3.bf16.msra.mxu1 %v8203_v1  ;;  %v8256_v1 = vld [vmem:[%s10541_s6 + $0x248] sm:$0xff]  }
 0x5fd   : > { %7426 = vmatprep.subr.bf16.mxu1 %v8387_v48 }
 0x600   : > { %7427 = vmatpush3.bf16.msra.mxu1 %v8204_v7  ;;  %v8257_v7 = vld [vmem:[%s10541_s6 + $0x250] sm:$0xff]  }
 0x601   : > { %7428 = vmatprep.subr.bf16.mxu1 %v8387_v48 }
 0x604   : > { %7429 = vmatpush3.bf16.msra.mxu1 %v8205_v15  ;;  %v8258_v15 = vld [vmem:[%s10541_s6 + $0x258] sm:$0xff]  }
 0x605   : > { %7430 = vmatprep.subr.bf16.mxu1 %v8387_v48 }
 0x608   : > { %7431 = vmatpush3.bf16.msra.mxu1 %v8206_v17  ;;  %v8259_v17 = vld [vmem:[%s10541_s6 + $0x260] sm:$0xff]  }
 0x609   : > { %7436 = vmatprep.subr.bf16.mxu1 %v8387_v48 }
 0x60b   : > { %7433 = vmatmul.mubr.bf16.vlgmr.msra.gmra.mrb[100].mxu1 %v4171_v40  ;;  %v8261_v40 = vld [vmem:[%s10541_s6 + $0x270] sm:$0xff]  }
 0x60c   : > { %7437 = vmatpush3.bf16.msra.mxu1 %v8207_v50  ;;  %7452 = vmatprep.mubr.msk.bf16.mxu1 %vm8388_vm6, %v8387_v48  ;;  %v8260_v50 = vld [vmem:[%s10541_s6 + $0x268] sm:$0xff]  }
 0x60d   : > { %7438 = vmatprep.subr.bf16.mxu1 %v8387_v48 }
 0x610   : > { %7439 = vmatpush3.bf16.msra.mxu1 %v8208_v41  ;;  %v8262_v41 = vld [vmem:[%s10541_s6 + $0x278] sm:$0xff]  }
 0x611   : > { %7440 = vmatprep.subr.bf16.mxu1 %v8387_v48 }
 0x614   : > { %7441 = vmatpush3.bf16.msra.mxu1 %v8209_v61  ;;  %v8263_v61 = vld [vmem:[%s10541_s6 + $0x280] sm:$0xff]  }
 0x615   : > { %7442 = vmatprep.subr.bf16.mxu1 %v8387_v48 }
 0x618   : > { %7443 = vmatpush3.bf16.msra.mxu1 %v8210_v26  ;;  %v4927_v26 = vrot.slane %v9963_v20, 5 }
 0x619   : > { %7444 = vmatprep.subr.bf16.mxu1 %v8387_v48 }
 0x61c   : > { %7445 = vmatpush3.bf16.msra.mxu1 %v8211_v42  ;;  %v8264_v42 = vld [vmem:[%s10541_s6 + $0x288] sm:$0xff]  }
 0x61d   : > { %7446 = vmatprep.subr.bf16.mxu1 %v8387_v48 }
 0x620   : > { %7447 = vmatpush3.bf16.msra.mxu1 %v8212_v46  ;;  %v8265_v46 = vld [vmem:[%s10541_s6 + $0x290] sm:$0xff]  }
 0x621   : > { %7448 = vmatprep.subr.bf16.mxu1 %v8387_v48 }
 0x624   : > { %7449 = vmatpush3.bf16.msra.mxu1 %v8213_v10  ;;  %v8266_v10 = vld [vmem:[%s10541_s6 + $0x298] sm:$0xff]  }
 0x625   : > { %7450 = vmatprep.subr.bf16.mxu1 %v8387_v48 }
 0x628   : > { %7451 = vmatpush3.bf16.msra.mxu1 %v8214_v19  ;;  %v8267_v19 = vld [vmem:[%s10541_s6 + $0x2a0] sm:$0xff]  }
 0x629   : > { %7456 = vmatprep.subr.bf16.mxu1 %v8387_v48 }
 0x62b   : > { %7453 = vmatmul.mubr.bf16.vlgmr.msra.gmra.mrb[100].mxu1 %v4279_v16  ;;  %v8269_v16 = vld [vmem:[%s10541_s6 + $0x2b0] sm:$0xff]  }
 0x62c   : > { %7457 = vmatpush3.bf16.msra.mxu1 %v8215_v27  ;;  %7472 = vmatprep.mubr.msk.bf16.mxu1 %vm8388_vm6, %v8387_v48  ;;  %v8268_v27 = vld [vmem:[%s10541_s6 + $0x2a8] sm:$0xff]  }
 0x62d   : > { %7458 = vmatprep.subr.bf16.mxu1 %v8387_v48 }
 0x630   : > { %7459 = vmatpush3.bf16.msra.mxu1 %v8216_v11  ;;  %v8270_v11 = vld [vmem:[%s10541_s6 + $0x2b8] sm:$0xff]  }
 0x631   : > { %7460 = vmatprep.subr.bf16.mxu1 %v8387_v48 }
 0x634   : > { %7461 = vmatpush3.bf16.msra.mxu1 %v8217_v23  ;;  %v8271_v23 = vld [vmem:[%s10541_s6 + $0x2c0] sm:$0xff]  }
 0x635   : > { %7462 = vmatprep.subr.bf16.mxu1 %v8387_v48 }
 0x638   : > { %7463 = vmatpush3.bf16.msra.mxu1 %v8218_v52  ;;  %v5035_v52 = vrot.slane %v9926_v25, 6  ;;  %v8274_v25 = vld [vmem:[%s10541_s6 + $0x2d8] sm:$0xff]  }
 0x639   : > { %7464 = vmatprep.subr.bf16.mxu1 %v8387_v48 }
 0x63c   : > { %7465 = vmatpush3.bf16.msra.mxu1 %v8219_v22  ;;  %v8272_v22 = vld [vmem:[%s10541_s6 + $0x2c8] sm:$0xff]  }
 0x63d   : > { %7466 = vmatprep.subr.bf16.mxu1 %v8387_v48 }
 0x640   : > { %7467 = vmatpush3.bf16.msra.mxu1 %v8220_v31  ;;  %v8273_v31 = vld [vmem:[%s10541_s6 + $0x2d0] sm:$0xff]  }
 0x641   : > { %7468 = vmatprep.subr.bf16.mxu1 %v8387_v48 }
 0x644   : > { %7469 = vmatpush3.bf16.msra.mxu1 %v8221_v63  ;;  %v8275_v63 = vld [vmem:[%s10541_s6 + $0x2e0] sm:$0xff]  }
 0x645   : > { %7470 = vmatprep.subr.bf16.mxu1 %v8387_v48 }
 0x648   : > { %7471 = vmatpush3.bf16.msra.mxu1 %v8222_v39  ;;  %v8276_v39 = vld [vmem:[%s10541_s6 + $0x2e8] sm:$0xff]  }
 0x649   : > { %7476 = vmatprep.subr.bf16.mxu1 %v8387_v48 }
 0x64b   : > { %7473 = vmatmul.mubr.bf16.vlgmr.msra.gmra.mrb[100].mxu1 %v4387_v32  ;;  %v8278_v32 = vld [vmem:[%s10541_s6 + $0x2f8] sm:$0xff]  }
 0x64c   : > { %7477 = vmatpush3.bf16.msra.mxu1 %v8223_v9  ;;  %7492 = vmatprep.mubr.msk.bf16.mxu1 %vm8388_vm6, %v8387_v48  ;;  %v8277_v9 = vld [vmem:[%s10541_s6 + $0x2f0] sm:$0xff]  }
 0x64d   : > { %7478 = vmatprep.subr.bf16.mxu1 %v8387_v48 }
 0x650   : > { %7479 = vmatpush3.bf16.msra.mxu1 %v8224_v13  ;;  %v8279_v13 = vld [vmem:[%s10541_s6 + $0x300] sm:$0xff]  }
 0x651   : > { %7480 = vmatprep.subr.bf16.mxu1 %v8387_v48 }
 0x654   : > { %7481 = vmatpush3.bf16.msra.mxu1 %v8225_v37  ;;  %v5143_v37 = vrot.slane %v9963_v20, 6 }
 0x655   : > { %7482 = vmatprep.subr.bf16.mxu1 %v8387_v48 }
 0x658   : > { %7483 = vmatpush3.bf16.msra.mxu1 %v8226_v2  ;;  %v8311_v2 = vld [vmem:[%s10542_s7] sm:$0xff]  }
 0x659   : > { %7484 = vmatprep.subr.bf16.mxu1 %v8387_v48  ;;  %7697 = vmatpush3.bf16.msra.mxu0 %v8311_v2 }
 0x65a   : > { %7698 = vmatprep.subr.bf16.mxu0 %v8387_v48 }
 0x65c   : > { %7485 = vmatpush3.bf16.msra.mxu1 %v8227_v14  ;;  %v8280_v14 = vld [vmem:[%s10541_s6 + $0x308] sm:$0xff]  }
 0x65d   : > { %7486 = vmatprep.subr.bf16.mxu1 %v8387_v48 }
 0x660   : > { %7487 = vmatpush3.bf16.msra.mxu1 %v8228_v0  ;;  %v8312_v0 = vld [vmem:[%s10542_s7 + $0x8] sm:$0xff]  }
 0x661   : > { %7488 = vmatprep.subr.bf16.mxu1 %v8387_v48  ;;  %7699 = vmatpush3.bf16.msra.mxu0 %v8312_v0 }
 0x662   : > { %7700 = vmatprep.subr.bf16.mxu0 %v8387_v48 }
 0x664   : > { %7489 = vmatpush3.bf16.msra.mxu1 %v8229_v45  ;;  %v8281_v45 = vld [vmem:[%s10541_s6 + $0x310] sm:$0xff]  }
 0x665   : > { %7490 = vmatprep.subr.bf16.mxu1 %v8387_v48 }
 0x668   : > { %7491 = vmatpush3.bf16.msra.mxu1 %v8230_v59  ;;  %v8313_v59 = vld [vmem:[%s10542_s7 + $0x10] sm:$0xff]  }
 0x669   : > { %7496 = vmatprep.subr.bf16.mxu1 %v8387_v48  ;;  %7701 = vmatpush3.bf16.msra.mxu0 %v8313_v59 }
 0x66a   : > { %7702 = vmatprep.subr.bf16.mxu0 %v8387_v48 }
 0x66b   : > { %7493 = vmatmul.mubr.bf16.vlgmr.msra.gmra.mrb[100].mxu1 %v4495_v24  ;;  %v8314_v24 = vld [vmem:[%s10542_s7 + $0x18] sm:$0xff]  }
 0x66c   : > { %7497 = vmatpush3.bf16.msra.mxu1 %v8231_v62  ;;  %7512 = vmatprep.mubr.msk.bf16.mxu1 %vm8388_vm6, %v8387_v48  ;;  %v8282_v62 = vld [vmem:[%s10541_s6 + $0x318] sm:$0xff]  }
 0x66d   : > { %7498 = vmatprep.subr.bf16.mxu1 %v8387_v48  ;;  %7703 = vmatpush3.bf16.msra.mxu0 %v8314_v24 }
 0x66e   : > { %7704 = vmatprep.subr.bf16.mxu0 %v8387_v48 }
 0x670   : > { %7499 = vmatpush3.bf16.msra.mxu1 %v8232_v43  ;;  %v8283_v43 = vld [vmem:[%s10541_s6 + $0x320] sm:$0xff]  }
 0x671   : > { %7500 = vmatprep.subr.bf16.mxu1 %v8387_v48 }
 0x674   : > { %7501 = vmatpush3.bf16.msra.mxu1 %v8233_v47  ;;  %v8315_v47 = vld [vmem:[%s10542_s7 + $0x20] sm:$0xff]  }
 0x675   : > { %7502 = vmatprep.subr.bf16.mxu1 %v8387_v48  ;;  %7705 = vmatpush3.bf16.msra.mxu0 %v8315_v47 }
 0x676   : > { %7706 = vmatprep.subr.bf16.mxu0 %v8387_v48 }
 0x678   : > { %7503 = vmatpush3.bf16.msra.mxu1 %v8234_v29  ;;  %v8284_v29 = vld [vmem:[%s10541_s6 + $0x328] sm:$0xff]  }
 0x679   : > { %7504 = vmatprep.subr.bf16.mxu1 %v8387_v48 }
 0x67c   : > { %7505 = vmatpush3.bf16.msra.mxu1 %v8235_v55  ;;  %v8316_v55 = vld [vmem:[%s10542_s7 + $0x28] sm:$0xff]  }
 0x67d   : > { %7506 = vmatprep.subr.bf16.mxu1 %v8387_v48  ;;  %7707 = vmatpush3.bf16.msra.mxu0 %v8316_v55 }
 0x67e   : > { %7708 = vmatprep.subr.bf16.mxu0 %v8387_v48 }
 0x680   : > { %7507 = vmatpush3.bf16.msra.mxu1 %v8236_v18  ;;  %v8285_v18 = vld [vmem:[%s10541_s6 + $0x330] sm:$0xff]  }
 0x681   : > { %7508 = vmatprep.subr.bf16.mxu1 %v8387_v48 }
 0x684   : > { %7509 = vmatpush3.bf16.msra.mxu1 %v8237_v6  ;;  %v8286_v6 = vld [vmem:[%s10541_s6 + $0x338] sm:$0xff]  }
 0x685   : > { %7510 = vmatprep.subr.bf16.mxu1 %v8387_v48 }
 0x688   : > { %7511 = vmatpush3.bf16.msra.mxu1 %v8238_v12  ;;  %v8287_v12 = vld [vmem:[%s10541_s6 + $0x340] sm:$0xff]  }
 0x689   : > { %7516 = vmatprep.subr.bf16.mxu1 %v8387_v48 }
 0x68b   : > { %7513 = vmatmul.mubr.bf16.vlgmr.msra.gmra.mrb[100].mxu1 %v4603_v49  ;;  %v8288_v49 = vld [vmem:[%s10541_s6 + $0x348] sm:$0xff]  }
 0x68c   : > { %7517 = vmatpush3.bf16.msra.mxu1 %v8239_v28  ;;  %7532 = vmatprep.mubr.msk.bf16.mxu1 %vm8388_vm6, %v8387_v48  ;;  %v5251_v28 = vrot.slane %v9963_v20, 7  ;;  %v8290_v20 = vld [vmem:[%s10541_s6 + $0x358] sm:$0xff]  }
 0x68d   : > { %7518 = vmatprep.subr.bf16.mxu1 %v8387_v48 }
 0x690   : > { %7519 = vmatpush3.bf16.msra.mxu1 %v8240_v56  ;;  %v8289_v56 = vld [vmem:[%s10541_s6 + $0x350] sm:$0xff]  }
 0x691   : > { %7520 = vmatprep.subr.bf16.mxu1 %v8387_v48 }
 0x694   : > { %7521 = vmatpush3.bf16.msra.mxu1 %v8241_v8  ;;  %v8291_v8 = vld [vmem:[%s10541_s6 + $0x360] sm:$0xff]  }
 0x695   : > { %7522 = vmatprep.subr.bf16.mxu1 %v8387_v48 }
 0x698   : > { %7523 = vmatpush3.bf16.msra.mxu1 %v8242_v58  ;;  %v8292_v58 = vld [vmem:[%s10541_s6 + $0x368] sm:$0xff]  }
 0x699   : > { %7524 = vmatprep.subr.bf16.mxu1 %v8387_v48 }
 0x69c   : > { %7525 = vmatpush3.bf16.msra.mxu1 %v8243_v3  ;;  %v8293_v3 = vld [vmem:[%s10541_s6 + $0x370] sm:$0xff]  }
 0x69d   : > { %7526 = vmatprep.subr.bf16.mxu1 %v8387_v48 }
 0x6a0   : > { %7527 = vmatpush3.bf16.msra.mxu1 %v8244_v33  ;;  %v8294_v33 = vld [vmem:[%s10541_s6 + $0x378] sm:$0xff]  }
 0x6a1   : > { %7528 = vmatprep.subr.bf16.mxu1 %v8387_v48 }
 0x6a4   : > { %7529 = vmatpush3.bf16.msra.mxu1 %v8245_v53  ;;  %v3935_v53 = vmax.f32 %v9919_v21, 0.0  ;;  %v8297_v21 = vld [vmem:[%s10541_s6 + $0x390] sm:$0xff]  }
 0x6a5   : > { %7530 = vmatprep.subr.bf16.mxu1 %v8387_v48 }
 0x6a8   : > { %7531 = vmatpush3.bf16.msra.mxu1 %v8246_v57  ;;  %v8295_v57 = vld [vmem:[%s10541_s6 + $0x380] sm:$0xff]  }
 0x6a9   : > { %7536 = vmatprep.subr.bf16.mxu1 %v8387_v48 }
 0x6ab   : > { %7533 = vmatmul.mubr.bf16.vlgmr.msra.gmra.mrb[100].mxu1 %v4711_v51  ;;  %v8296_v51 = vld [vmem:[%s10541_s6 + $0x388] sm:$0xff]  }
 0x6ac   : > { %7537 = vmatpush3.bf16.msra.mxu1 %v8247_v44  ;;  %7552 = vmatprep.mubr.msk.bf16.mxu1 %vm8388_vm6, %v8387_v48  ;;  %v3937_v44 = vpack.c.bf16 %v3935_v53, %v3935_v53 }
 0x6ad   : > { %7538 = vmatprep.subr.bf16.mxu1 %v8387_v48 }
 0x6b0   : > { %7539 = vmatpush3.bf16.msra.mxu1 %v8248_v34  ;;  %v8298_v34 = vld [vmem:[%s10541_s6 + $0x398] sm:$0xff]  }
 0x6b1   : > { %7540 = vmatprep.subr.bf16.mxu1 %v8387_v48 }
 0x6b4   : > { %7541 = vmatpush3.bf16.msra.mxu1 %v8249_v5  ;;  %v8299_v5 = vld [vmem:[%s10541_s6 + $0x3a0] sm:$0xff]  }
 0x6b5   : > { %7542 = vmatprep.subr.bf16.mxu1 %v8387_v48 }
 0x6b8   : > { %7543 = vmatpush3.bf16.msra.mxu1 %v8250_v30  ;;  %v8300_v30 = vld [vmem:[%s10541_s6 + $0x3a8] sm:$0xff]  }
 0x6b9   : > { %7544 = vmatprep.subr.bf16.mxu1 %v8387_v48 }
 0x6bc   : > { %7545 = vmatpush3.bf16.msra.mxu1 %v8251_v60  ;;  %v8301_v60 = vld [vmem:[%s10541_s6 + $0x3b0] sm:$0xff]  }
 0x6bd   : > { %7546 = vmatprep.subr.bf16.mxu1 %v8387_v48 }
 0x6c0   : > { %7547 = vmatpush3.bf16.msra.mxu1 %v8252_v4  ;;  %v8302_v4 = vld [vmem:[%s10541_s6 + $0x3b8] sm:$0xff]  }
 0x6c1   : > { %7548 = vmatprep.subr.bf16.mxu1 %v8387_v48 }
 0x6c4   : > { %7549 = vmatpush3.bf16.msra.mxu1 %v8253_v36  ;;  %v8303_v36 = vld [vmem:[%s10541_s6 + $0x3c0] sm:$0xff]  }
 0x6c5   : > { %7550 = vmatprep.subr.bf16.mxu1 %v8387_v48 }
 0x6c8   : > { %7551 = vmatpush3.bf16.msra.mxu1 %v8254_v35  ;;  %v5466_v35 = vshrl.u32 %v3937_v44, 16 }
 0x6c9   : > { %7556 = vmatprep.subr.bf16.mxu1 %v8387_v48 }
 0x6cb   : > { %7553 = vmatmul.mubr.bf16.vlgmr.msra.gmra.mrb[100].mxu1 %v4819_v38  ;;  %v8305_v38 = vld [vmem:[%s10541_s6 + $0x3d0] sm:$0xff]  }
 0x6cc   : > { %7557 = vmatpush3.bf16.msra.mxu1 %v8255_v54  ;;  %7572 = vmatprep.mubr.msk.bf16.mxu1 %vm8388_vm6, %v8387_v48  ;;  %v8304_v54 = vld [vmem:[%s10541_s6 + $0x3c8] sm:$0xff]  }
 0x6cd   : > { %7558 = vmatprep.subr.bf16.mxu1 %v8387_v48 }
 0x6d0   : > { %7559 = vmatpush3.bf16.msra.mxu1 %v8256_v1  ;;  %v8306_v1 = vld [vmem:[%s10541_s6 + $0x3d8] sm:$0xff]  }
 0x6d1   : > { %7560 = vmatprep.subr.bf16.mxu1 %v8387_v48 }
 0x6d4   : > { %7561 = vmatpush3.bf16.msra.mxu1 %v8257_v7  ;;  %v8307_v7 = vld [vmem:[%s10541_s6 + $0x3e0] sm:$0xff]  }
 0x6d5   : > { %7562 = vmatprep.subr.bf16.mxu1 %v8387_v48 }
 0x6d8   : > { %7563 = vmatpush3.bf16.msra.mxu1 %v8258_v15  ;;  %v8308_v15 = vld [vmem:[%s10541_s6 + $0x3e8] sm:$0xff]  }
 0x6d9   : > { %7564 = vmatprep.subr.bf16.mxu1 %v8387_v48 }
 0x6dc   : > { %7565 = vmatpush3.bf16.msra.mxu1 %v8259_v17  ;;  %v8309_v17 = vld [vmem:[%s10541_s6 + $0x3f0] sm:$0xff]  }
 0x6dd   : > { %7566 = vmatprep.subr.bf16.mxu1 %v8387_v48 }
 0x6e0   : > { %7567 = vmatpush3.bf16.msra.mxu1 %v8260_v50  ;;  %v8310_v50 = vld [vmem:[%s10541_s6 + $0x3f8] sm:$0xff]  }
 0x6e1   : > { %7568 = vmatprep.subr.bf16.mxu1 %v8387_v48 }
 0x6e4   : > { %7569 = vmatpush3.bf16.msra.mxu1 %v8261_v40  ;;  %v5576_v40 = vrot.slane %v3937_v44, 1 }
 0x6e5   : > { %7570 = vmatprep.subr.bf16.mxu1 %v8387_v48 }
 0x6e8   : > { %7571 = vmatpush3.bf16.msra.mxu1 %v8262_v41  ;;  %v8317_v41 = vld [vmem:[%s10542_s7 + $0x30] sm:$0xff]  }
 0x6e9   : > { %7576 = vmatprep.subr.bf16.mxu1 %v8387_v48  ;;  %7709 = vmatpush3.bf16.msra.mxu0 %v8317_v41 }
 0x6ea   : > { %7710 = vmatprep.subr.bf16.mxu0 %v8387_v48 }
 0x6eb   : > { %7573 = vmatmul.mubr.bf16.vlgmr.msra.gmra.mrb[100].mxu1 %v4927_v26  ;;  %v307_v26 = vld [vmem:[%s10537_s2 + $0x3] sm:$0x1] }
 0x6ec   : > { %7577 = vmatpush3.bf16.msra.mxu1 %v8263_v61  ;;  %7592 = vmatprep.mubr.msk.bf16.mxu1 %vm8388_vm6, %v8387_v48  ;;  %v8318_v61 = vld [vmem:[%s10542_s7 + $0x38] sm:$0xff]  }
 0x6ed   : > { %7578 = vmatprep.subr.bf16.mxu1 %v8387_v48  ;;  %7711 = vmatpush3.bf16.msra.mxu0 %v8318_v61 }
 0x6f0   : > { %7579 = vmatpush3.bf16.msra.mxu1 %v8264_v42 }
 0x6f1   : > { %7580 = vmatprep.subr.bf16.mxu1 %v8387_v48 }
 0x6f4   : > { %7581 = vmatpush3.bf16.msra.mxu1 %v8265_v46 }
 0x6f5   : > { %7582 = vmatprep.subr.bf16.mxu1 %v8387_v48 }
 0x6f8   : > { %7583 = vmatpush3.bf16.msra.mxu1 %v8266_v10 }
 0x6f9   : > { %7584 = vmatprep.subr.bf16.mxu1 %v8387_v48 }
 0x6fc   : > { %7585 = vmatpush3.bf16.msra.mxu1 %v8267_v19 }
 0x6fd   : > { %7586 = vmatprep.subr.bf16.mxu1 %v8387_v48 }
 0x700   : > { %7587 = vmatpush3.bf16.msra.mxu1 %v8268_v27 }
 0x701   : > { %7588 = vmatprep.subr.bf16.mxu1 %v8387_v48 }
 0x704   : > { %7589 = vmatpush3.bf16.msra.mxu1 %v8269_v16 }
 0x705   : > { %7590 = vmatprep.subr.bf16.mxu1 %v8387_v48 }
 0x708   : > { %7591 = vmatpush3.bf16.msra.mxu1 %v8270_v11 }
 0x709   : > { %7596 = vmatprep.subr.bf16.mxu1 %v8387_v48 }
 0x70b   : > { %7593 = vmatmul.mubr.bf16.vlgmr.msra.gmra.mrb[100].mxu1 %v5035_v52 }
 0x70c   : > { %7597 = vmatpush3.bf16.msra.mxu1 %v8271_v23  ;;  %7612 = vmatprep.mubr.msk.bf16.mxu1 %vm8388_vm6, %v8387_v48  ;;  %v308_v23 = vld [vmem:[%s10537_s2 + $0x4] sm:$0x1] }
 0x70d   : > { %7598 = vmatprep.subr.bf16.mxu1 %v8387_v48 }
 0x710   : > { %7599 = vmatpush3.bf16.msra.mxu1 %v8272_v22 }
 0x711   : > { %7600 = vmatprep.subr.bf16.mxu1 %v8387_v48 }
 0x714   : > { %7601 = vmatpush3.bf16.msra.mxu1 %v8273_v31 }
 0x715   : > { %7602 = vmatprep.subr.bf16.mxu1 %v8387_v48 }
 0x718   : > { %7603 = vmatpush3.bf16.msra.mxu1 %v8274_v25 }
 0x719   : > { %7604 = vmatprep.subr.bf16.mxu1 %v8387_v48 }
 0x71c   : > { %7605 = vmatpush3.bf16.msra.mxu1 %v8275_v63 }
 0x71d   : > { %7606 = vmatprep.subr.bf16.mxu1 %v8387_v48 }
 0x720   : > { %7607 = vmatpush3.bf16.msra.mxu1 %v8276_v39 }
 0x721   : > { %7608 = vmatprep.subr.bf16.mxu1 %v8387_v48 }
 0x724   : > { %7609 = vmatpush3.bf16.msra.mxu1 %v8277_v9 }
 0x725   : > { %7610 = vmatprep.subr.bf16.mxu1 %v8387_v48 }
 0x728   : > { %7611 = vmatpush3.bf16.msra.mxu1 %v8278_v32 }
 0x729   : > { %7616 = vmatprep.subr.bf16.mxu1 %v8387_v48 }
 0x72b   : > { %7613 = vmatmul.mubr.bf16.vlgmr.msra.gmra.mrb[100].mxu1 %v5143_v37 }
 0x72c   : > { %7617 = vmatpush3.bf16.msra.mxu1 %v8279_v13  ;;  %7632 = vmatprep.mubr.msk.bf16.mxu1 %vm8388_vm6, %v8387_v48 }
 0x72d   : > { %7618 = vmatprep.subr.bf16.mxu1 %v8387_v48 }
 0x730   : > { %7619 = vmatpush3.bf16.msra.mxu1 %v8280_v14 }
 0x731   : > { %7620 = vmatprep.subr.bf16.mxu1 %v8387_v48 }
 0x734   : > { %7621 = vmatpush3.bf16.msra.mxu1 %v8281_v45 }
 0x735   : > { %7622 = vmatprep.subr.bf16.mxu1 %v8387_v48 }
 0x738   : > { %7623 = vmatpush3.bf16.msra.mxu1 %v8282_v62 }
 0x739   : > { %7624 = vmatprep.subr.bf16.mxu1 %v8387_v48 }
 0x73c   : > { %7625 = vmatpush3.bf16.msra.mxu1 %v8283_v43 }
 0x73d   : > { %7626 = vmatprep.subr.bf16.mxu1 %v8387_v48 }
 0x740   : > { %7627 = vmatpush3.bf16.msra.mxu1 %v8284_v29 }
 0x741   : > { %7628 = vmatprep.subr.bf16.mxu1 %v8387_v48 }
 0x744   : > { %7629 = vmatpush3.bf16.msra.mxu1 %v8285_v18 }
 0x745   : > { %7630 = vmatprep.subr.bf16.mxu1 %v8387_v48 }
 0x748   : > { %7631 = vmatpush3.bf16.msra.mxu1 %v8286_v6 }
 0x749   : > { %7636 = vmatprep.subr.bf16.mxu1 %v8387_v48 }
 0x74b   : > { %7633 = vmatmul.mubr.bf16.vlgmr.msra.gmra.mrb[100].mxu1 %v5251_v28 }
 0x74c   : > { %7637 = vmatpush3.bf16.msra.mxu1 %v8287_v12  ;;  %7652 = vmatprep.mubr.msk.bf16.mxu1 %vm8388_vm6, %v8387_v48 }
 0x74d   : > { %7638 = vmatprep.subr.bf16.mxu1 %v8387_v48 }
 0x750   : > { %7639 = vmatpush3.bf16.msra.mxu1 %v8288_v49 }
 0x751   : > { %7640 = vmatprep.subr.bf16.mxu1 %v8387_v48 }
 0x754   : > { %7641 = vmatpush3.bf16.msra.mxu1 %v8289_v56 }
 0x755   : > { %7642 = vmatprep.subr.bf16.mxu1 %v8387_v48 }
 0x758   : > { %7643 = vmatpush3.bf16.msra.mxu1 %v8290_v20 }
 0x759   : > { %7644 = vmatprep.subr.bf16.mxu1 %v8387_v48 }
 0x75c   : > { %7645 = vmatpush3.bf16.msra.mxu1 %v8291_v8 }
 0x75d   : > { %7646 = vmatprep.subr.bf16.mxu1 %v8387_v48 }
 0x760   : > { %7647 = vmatpush3.bf16.msra.mxu1 %v8292_v58 }
 0x761   : > { %7648 = vmatprep.subr.bf16.mxu1 %v8387_v48 }
 0x764   : > { %7649 = vmatpush3.bf16.msra.mxu1 %v8293_v3 }
 0x765   : > { %7650 = vmatprep.subr.bf16.mxu1 %v8387_v48 }
 0x768   : > { %7651 = vmatpush3.bf16.msra.mxu1 %v8294_v33 }
 0x769   : > { %7656 = vmatprep.subr.bf16.mxu1 %v8387_v48 }
 0x76b   : > { %7653 = vmatmul.mubr.bf16.vlgmr.msra.gmra.mrb[100].mxu1 %v3937_v44 }
 0x76c   : > { %7657 = vmatpush3.bf16.msra.mxu1 %v8295_v57  ;;  %7672 = vmatprep.mubr.msk.bf16.mxu1 %vm8388_vm6, %v8387_v48 }
 0x76d   : > { %7658 = vmatprep.subr.bf16.mxu1 %v8387_v48 }
 0x770   : > { %7659 = vmatpush3.bf16.msra.mxu1 %v8296_v51 }
 0x771   : > { %7660 = vmatprep.subr.bf16.mxu1 %v8387_v48 }
 0x774   : > { %7661 = vmatpush3.bf16.msra.mxu1 %v8297_v21 }
 0x775   : > { %7662 = vmatprep.subr.bf16.mxu1 %v8387_v48 }
 0x778   : > { %7663 = vmatpush3.bf16.msra.mxu1 %v8298_v34 }
 0x779   : > { %7664 = vmatprep.subr.bf16.mxu1 %v8387_v48 }
 0x77c   : > { %7665 = vmatpush3.bf16.msra.mxu1 %v8299_v5 }
 0x77d   : > { %7666 = vmatprep.subr.bf16.mxu1 %v8387_v48 }
 0x780   : > { %7667 = vmatpush3.bf16.msra.mxu1 %v8300_v30 }
 0x781   : > { %7668 = vmatprep.subr.bf16.mxu1 %v8387_v48 }
 0x784   : > { %7669 = vmatpush3.bf16.msra.mxu1 %v8301_v60 }
 0x785   : > { %7670 = vmatprep.subr.bf16.mxu1 %v8387_v48 }
 0x788   : > { %7671 = vmatpush3.bf16.msra.mxu1 %v8302_v4 }
 0x789   : > { %7676 = vmatprep.subr.bf16.mxu1 %v8387_v48 }
 0x78b   : > { %7673 = vmatmul.mubr.bf16.vlgmr.msra.gmra.mrb[100].mxu1 %v5466_v35 }
 0x78c   : > { %7677 = vmatpush3.bf16.msra.mxu1 %v8303_v36  ;;  %7692 = vmatprep.mubr.msk.bf16.mxu1 %vm8388_vm6, %v8387_v48 }
 0x78d   : > { %7678 = vmatprep.subr.bf16.mxu1 %v8387_v48 }
 0x790   : > { %7679 = vmatpush3.bf16.msra.mxu1 %v8304_v54 }
 0x791   : > { %7680 = vmatprep.subr.bf16.mxu1 %v8387_v48 }
 0x794   : > { %7681 = vmatpush3.bf16.msra.mxu1 %v8305_v38 }
 0x795   : > { %7682 = vmatprep.subr.bf16.mxu1 %v8387_v48 }
 0x798   : > { %7683 = vmatpush3.bf16.msra.mxu1 %v8306_v1 }
 0x799   : > { %7684 = vmatprep.subr.bf16.mxu1 %v8387_v48 }
 0x79c   : > { %7685 = vmatpush3.bf16.msra.mxu1 %v8307_v7 }
 0x79d   : > { %7686 = vmatprep.subr.bf16.mxu1 %v8387_v48 }
 0x7a0   : > { %7687 = vmatpush3.bf16.msra.mxu1 %v8308_v15 }
 0x7a1   : > { %7688 = vmatprep.subr.bf16.mxu1 %v8387_v48 }
 0x7a4   : > { %7689 = vmatpush3.bf16.msra.mxu1 %v8309_v17 }
 0x7a5   : > { %7690 = vmatprep.subr.bf16.mxu1 %v8387_v48 }
 0x7a8   : > { %7691 = vmatpush3.bf16.msra.mxu1 %v8310_v50 }
 0x7ab   : > { %7693 = vmatmul.mubr.bf16.vlgmr.msra.gmra.mrb[100].mxu1 %v5576_v40 }
 0x87e   : > { %v5660_v42 = vpop.f32.mrb[100].mxu1 }
 0x87f   : > { %v7744_v46 = vadd.f32 %v5660_v42, %v307_v26  ;;  %v7694_v10 = vpop.f32.mrb[101].mxu1 }
 0x880   : > { %v5663_v19 = vpop.f32.mrb[102].mxu1 }
 0x881   : > { %v5667_v27 = vmax.f32 %v7744_v46, 0.0  ;;  %v7695_v16 = vpop.f32.mrb[103].mxu1 }
 0x883   : > { %v5668_v11 = vpack.c.bf16 %v5667_v27, %v5667_v27 }
 0x885   : > { %7713 = vmatmul.mubr.bf16.vlgmr.msra.gmra.mrb[84].mxu0 %v5668_v11 }
 0x958   : > { %v5767_v48 = vpop.f32.mrb[84].mxu0 }
 0x959   : > { %v5768_v52 = vadd.f32 %v5767_v48, %v308_v23  ;;  %v7714_v22 = vpop.f32.mrb[85].mxu0 }
 0x95a   : > { %v5770_v31 = vpop.f32.mrb[86].mxu0 }
 0x95b   : > { %5773 = vst [vmem:[%s297_s20] sm:$0x1] %v5768_v52  ;;  %v7715_v25 = vpop.f32.mrb[87].mxu0 }
 0x95c   : > { %8334 = shalt.err (!%p8331_p3)
}
 0x95d   : > { %s8335_s12 = scalar_lea.hbm %s10493_s23, 16  ;;  %s8339_s19 = scalar_lea.hbm %s10543_s8, 32 }
 0x95e   : > { %p8336_p4 = scmp.ne.s32.totalorder %s10493_s23, %s8335_s12  ;;  %p8340_p9 = scmp.lt.u32.totalorder %s10493_s23, %s10543_s8 }
 0x95f   : > { %p8341_p10 = scmp.lt.u32.totalorder %s8339_s19, %s8335_s12  ;;  %p8343_p12 = scmp.lt.u32.totalorder %s8335_s12, %s10493_s23 }
 0x960   : > { %p8337_p7 = pnand %p8336_p4, %p8473_p5 }
 0x961   : > { %p8342_p11 = por %p8341_p10, %p8340_p9 }
 0x962   : > { %p8338_p8 = pneg %p8337_p7 }
 0x963   : > { %p8344_p13 = por %p8343_p12, %p8342_p11 }
 0x965   : > { %p8345_p0 = pnand %p8344_p13, %p8338_p8 }
 0x967   : > { %8348 = shalt.err (!%p8345_p0)
}
 0x968   : > { %7866 = dma.vmem_to_hbm [thread:$0]  (%p8473_p5), %s10495_s13, 16, %s10493_s23, %s5775_s24  }
 0x969 PF: > { %p7872_p1 = scmp.ge.s32.totalorder %s8383_s30, 2  ;;  %s5799_s22 = sand.u32 1, %s8371_s27  }
 0x96a   : > { %s5800_s9 = scalar_lea.sflag [#allocation3], %s5799_s22 }
 0x96b   : > { %p7869_p2 = pnand %p7872_p1, %p8477_p6 }
 0x96d   : > { %8366 = dma.done.wait (!%p7869_p2), %s5800_s9, 16  }
 0x96e   : > { %8368 = vsyncadd (!%p7869_p2), %s5800_s9, 4294967280  ;;  %p18_p3 = scmp.ge.s32.totalorder %s8460_s11, 4   ;;  %s10554_s27 = smov %s8375_s28 }
 0x96f   : > { %s10555_s28 = smov %s8379_s29  ;;  %s10556_s29 = smov %s8471_s14 }
 0x970   : > { %s10557_s30 = smov %s8460_s11  ;;  %20 = sbr.rel (!%p18_p3) target bundleno = 3 (0x3), region = 117 }
 0x977   :  { %5804 = vsyncpa [#allocation3], 1 }
 0x978   :  { %5806 = vsyncpa [#allocation3 + $0x1], 1 }

</bundles_post_ra>
